<compile_context>
chip_gen: v6e
topology: v6e:2x2x1
jax: 0.10.0
libtpu: 0.0.40
codegen_flags: <defaults>
</compile_context>

<pallas_src>
import math

import jax
import jax.numpy as jnp
from jax.experimental import pallas as pl
from jax.experimental.pallas import tpu as pltpu

# ---- model dimensions (small, consistent with the module's forward) ----
B = 8              # number of graph nodes (batch)
S = 16             # sequence length (power of two -> shift instead of div)
H = 64             # hidden size
NUM_HEADS = 4
HEAD_DIM = H // NUM_HEADS
FFN = 128          # intermediate size
VOCAB = 101
VOCAB_PAD = 128    # vocab padded to a full lane width for the one-hot matmul
NUM_CLASSES = 4
C_PAD = 128        # logits padded to a full lane width (unmasked stores)
BS = B * S         # 128 flattened rows -> full MXU row occupancy
LN_EPS = 1e-12

assert S & (S - 1) == 0, "S must be a power of two for the shift-based node id"
_LOG2_S = S.bit_length() - 1

# ---- packed vector slab: one (16, 192) f32 array, one vector per row ----
R_LN_E_G, R_LN_E_B = 0, 1
R_B_QKV = 2
R_BO = 3
R_LN_A_G, R_LN_A_B = 4, 5
R_B1 = 6
R_B2 = 7
R_LN_F_G, R_LN_F_B = 8, 9
R_BP = 10
R_BC = 11
VEC_ROWS = 16
VEC_COLS = 3 * H                      # 192

# ---- packed 64-row weight slab: one (64, 576) bf16 array, column ranges ----
C_QKV = 0                             # (64, 192)  fused QKV (Q pre-scaled)
C_WO = C_QKV + 3 * H                  # (64, 64)   attention output
C_W1 = C_WO + H                       # (64, 128)  FFN up
C_WP = C_W1 + FFN                     # (64, 64)   pooler
C_WC = C_WP + H                       # (64, 128)  classifier (lane-padded)
W64_COLS = C_WC + C_PAD               # 576


def _layer_norm(x, gamma, beta):
    mean = jnp.mean(x, axis=-1, keepdims=True)
    var = jnp.mean(jnp.square(x - mean), axis=-1, keepdims=True)
    return (x - mean) * jax.lax.rsqrt(var + LN_EPS) * gamma + beta


# -------------------------------------------------------------------------
# Single fused kernel: embeddings -> encoder layer -> pooler/graph/classifier
# Grid-less call: every operand is a full-array VMEM ref (no pipelining).
# -------------------------------------------------------------------------
def hyperbert_fused_kernel(ids_ref, keep_ref, adj_ref, pos_ref,
                           w64_ref, w128_ref, vec_ref, logits_ref):
    f32, bf16 = jnp.float32, jnp.bfloat16

    def vec(row, width):
        # static (1, width) slice of the packed bias/LN slab — free at runtime
        return vec_ref[row:row + 1, :width]

    # ---- token embedding: one-hot (BS, VOCAB_PAD) @ table (VOCAB_PAD, H) ----
    ids = ids_ref[...]                                               # (BS, 1) int32
    vocab_iota = jax.lax.broadcasted_iota(jnp.int32, (BS, VOCAB_PAD), 1)
    one_hot = jnp.where(vocab_iota == ids, 1.0, 0.0).astype(bf16)    # exact 0/1
    emb = jnp.dot(one_hot, w128_ref[:, :H], preferred_element_type=f32)

    x = emb + pos_ref[...]                                           # pos pre-tiled (BS, H)
    x = _layer_norm(x, vec(R_LN_E_G, H), vec(R_LN_E_B, H))           # embedding LN (f32)

    # ---- fused QKV projection (Q columns pre-scaled by 1/sqrt(hd)) ----
    qkv = (jnp.dot(x.astype(bf16), w64_ref[:, C_QKV:C_QKV + 3 * H],
                   preferred_element_type=f32)
           + vec(R_B_QKV, 3 * H)).astype(bf16)                       # (BS, 3H) bf16, cast once
    q = qkv[:, 0 * H:1 * H]
    k = qkv[:, 1 * H:2 * H]
    v = qkv[:, 2 * H:3 * H]

    # Block-diagonal (per-node) + key-padding additive mask, built once in bf16.
    row_i = jax.lax.broadcasted_iota(jnp.int32, (BS, BS), 0)
    col_j = jax.lax.broadcasted_iota(jnp.int32, (BS, BS), 1)
    same_node = (jax.lax.shift_right_logical(row_i, _LOG2_S) ==
                 jax.lax.shift_right_logical(col_j, _LOG2_S))
    valid = jnp.logical_and(same_node, keep_ref[...] > 0.0)          # (BS, BS)
    bias = jnp.where(valid, 0.0, -1e9).astype(bf16)                  # 0 valid, -1e9 masked

    dn_qkT = (((1,), (1,)), ((), ()))                                # contract last dims: q @ k^T
    ctx_heads = []
    for h in range(NUM_HEADS):                                       # static 4-iteration loop
        sl = slice(h * HEAD_DIM, (h + 1) * HEAD_DIM)
        s = jax.lax.dot_general(q[:, sl], k[:, sl], dn_qkT,
                                preferred_element_type=f32) + bias   # (BS, BS) f32
        s = s - jnp.max(s, axis=-1, keepdims=True)
        p = jnp.exp(s)
        # TODO(synk): approx EUP reciprocal -> softmax rows sum to 1 within ~1e-3.
        p = p * pl.reciprocal(jnp.sum(p, axis=-1, keepdims=True), approx=True)
        ctx_heads.append(jnp.dot(p.astype(bf16), v[:, sl],
                                 preferred_element_type=f32).astype(bf16))
    ctx = jnp.concatenate(ctx_heads, axis=-1)                        # (BS, H) bf16
    attn_out = jnp.dot(ctx, w64_ref[:, C_WO:C_WO + H],
                       preferred_element_type=f32) + vec(R_BO, H)    # one K=64 matmul
    x = _layer_norm(x + attn_out, vec(R_LN_A_G, H), vec(R_LN_A_B, H))

    # ---- FFN: dense -> GELU -> dense + residual LN ----
    hdn = jnp.dot(x.astype(bf16), w64_ref[:, C_W1:C_W1 + FFN],
                  preferred_element_type=f32) + vec(R_B1, FFN)
    # TODO(synk): BERT uses exact erf-GELU; tanh approximation differs by ~1e-3.
    hdn = jax.nn.gelu(hdn, approximate=True)
    ffo = jnp.dot(hdn.astype(bf16), w128_ref[:, H:],
                  preferred_element_type=f32) + vec(R_B2, H)
    x = _layer_norm(x + ffo, vec(R_LN_F_G, H), vec(R_LN_F_B, H))

    # ---- CLS extraction as a one-hot selection matmul (rows 0, S, 2S, ...) ----
    sel_r = jax.lax.broadcasted_iota(jnp.int32, (B, BS), 0)
    sel_c = jax.lax.broadcasted_iota(jnp.int32, (B, BS), 1)
    sel = jnp.where(sel_c == sel_r * S, 1.0, 0.0).astype(bf16)       # (B, BS)
    cls = jnp.dot(sel, x.astype(bf16), preferred_element_type=f32)   # (B, H)

    # ---- pooler (tanh dense) + graph message passing + classifier ----
    pooled = jnp.tanh(jnp.dot(cls.astype(bf16), w64_ref[:, C_WP:C_WP + H],
                              preferred_element_type=f32) + vec(R_BP, H))
    enc = pooled + jnp.dot(adj_ref[...], pooled.astype(bf16),        # bf16 MXU pass
                           preferred_element_type=f32)
    logits = jnp.dot(enc.astype(bf16), w64_ref[:, C_WC:C_WC + C_PAD],
                     preferred_element_type=f32) + vec(R_BC, C_PAD)  # (B, C_PAD)
    logits_ref[...] = logits.astype(logits_ref.dtype)                # raw logits


# -------------------------------------------------------------------------
# Wrapper (jitted: glue ops, the pallas_call and the final slice all fuse)
# -------------------------------------------------------------------------
_VMEM_SPEC = pl.BlockSpec(memory_space=pltpu.MemorySpace.VMEM)


@jax.jit
def hyperbert_with_classifier_forward(params, input_ids, attention_mask, adjacency):
    """Pallas-backed equivalent of HyperBertWithClassifier.forward(kwargs)."""
    ids2 = input_ids.reshape(BS, 1).astype(jnp.int32)
    keep = attention_mask.astype(jnp.float32).reshape(1, BS)
    adj = adjacency.astype(jnp.bfloat16)

    logits_pad = pl.pallas_call(
        hyperbert_fused_kernel,
        out_shape=jax.ShapeDtypeStruct((B, C_PAD), jnp.float32),
        in_specs=[_VMEM_SPEC] * 7,
        out_specs=_VMEM_SPEC,
    )(ids2, keep, adj,
      params["pos"], params["w64"], params["w128"], params["vec"])

    return logits_pad[:, :NUM_CLASSES]                               # (B, C)


# -------------------------------------------------------------------------
# Deterministic parameter construction (packed slabs, scale fold, pos tiling)
# -------------------------------------------------------------------------
def init_params(key):
    ks = jax.random.split(key, 10)
    std = 0.02
    f32, bf16 = jnp.float32, jnp.bfloat16

    def dense(k, shape):
        return std * jax.random.normal(k, shape, f32)

    word = dense(ks[0], (VOCAB, H))
    word_pad = jnp.zeros((VOCAB_PAD, H), f32).at[:VOCAB].set(word)

    pos = dense(ks[1], (S, H))
    pos_tiled = jnp.tile(pos, (B, 1))                                # hoisted out of forward

    scale = 1.0 / math.sqrt(HEAD_DIM)
    wq, wk, wv = dense(ks[2], (H, H)), dense(ks[3], (H, H)), dense(ks[4], (H, H))
    w_qkv = jnp.concatenate([wq * scale, wk, wv], axis=1)            # 1/sqrt(hd) folded into Q
    b_qkv = jnp.zeros((3 * H,), f32)                                 # scale fold is a no-op on zeros

    wo = dense(ks[5], (H, H))
    w1 = dense(ks[6], (H, FFN))
    w2 = dense(ks[7], (FFN, H))
    wp = dense(ks[8], (H, H))
    wc = dense(ks[9], (H, NUM_CLASSES))
    wc_pad = jnp.zeros((H, C_PAD), f32).at[:, :NUM_CLASSES].set(wc)

    # packed weight slabs
    w64 = jnp.concatenate([w_qkv, wo, w1, wp, wc_pad], axis=1).astype(bf16)   # (64, 576)
    w128 = jnp.concatenate([word_pad, w2], axis=1).astype(bf16)               # (128, 128)

    # packed LN/bias slab (rows not set stay zero: LN betas and all dense biases)
    vec = jnp.zeros((VEC_ROWS, VEC_COLS), f32)
    ones_h = jnp.ones((H,), f32)
    vec = vec.at[R_LN_E_G, :H].set(ones_h)
    vec = vec.at[R_LN_A_G, :H].set(ones_h)
    vec = vec.at[R_LN_F_G, :H].set(ones_h)
    vec = vec.at[R_B_QKV, :3 * H].set(b_qkv)

    return {"pos": pos_tiled, "w64": w64, "w128": w128, "vec": vec}


if __name__ == "__main__":
    root = jax.random.PRNGKey(0)
    k_param, k_ids, k_adj = jax.random.split(root, 3)

    params = init_params(k_param)

    # node token ids, with trailing padding on half the nodes
    input_ids = jax.random.randint(k_ids, (B, S), 0, VOCAB, dtype=jnp.int32)
    attention_mask = jnp.ones((B, S), jnp.float32)
    attention_mask = attention_mask.at[::2, -4:].set(0.0)

    # symmetric graph adjacency with self-loops, row-normalized
    a = (jax.random.uniform(k_adj, (B, B)) > 0.6).astype(jnp.float32)
    a = jnp.maximum(a, a.T) + jnp.eye(B, dtype=jnp.float32)
    adjacency = a / jnp.sum(a, axis=-1, keepdims=True)

    logits = hyperbert_with_classifier_forward(params, input_ids, attention_mask, adjacency)
    logits = jax.block_until_ready(logits)

    assert logits.shape == (B, NUM_CLASSES)
    assert bool(jnp.all(jnp.isfinite(logits)))
    print("KERNEL_OK")
</pallas_src>

<mosaic_0001>
module attributes {stable_mosaic.version = 11 : i64} {
  func.func @hyperbert_fused_kernel(%arg0: memref<128x1xi32, #tpu.memory_space<vmem>>, %arg1: memref<1x128xf32, #tpu.memory_space<vmem>>, %arg2: memref<8x8xbf16, #tpu.memory_space<vmem>>, %arg3: memref<128x64xf32, #tpu.memory_space<vmem>>, %arg4: memref<64x576xbf16, #tpu.memory_space<vmem>>, %arg5: memref<128x128xbf16, #tpu.memory_space<vmem>>, %arg6: memref<16x192xf32, #tpu.memory_space<vmem>>, %arg7: memref<8x128xf32, #tpu.memory_space<vmem>>) attributes {dimension_semantics = [], scalar_prefetch = 0 : i64, scratch_operands = 0 : i64, tpu.core_type = #tpu.core_type<tc>} {
    %c0 = arith.constant 0 : index
    %c0_0 = arith.constant 0 : index
    %0 = vector.load %arg0[%c0, %c0_0] : memref<128x1xi32, #tpu.memory_space<vmem>>, vector<128x1xi32>
    %1 = tpu.iota {dimensions = array<i32: 1>} : vector<128x128xi32>
    %2 = vector.broadcast %0 : vector<128x1xi32> to vector<128x128xi32>
    %3 = arith.cmpi eq, %1, %2 : vector<128x128xi32>
    %cst = arith.constant 1.000000e+00 : f32
    %cst_1 = arith.constant 0.000000e+00 : f32
    %4 = vector.broadcast %cst : f32 to vector<128x128xf32>
    %5 = vector.broadcast %cst_1 : f32 to vector<128x128xf32>
    %6 = arith.select %3, %4, %5 : vector<128x128xi1>, vector<128x128xf32>
    %7 = arith.truncf %6 : vector<128x128xf32> to vector<128x128xbf16>
    %c0_2 = arith.constant 0 : index
    %c0_3 = arith.constant 0 : index
    %8 = vector.load %arg5[%c0_2, %c0_3] : memref<128x128xbf16, #tpu.memory_space<vmem>>, vector<128x64xbf16>
    %cst_4 = arith.constant dense<0.000000e+00> : vector<128x64xf32>
    %9 = tpu.matmul %7, %8, %cst_4 {dimension_numbers = #tpu.dot_dimension_numbers<[1], [0], [0], [1], [0, 0, 1, 1], [], []>} : vector<128x128xbf16>, vector<128x64xbf16>, vector<128x64xf32> -> vector<128x64xf32>
    %c0_5 = arith.constant 0 : index
    %c0_6 = arith.constant 0 : index
    %10 = vector.load %arg3[%c0_5, %c0_6] : memref<128x64xf32, #tpu.memory_space<vmem>>, vector<128x64xf32>
    %11 = arith.addf %9, %10 : vector<128x64xf32>
    %c0_7 = arith.constant 0 : index
    %c0_8 = arith.constant 0 : index
    %12 = vector.load %arg6[%c0_7, %c0_8] : memref<16x192xf32, #tpu.memory_space<vmem>>, vector<1x64xf32>
    %c1 = arith.constant 1 : index
    %c0_9 = arith.constant 0 : index
    %13 = vector.load %arg6[%c1, %c0_9] : memref<16x192xf32, #tpu.memory_space<vmem>>, vector<1x64xf32>
    %cst_10 = arith.constant dense<0.000000e+00> : vector<128xf32>
    %14 = vector.multi_reduction <add>, %11, %cst_10 [1] : vector<128x64xf32> to vector<128xf32>
    %15 = vector.shape_cast %14 : vector<128xf32> to vector<128x1xf32>
    %cst_11 = arith.constant 6.400000e+01 : f32
    %16 = vector.broadcast %cst_11 : f32 to vector<128x1xf32>
    %17 = arith.divf %15, %16 : vector<128x1xf32>
    %18 = vector.broadcast %17 : vector<128x1xf32> to vector<128x64xf32>
    %19 = arith.subf %11, %18 : vector<128x64xf32>
    %20 = arith.mulf %19, %19 : vector<128x64xf32>
    %cst_12 = arith.constant dense<0.000000e+00> : vector<128xf32>
    %21 = vector.multi_reduction <add>, %20, %cst_12 [1] : vector<128x64xf32> to vector<128xf32>
    %22 = vector.shape_cast %21 : vector<128xf32> to vector<128x1xf32>
    %cst_13 = arith.constant 6.400000e+01 : f32
    %23 = vector.broadcast %cst_13 : f32 to vector<128x1xf32>
    %24 = arith.divf %22, %23 : vector<128x1xf32>
    %25 = vector.broadcast %17 : vector<128x1xf32> to vector<128x64xf32>
    %26 = arith.subf %11, %25 : vector<128x64xf32>
    %cst_14 = arith.constant 9.99999996E-13 : f32
    %27 = vector.broadcast %cst_14 : f32 to vector<128x1xf32>
    %28 = arith.addf %24, %27 : vector<128x1xf32>
    %29 = math.rsqrt %28 : vector<128x1xf32>
    %30 = vector.broadcast %29 : vector<128x1xf32> to vector<128x64xf32>
    %31 = arith.mulf %26, %30 : vector<128x64xf32>
    %32 = vector.broadcast %12 : vector<1x64xf32> to vector<128x64xf32>
    %33 = arith.mulf %31, %32 : vector<128x64xf32>
    %34 = vector.broadcast %13 : vector<1x64xf32> to vector<128x64xf32>
    %35 = arith.addf %33, %34 : vector<128x64xf32>
    %36 = arith.truncf %35 : vector<128x64xf32> to vector<128x64xbf16>
    %c0_15 = arith.constant 0 : index
    %c0_16 = arith.constant 0 : index
    %37 = vector.load %arg4[%c0_15, %c0_16] : memref<64x576xbf16, #tpu.memory_space<vmem>>, vector<64x192xbf16>
    %cst_17 = arith.constant dense<0.000000e+00> : vector<128x192xf32>
    %38 = tpu.matmul %36, %37, %cst_17 {dimension_numbers = #tpu.dot_dimension_numbers<[1], [0], [0], [1], [0, 0, 1, 1], [], []>} : vector<128x64xbf16>, vector<64x192xbf16>, vector<128x192xf32> -> vector<128x192xf32>
    %c2 = arith.constant 2 : index
    %c0_18 = arith.constant 0 : index
    %39 = vector.load %arg6[%c2, %c0_18] : memref<16x192xf32, #tpu.memory_space<vmem>>, vector<1x192xf32>
    %40 = vector.broadcast %39 : vector<1x192xf32> to vector<128x192xf32>
    %41 = arith.addf %38, %40 : vector<128x192xf32>
    %42 = arith.truncf %41 : vector<128x192xf32> to vector<128x192xbf16>
    %43 = vector.extract_strided_slice %42 {offsets = [0, 0], sizes = [128, 64], strides = [1, 1]} : vector<128x192xbf16> to vector<128x64xbf16>
    %44 = vector.extract_strided_slice %42 {offsets = [0, 64], sizes = [128, 64], strides = [1, 1]} : vector<128x192xbf16> to vector<128x64xbf16>
    %45 = vector.extract_strided_slice %42 {offsets = [0, 128], sizes = [128, 64], strides = [1, 1]} : vector<128x192xbf16> to vector<128x64xbf16>
    %46 = tpu.iota {dimensions = array<i32: 0>} : vector<128x128xi32>
    %47 = tpu.iota {dimensions = array<i32: 1>} : vector<128x128xi32>
    %c4_i32 = arith.constant 4 : i32
    %48 = vector.broadcast %c4_i32 : i32 to vector<128x128xi32>
    %49 = arith.shrui %46, %48 : vector<128x128xi32>
    %c4_i32_19 = arith.constant 4 : i32
    %50 = vector.broadcast %c4_i32_19 : i32 to vector<128x128xi32>
    %51 = arith.shrui %47, %50 : vector<128x128xi32>
    %52 = arith.cmpi eq, %49, %51 : vector<128x128xi32>
    %c0_20 = arith.constant 0 : index
    %c0_21 = arith.constant 0 : index
    %53 = vector.load %arg1[%c0_20, %c0_21] : memref<1x128xf32, #tpu.memory_space<vmem>>, vector<1x128xf32>
    %cst_22 = arith.constant 0.000000e+00 : f32
    %54 = vector.broadcast %cst_22 : f32 to vector<1x128xf32>
    %55 = arith.cmpf ogt, %53, %54 : vector<1x128xf32>
    %56 = vector.broadcast %55 : vector<1x128xi1> to vector<128x128xi1>
    %57 = arith.andi %52, %56 : vector<128x128xi1>
    %cst_23 = arith.constant 0.000000e+00 : f32
    %cst_24 = arith.constant -1.000000e+09 : f32
    %58 = vector.broadcast %cst_23 : f32 to vector<128x128xf32>
    %59 = vector.broadcast %cst_24 : f32 to vector<128x128xf32>
    %60 = arith.select %57, %58, %59 : vector<128x128xi1>, vector<128x128xf32>
    %61 = arith.truncf %60 : vector<128x128xf32> to vector<128x128xbf16>
    %62 = vector.extract_strided_slice %43 {offsets = [0, 0], sizes = [128, 16], strides = [1, 1]} : vector<128x64xbf16> to vector<128x16xbf16>
    %63 = vector.extract_strided_slice %44 {offsets = [0, 0], sizes = [128, 16], strides = [1, 1]} : vector<128x64xbf16> to vector<128x16xbf16>
    %cst_25 = arith.constant dense<0.000000e+00> : vector<128x128xf32>
    %64 = tpu.matmul %62, %63, %cst_25 {dimension_numbers = #tpu.dot_dimension_numbers<[1], [1], [0], [0], [0, 0, 1, 0], [], []>} : vector<128x16xbf16>, vector<128x16xbf16>, vector<128x128xf32> -> vector<128x128xf32>
    %65 = arith.extf %61 : vector<128x128xbf16> to vector<128x128xf32>
    %66 = arith.addf %64, %65 : vector<128x128xf32>
    %cst_26 = arith.constant dense<0xFF800000> : vector<128xf32>
    %67 = vector.multi_reduction <maximumf>, %66, %cst_26 [1] : vector<128x128xf32> to vector<128xf32>
    %68 = vector.shape_cast %67 : vector<128xf32> to vector<128x1xf32>
    %69 = vector.broadcast %68 : vector<128x1xf32> to vector<128x128xf32>
    %70 = arith.subf %66, %69 : vector<128x128xf32>
    %71 = math.exp %70 : vector<128x128xf32>
    %cst_27 = arith.constant dense<0.000000e+00> : vector<128xf32>
    %72 = vector.multi_reduction <add>, %71, %cst_27 [1] : vector<128x128xf32> to vector<128xf32>
    %73 = vector.shape_cast %72 : vector<128xf32> to vector<128x1xf32>
    %74 = tpu.reciprocal %73 {approx = true} : vector<128x1xf32> -> vector<128x1xf32>
    %75 = vector.broadcast %74 : vector<128x1xf32> to vector<128x128xf32>
    %76 = arith.mulf %71, %75 : vector<128x128xf32>
    %77 = arith.truncf %76 : vector<128x128xf32> to vector<128x128xbf16>
    %78 = vector.extract_strided_slice %45 {offsets = [0, 0], sizes = [128, 16], strides = [1, 1]} : vector<128x64xbf16> to vector<128x16xbf16>
    %cst_28 = arith.constant dense<0.000000e+00> : vector<128x16xf32>
    %79 = tpu.matmul %77, %78, %cst_28 {dimension_numbers = #tpu.dot_dimension_numbers<[1], [0], [0], [1], [0, 0, 1, 1], [], []>} : vector<128x128xbf16>, vector<128x16xbf16>, vector<128x16xf32> -> vector<128x16xf32>
    %80 = arith.truncf %79 : vector<128x16xf32> to vector<128x16xbf16>
    %81 = vector.extract_strided_slice %43 {offsets = [0, 16], sizes = [128, 16], strides = [1, 1]} : vector<128x64xbf16> to vector<128x16xbf16>
    %82 = vector.extract_strided_slice %44 {offsets = [0, 16], sizes = [128, 16], strides = [1, 1]} : vector<128x64xbf16> to vector<128x16xbf16>
    %cst_29 = arith.constant dense<0.000000e+00> : vector<128x128xf32>
    %83 = tpu.matmul %81, %82, %cst_29 {dimension_numbers = #tpu.dot_dimension_numbers<[1], [1], [0], [0], [0, 0, 1, 0], [], []>} : vector<128x16xbf16>, vector<128x16xbf16>, vector<128x128xf32> -> vector<128x128xf32>
    %84 = arith.extf %61 : vector<128x128xbf16> to vector<128x128xf32>
    %85 = arith.addf %83, %84 : vector<128x128xf32>
    %cst_30 = arith.constant dense<0xFF800000> : vector<128xf32>
    %86 = vector.multi_reduction <maximumf>, %85, %cst_30 [1] : vector<128x128xf32> to vector<128xf32>
    %87 = vector.shape_cast %86 : vector<128xf32> to vector<128x1xf32>
    %88 = vector.broadcast %87 : vector<128x1xf32> to vector<128x128xf32>
    %89 = arith.subf %85, %88 : vector<128x128xf32>
    %90 = math.exp %89 : vector<128x128xf32>
    %cst_31 = arith.constant dense<0.000000e+00> : vector<128xf32>
    %91 = vector.multi_reduction <add>, %90, %cst_31 [1] : vector<128x128xf32> to vector<128xf32>
    %92 = vector.shape_cast %91 : vector<128xf32> to vector<128x1xf32>
    %93 = tpu.reciprocal %92 {approx = true} : vector<128x1xf32> -> vector<128x1xf32>
    %94 = vector.broadcast %93 : vector<128x1xf32> to vector<128x128xf32>
    %95 = arith.mulf %90, %94 : vector<128x128xf32>
    %96 = arith.truncf %95 : vector<128x128xf32> to vector<128x128xbf16>
    %97 = vector.extract_strided_slice %45 {offsets = [0, 16], sizes = [128, 16], strides = [1, 1]} : vector<128x64xbf16> to vector<128x16xbf16>
    %cst_32 = arith.constant dense<0.000000e+00> : vector<128x16xf32>
    %98 = tpu.matmul %96, %97, %cst_32 {dimension_numbers = #tpu.dot_dimension_numbers<[1], [0], [0], [1], [0, 0, 1, 1], [], []>} : vector<128x128xbf16>, vector<128x16xbf16>, vector<128x16xf32> -> vector<128x16xf32>
    %99 = arith.truncf %98 : vector<128x16xf32> to vector<128x16xbf16>
    %100 = vector.extract_strided_slice %43 {offsets = [0, 32], sizes = [128, 16], strides = [1, 1]} : vector<128x64xbf16> to vector<128x16xbf16>
    %101 = vector.extract_strided_slice %44 {offsets = [0, 32], sizes = [128, 16], strides = [1, 1]} : vector<128x64xbf16> to vector<128x16xbf16>
    %cst_33 = arith.constant dense<0.000000e+00> : vector<128x128xf32>
    %102 = tpu.matmul %100, %101, %cst_33 {dimension_numbers = #tpu.dot_dimension_numbers<[1], [1], [0], [0], [0, 0, 1, 0], [], []>} : vector<128x16xbf16>, vector<128x16xbf16>, vector<128x128xf32> -> vector<128x128xf32>
    %103 = arith.extf %61 : vector<128x128xbf16> to vector<128x128xf32>
    %104 = arith.addf %102, %103 : vector<128x128xf32>
    %cst_34 = arith.constant dense<0xFF800000> : vector<128xf32>
    %105 = vector.multi_reduction <maximumf>, %104, %cst_34 [1] : vector<128x128xf32> to vector<128xf32>
    %106 = vector.shape_cast %105 : vector<128xf32> to vector<128x1xf32>
    %107 = vector.broadcast %106 : vector<128x1xf32> to vector<128x128xf32>
    %108 = arith.subf %104, %107 : vector<128x128xf32>
    %109 = math.exp %108 : vector<128x128xf32>
    %cst_35 = arith.constant dense<0.000000e+00> : vector<128xf32>
    %110 = vector.multi_reduction <add>, %109, %cst_35 [1] : vector<128x128xf32> to vector<128xf32>
    %111 = vector.shape_cast %110 : vector<128xf32> to vector<128x1xf32>
    %112 = tpu.reciprocal %111 {approx = true} : vector<128x1xf32> -> vector<128x1xf32>
    %113 = vector.broadcast %112 : vector<128x1xf32> to vector<128x128xf32>
    %114 = arith.mulf %109, %113 : vector<128x128xf32>
    %115 = arith.truncf %114 : vector<128x128xf32> to vector<128x128xbf16>
    %116 = vector.extract_strided_slice %45 {offsets = [0, 32], sizes = [128, 16], strides = [1, 1]} : vector<128x64xbf16> to vector<128x16xbf16>
    %cst_36 = arith.constant dense<0.000000e+00> : vector<128x16xf32>
    %117 = tpu.matmul %115, %116, %cst_36 {dimension_numbers = #tpu.dot_dimension_numbers<[1], [0], [0], [1], [0, 0, 1, 1], [], []>} : vector<128x128xbf16>, vector<128x16xbf16>, vector<128x16xf32> -> vector<128x16xf32>
    %118 = arith.truncf %117 : vector<128x16xf32> to vector<128x16xbf16>
    %119 = vector.extract_strided_slice %43 {offsets = [0, 48], sizes = [128, 16], strides = [1, 1]} : vector<128x64xbf16> to vector<128x16xbf16>
    %120 = vector.extract_strided_slice %44 {offsets = [0, 48], sizes = [128, 16], strides = [1, 1]} : vector<128x64xbf16> to vector<128x16xbf16>
    %cst_37 = arith.constant dense<0.000000e+00> : vector<128x128xf32>
    %121 = tpu.matmul %119, %120, %cst_37 {dimension_numbers = #tpu.dot_dimension_numbers<[1], [1], [0], [0], [0, 0, 1, 0], [], []>} : vector<128x16xbf16>, vector<128x16xbf16>, vector<128x128xf32> -> vector<128x128xf32>
    %122 = arith.extf %61 : vector<128x128xbf16> to vector<128x128xf32>
    %123 = arith.addf %121, %122 : vector<128x128xf32>
    %cst_38 = arith.constant dense<0xFF800000> : vector<128xf32>
    %124 = vector.multi_reduction <maximumf>, %123, %cst_38 [1] : vector<128x128xf32> to vector<128xf32>
    %125 = vector.shape_cast %124 : vector<128xf32> to vector<128x1xf32>
    %126 = vector.broadcast %125 : vector<128x1xf32> to vector<128x128xf32>
    %127 = arith.subf %123, %126 : vector<128x128xf32>
    %128 = math.exp %127 : vector<128x128xf32>
    %cst_39 = arith.constant dense<0.000000e+00> : vector<128xf32>
    %129 = vector.multi_reduction <add>, %128, %cst_39 [1] : vector<128x128xf32> to vector<128xf32>
    %130 = vector.shape_cast %129 : vector<128xf32> to vector<128x1xf32>
    %131 = tpu.reciprocal %130 {approx = true} : vector<128x1xf32> -> vector<128x1xf32>
    %132 = vector.broadcast %131 : vector<128x1xf32> to vector<128x128xf32>
    %133 = arith.mulf %128, %132 : vector<128x128xf32>
    %134 = arith.truncf %133 : vector<128x128xf32> to vector<128x128xbf16>
    %135 = vector.extract_strided_slice %45 {offsets = [0, 48], sizes = [128, 16], strides = [1, 1]} : vector<128x64xbf16> to vector<128x16xbf16>
    %cst_40 = arith.constant dense<0.000000e+00> : vector<128x16xf32>
    %136 = tpu.matmul %134, %135, %cst_40 {dimension_numbers = #tpu.dot_dimension_numbers<[1], [0], [0], [1], [0, 0, 1, 1], [], []>} : vector<128x128xbf16>, vector<128x16xbf16>, vector<128x16xf32> -> vector<128x16xf32>
    %137 = arith.truncf %136 : vector<128x16xf32> to vector<128x16xbf16>
    %138 = tpu.concatenate %80, %99, %118, %137 in 1 : vector<128x16xbf16>, vector<128x16xbf16>, vector<128x16xbf16>, vector<128x16xbf16> -> vector<128x64xbf16>
    %c0_41 = arith.constant 0 : index
    %c192 = arith.constant 192 : index
    %139 = vector.load %arg4[%c0_41, %c192] : memref<64x576xbf16, #tpu.memory_space<vmem>>, vector<64x64xbf16>
    %cst_42 = arith.constant dense<0.000000e+00> : vector<128x64xf32>
    %140 = tpu.matmul %138, %139, %cst_42 {dimension_numbers = #tpu.dot_dimension_numbers<[1], [0], [0], [1], [0, 0, 1, 1], [], []>} : vector<128x64xbf16>, vector<64x64xbf16>, vector<128x64xf32> -> vector<128x64xf32>
    %c3 = arith.constant 3 : index
    %c0_43 = arith.constant 0 : index
    %141 = vector.load %arg6[%c3, %c0_43] : memref<16x192xf32, #tpu.memory_space<vmem>>, vector<1x64xf32>
    %142 = vector.broadcast %141 : vector<1x64xf32> to vector<128x64xf32>
    %143 = arith.addf %140, %142 : vector<128x64xf32>
    %144 = arith.addf %35, %143 : vector<128x64xf32>
    %c4 = arith.constant 4 : index
    %c0_44 = arith.constant 0 : index
    %145 = vector.load %arg6[%c4, %c0_44] : memref<16x192xf32, #tpu.memory_space<vmem>>, vector<1x64xf32>
    %c5 = arith.constant 5 : index
    %c0_45 = arith.constant 0 : index
    %146 = vector.load %arg6[%c5, %c0_45] : memref<16x192xf32, #tpu.memory_space<vmem>>, vector<1x64xf32>
    %cst_46 = arith.constant dense<0.000000e+00> : vector<128xf32>
    %147 = vector.multi_reduction <add>, %144, %cst_46 [1] : vector<128x64xf32> to vector<128xf32>
    %148 = vector.shape_cast %147 : vector<128xf32> to vector<128x1xf32>
    %cst_47 = arith.constant 6.400000e+01 : f32
    %149 = vector.broadcast %cst_47 : f32 to vector<128x1xf32>
    %150 = arith.divf %148, %149 : vector<128x1xf32>
    %151 = vector.broadcast %150 : vector<128x1xf32> to vector<128x64xf32>
    %152 = arith.subf %144, %151 : vector<128x64xf32>
    %153 = arith.mulf %152, %152 : vector<128x64xf32>
    %cst_48 = arith.constant dense<0.000000e+00> : vector<128xf32>
    %154 = vector.multi_reduction <add>, %153, %cst_48 [1] : vector<128x64xf32> to vector<128xf32>
    %155 = vector.shape_cast %154 : vector<128xf32> to vector<128x1xf32>
    %cst_49 = arith.constant 6.400000e+01 : f32
    %156 = vector.broadcast %cst_49 : f32 to vector<128x1xf32>
    %157 = arith.divf %155, %156 : vector<128x1xf32>
    %158 = vector.broadcast %150 : vector<128x1xf32> to vector<128x64xf32>
    %159 = arith.subf %144, %158 : vector<128x64xf32>
    %cst_50 = arith.constant 9.99999996E-13 : f32
    %160 = vector.broadcast %cst_50 : f32 to vector<128x1xf32>
    %161 = arith.addf %157, %160 : vector<128x1xf32>
    %162 = math.rsqrt %161 : vector<128x1xf32>
    %163 = vector.broadcast %162 : vector<128x1xf32> to vector<128x64xf32>
    %164 = arith.mulf %159, %163 : vector<128x64xf32>
    %165 = vector.broadcast %145 : vector<1x64xf32> to vector<128x64xf32>
    %166 = arith.mulf %164, %165 : vector<128x64xf32>
    %167 = vector.broadcast %146 : vector<1x64xf32> to vector<128x64xf32>
    %168 = arith.addf %166, %167 : vector<128x64xf32>
    %169 = arith.truncf %168 : vector<128x64xf32> to vector<128x64xbf16>
    %c0_51 = arith.constant 0 : index
    %c256 = arith.constant 256 : index
    %170 = vector.load %arg4[%c0_51, %c256] : memref<64x576xbf16, #tpu.memory_space<vmem>>, vector<64x128xbf16>
    %cst_52 = arith.constant dense<0.000000e+00> : vector<128x128xf32>
    %171 = tpu.matmul %169, %170, %cst_52 {dimension_numbers = #tpu.dot_dimension_numbers<[1], [0], [0], [1], [0, 0, 1, 1], [], []>} : vector<128x64xbf16>, vector<64x128xbf16>, vector<128x128xf32> -> vector<128x128xf32>
    %c6 = arith.constant 6 : index
    %c0_53 = arith.constant 0 : index
    %172 = vector.load %arg6[%c6, %c0_53] : memref<16x192xf32, #tpu.memory_space<vmem>>, vector<1x128xf32>
    %173 = vector.broadcast %172 : vector<1x128xf32> to vector<128x128xf32>
    %174 = arith.addf %171, %173 : vector<128x128xf32>
    %175 = arith.mulf %174, %174 : vector<128x128xf32>
    %176 = arith.mulf %174, %175 : vector<128x128xf32>
    %cst_54 = arith.constant 4.471500e-02 : f32
    %177 = vector.broadcast %cst_54 : f32 to vector<128x128xf32>
    %178 = arith.mulf %177, %176 : vector<128x128xf32>
    %179 = arith.addf %174, %178 : vector<128x128xf32>
    %cst_55 = arith.constant 0.797884583 : f32
    %180 = vector.broadcast %cst_55 : f32 to vector<128x128xf32>
    %181 = arith.mulf %180, %179 : vector<128x128xf32>
    %182 = math.tanh %181 : vector<128x128xf32>
    %cst_56 = arith.constant 1.000000e+00 : f32
    %183 = vector.broadcast %cst_56 : f32 to vector<128x128xf32>
    %184 = arith.addf %183, %182 : vector<128x128xf32>
    %cst_57 = arith.constant 5.000000e-01 : f32
    %185 = vector.broadcast %cst_57 : f32 to vector<128x128xf32>
    %186 = arith.mulf %185, %184 : vector<128x128xf32>
    %187 = arith.mulf %174, %186 : vector<128x128xf32>
    %188 = arith.truncf %187 : vector<128x128xf32> to vector<128x128xbf16>
    %c0_58 = arith.constant 0 : index
    %c64 = arith.constant 64 : index
    %189 = vector.load %arg5[%c0_58, %c64] : memref<128x128xbf16, #tpu.memory_space<vmem>>, vector<128x64xbf16>
    %cst_59 = arith.constant dense<0.000000e+00> : vector<128x64xf32>
    %190 = tpu.matmul %188, %189, %cst_59 {dimension_numbers = #tpu.dot_dimension_numbers<[1], [0], [0], [1], [0, 0, 1, 1], [], []>} : vector<128x128xbf16>, vector<128x64xbf16>, vector<128x64xf32> -> vector<128x64xf32>
    %c7 = arith.constant 7 : index
    %c0_60 = arith.constant 0 : index
    %191 = vector.load %arg6[%c7, %c0_60] : memref<16x192xf32, #tpu.memory_space<vmem>>, vector<1x64xf32>
    %192 = vector.broadcast %191 : vector<1x64xf32> to vector<128x64xf32>
    %193 = arith.addf %190, %192 : vector<128x64xf32>
    %194 = arith.addf %168, %193 : vector<128x64xf32>
    %c8 = arith.constant 8 : index
    %c0_61 = arith.constant 0 : index
    %195 = vector.load %arg6[%c8, %c0_61] : memref<16x192xf32, #tpu.memory_space<vmem>>, vector<1x64xf32>
    %c9 = arith.constant 9 : index
    %c0_62 = arith.constant 0 : index
    %196 = vector.load %arg6[%c9, %c0_62] : memref<16x192xf32, #tpu.memory_space<vmem>>, vector<1x64xf32>
    %cst_63 = arith.constant dense<0.000000e+00> : vector<128xf32>
    %197 = vector.multi_reduction <add>, %194, %cst_63 [1] : vector<128x64xf32> to vector<128xf32>
    %198 = vector.shape_cast %197 : vector<128xf32> to vector<128x1xf32>
    %cst_64 = arith.constant 6.400000e+01 : f32
    %199 = vector.broadcast %cst_64 : f32 to vector<128x1xf32>
    %200 = arith.divf %198, %199 : vector<128x1xf32>
    %201 = vector.broadcast %200 : vector<128x1xf32> to vector<128x64xf32>
    %202 = arith.subf %194, %201 : vector<128x64xf32>
    %203 = arith.mulf %202, %202 : vector<128x64xf32>
    %cst_65 = arith.constant dense<0.000000e+00> : vector<128xf32>
    %204 = vector.multi_reduction <add>, %203, %cst_65 [1] : vector<128x64xf32> to vector<128xf32>
    %205 = vector.shape_cast %204 : vector<128xf32> to vector<128x1xf32>
    %cst_66 = arith.constant 6.400000e+01 : f32
    %206 = vector.broadcast %cst_66 : f32 to vector<128x1xf32>
    %207 = arith.divf %205, %206 : vector<128x1xf32>
    %208 = vector.broadcast %200 : vector<128x1xf32> to vector<128x64xf32>
    %209 = arith.subf %194, %208 : vector<128x64xf32>
    %cst_67 = arith.constant 9.99999996E-13 : f32
    %210 = vector.broadcast %cst_67 : f32 to vector<128x1xf32>
    %211 = arith.addf %207, %210 : vector<128x1xf32>
    %212 = math.rsqrt %211 : vector<128x1xf32>
    %213 = vector.broadcast %212 : vector<128x1xf32> to vector<128x64xf32>
    %214 = arith.mulf %209, %213 : vector<128x64xf32>
    %215 = vector.broadcast %195 : vector<1x64xf32> to vector<128x64xf32>
    %216 = arith.mulf %214, %215 : vector<128x64xf32>
    %217 = vector.broadcast %196 : vector<1x64xf32> to vector<128x64xf32>
    %218 = arith.addf %216, %217 : vector<128x64xf32>
    %219 = tpu.iota {dimensions = array<i32: 0>} : vector<8x128xi32>
    %220 = tpu.iota {dimensions = array<i32: 1>} : vector<8x128xi32>
    %c16_i32 = arith.constant 16 : i32
    %221 = vector.broadcast %c16_i32 : i32 to vector<8x128xi32>
    %222 = arith.muli %219, %221 : vector<8x128xi32>
    %223 = arith.cmpi eq, %220, %222 : vector<8x128xi32>
    %cst_68 = arith.constant 1.000000e+00 : f32
    %cst_69 = arith.constant 0.000000e+00 : f32
    %224 = vector.broadcast %cst_68 : f32 to vector<8x128xf32>
    %225 = vector.broadcast %cst_69 : f32 to vector<8x128xf32>
    %226 = arith.select %223, %224, %225 : vector<8x128xi1>, vector<8x128xf32>
    %227 = arith.truncf %226 : vector<8x128xf32> to vector<8x128xbf16>
    %228 = arith.truncf %218 : vector<128x64xf32> to vector<128x64xbf16>
    %cst_70 = arith.constant dense<0.000000e+00> : vector<8x64xf32>
    %229 = tpu.matmul %227, %228, %cst_70 {dimension_numbers = #tpu.dot_dimension_numbers<[1], [0], [0], [1], [0, 0, 1, 1], [], []>} : vector<8x128xbf16>, vector<128x64xbf16>, vector<8x64xf32> -> vector<8x64xf32>
    %230 = arith.truncf %229 : vector<8x64xf32> to vector<8x64xbf16>
    %c0_71 = arith.constant 0 : index
    %c384 = arith.constant 384 : index
    %231 = vector.load %arg4[%c0_71, %c384] : memref<64x576xbf16, #tpu.memory_space<vmem>>, vector<64x64xbf16>
    %cst_72 = arith.constant dense<0.000000e+00> : vector<8x64xf32>
    %232 = tpu.matmul %230, %231, %cst_72 {dimension_numbers = #tpu.dot_dimension_numbers<[1], [0], [0], [1], [0, 0, 1, 1], [], []>} : vector<8x64xbf16>, vector<64x64xbf16>, vector<8x64xf32> -> vector<8x64xf32>
    %c10 = arith.constant 10 : index
    %c0_73 = arith.constant 0 : index
    %233 = vector.load %arg6[%c10, %c0_73] : memref<16x192xf32, #tpu.memory_space<vmem>>, vector<1x64xf32>
    %234 = vector.broadcast %233 : vector<1x64xf32> to vector<8x64xf32>
    %235 = arith.addf %232, %234 : vector<8x64xf32>
    %236 = math.tanh %235 : vector<8x64xf32>
    %c0_74 = arith.constant 0 : index
    %c0_75 = arith.constant 0 : index
    %237 = vector.load %arg2[%c0_74, %c0_75] : memref<8x8xbf16, #tpu.memory_space<vmem>>, vector<8x8xbf16>
    %238 = arith.truncf %236 : vector<8x64xf32> to vector<8x64xbf16>
    %cst_76 = arith.constant dense<0.000000e+00> : vector<8x64xf32>
    %239 = tpu.matmul %237, %238, %cst_76 {dimension_numbers = #tpu.dot_dimension_numbers<[1], [0], [0], [1], [0, 0, 1, 1], [], []>} : vector<8x8xbf16>, vector<8x64xbf16>, vector<8x64xf32> -> vector<8x64xf32>
    %240 = arith.addf %236, %239 : vector<8x64xf32>
    %241 = arith.truncf %240 : vector<8x64xf32> to vector<8x64xbf16>
    %c0_77 = arith.constant 0 : index
    %c448 = arith.constant 448 : index
    %242 = vector.load %arg4[%c0_77, %c448] : memref<64x576xbf16, #tpu.memory_space<vmem>>, vector<64x128xbf16>
    %cst_78 = arith.constant dense<0.000000e+00> : vector<8x128xf32>
    %243 = tpu.matmul %241, %242, %cst_78 {dimension_numbers = #tpu.dot_dimension_numbers<[1], [0], [0], [1], [0, 0, 1, 1], [], []>} : vector<8x64xbf16>, vector<64x128xbf16>, vector<8x128xf32> -> vector<8x128xf32>
    %c11 = arith.constant 11 : index
    %c0_79 = arith.constant 0 : index
    %244 = vector.load %arg6[%c11, %c0_79] : memref<16x192xf32, #tpu.memory_space<vmem>>, vector<1x128xf32>
    %245 = vector.broadcast %244 : vector<1x128xf32> to vector<8x128xf32>
    %246 = arith.addf %243, %245 : vector<8x128xf32>
    %c0_80 = arith.constant 0 : index
    %c0_81 = arith.constant 0 : index
    %247 = vector.load %arg7[%c0_80, %c0_81] : memref<8x128xf32, #tpu.memory_space<vmem>>, vector<8x128xf32>
    tpu.vector_store %arg7[%c0_80, %c0_81], %246 {strides = array<i32>} : memref<8x128xf32, #tpu.memory_space<vmem>>, vector<8x128xf32>,
    return
  }
}

</mosaic_0001>

<bundles_post_ra>
// kernel: hyperbert_with_classifier_forward.1
= control target key start
LH: loop header
LB: loop body
LE: loop exit
PB: predicated region body
PF: predicated region fallthrough
CT: control target
= control target key end

     0   :  { %v5452_v0 = vmov 0   ;;  %v43_v25 = vlaneseq  ;;  %v8080_v31 = vmov 1.0|1.0   ;;  %s5454_s30 = smov 64   ;;  %s5455_s8 = smov 48   ;;  %s8072_s0 = inlined_call_operand.vmem [shape: s32[128,1], index: 0, kind: input, shape index: {}]   ;;  %s8073_s5 = inlined_call_operand.vmem [shape: bf16[128,128], index: 5, kind: input, shape index: {}]   ;;  %s8074_s3 = inlined_call_operand.vmem [shape: f32[128,64], index: 3, kind: input, shape index: {}]   ;;  %s8075_s4 = inlined_call_operand.vmem [shape: bf16[64,576], index: 4, kind: input, shape index: {}]   ;;  %s8076_s6 = inlined_call_operand.vmem [shape: f32[16,192], index: 6, kind: input, shape index: {}]   ;;  %s8077_s1 = inlined_call_operand.vmem [shape: f32[1,128], index: 1, kind: input, shape index: {}]   ;;  %s8078_s2 = inlined_call_operand.vmem [shape: bf16[8,8], index: 2, kind: input, shape index: {}]   ;;  %s8079_s7 = inlined_call_operand.vmem [shape: f32[8,128], index: 7, kind: output, shape index: {}]  }
   0x1   :  { %5013 = vset.pattern.permute.xlu1 %v5452_v0  ;;  %5012 = vset.pattern.permute.xlu0 %v5452_v0  ;;  %v29_v1 = vld [vmem:[%s8072_s0 + $0x10] sm:$0xff]  ;;  %v27_v2 = vld [vmem:[%s8072_s0] sm:$0xff]  ;;  %v30_v3 = vld [vmem:[%s8072_s0 + $0x18] sm:$0xff]  ;;  %s5458_s10 = smov 32   ;;  %s5459_s11 = smov 96  }
   0x2   :  { %52 = vperm.xlu1 %5013, %v29_v1   ;;  %679 = vmatprep.mubr.bf16.mxu1 %v5452_v0  ;;  %v28_v4 = vld [vmem:[%s8072_s0 + $0x8] sm:$0xff]  ;;  %v31_v6 = vld [vmem:[%s8072_s0 + $0x20] sm:$0xff]  ;;  %v5014_v7 = vld [vmem:[%s8073_s5 + $0x38] sm:$0xff]   ;;  %v5580_v27 = vand.u32 127, %v43_v25  ;;  %s5460_s12 = smov 16   ;;  %s5461_s13 = smov 80  }
   0x3   :  { %46 = vperm.xlu0 %5012, %v27_v2   ;;  %v32_v5 = vld [vmem:[%s8072_s0 + $0x28] sm:$0xff]  ;;  %v5015_v8 = vld [vmem:[%s8073_s5 + $0x30] sm:$0xff]   ;;  %4550 = vmatprep.subr.bf16.mxu0 %v5014_v7  ;;  %v34_v9 = vld [vmem:[%s8072_s0 + $0x38] sm:$0xff] }
   0x4   :  { %4551 = vmatpush3.bf16.msra.mxu0 %v5014_v7  ;;  %v5016_v10 = vld [vmem:[%s8073_s5 + $0x28] sm:$0xff]   ;;  %v33_v11 = vld [vmem:[%s8072_s0 + $0x30] sm:$0xff]  ;;  %v5017_v13 = vld [vmem:[%s8073_s5 + $0x20] sm:$0xff]   ;;  %8134 = vst [vmem:[#allocation2_spill] sm:$0xff] %v5580_v27 }
   0x5   :  { %4552 = vmatprep.subr.bf16.mxu0 %v5015_v8  ;;  %v36_v12 = vld [vmem:[%s8072_s0 + $0x48] sm:$0xff]  ;;  %v35_v14 = vld [vmem:[%s8072_s0 + $0x40] sm:$0xff]  ;;  %v38_v15 = vld [vmem:[%s8072_s0 + $0x58] sm:$0xff] }
   0x6   :  { %55 = vperm.xlu1 %5013, %v30_v3   ;;  %v5018_v16 = vld [vmem:[%s8073_s5 + $0x18] sm:$0xff]   ;;  %v37_v17 = vld [vmem:[%s8072_s0 + $0x50] sm:$0xff]  ;;  %v40_v18 = vld [vmem:[%s8072_s0 + $0x68] sm:$0xff] }
   0x7   :  { %49 = vperm.xlu0 %5012, %v28_v4   ;;  %v5019_v19 = vld [vmem:[%s8073_s5 + $0x10] sm:$0xff]   ;;  %v39_v20 = vld [vmem:[%s8072_s0 + $0x60] sm:$0xff]  ;;  %v42_v21 = vld [vmem:[%s8072_s0 + $0x78] sm:$0xff] }
   0x8   :  { %4553 = vmatpush3.bf16.msra.mxu0 %v5015_v8  ;;  %v5020_v22 = vld [vmem:[%s8073_s5 + $0x8] sm:$0xff]   ;;  %v41_v23 = vld [vmem:[%s8072_s0 + $0x70] sm:$0xff]  ;;  %v5021_v24 = vld [vmem:[%s8073_s5] sm:$0xff]  }
   0x9   :  { %4554 = vmatprep.subr.bf16.mxu0 %v5016_v10  ;;  %v149_v45 = vld [vmem:[%s8074_s3] sm:$0xff]  ;;  %v151_v46 = vld [vmem:[%s8074_s3 + $0x10] sm:$0xff]  ;;  %v150_v50 = vld [vmem:[%s8074_s3 + $0x8] sm:$0xff] }
   0xa   :  { %61 = vperm.xlu1 %5013, %v32_v5   ;;  %v152_v53 = vld [vmem:[%s8074_s3 + $0x18] sm:$0xff]  ;;  %v153_v57 = vld [vmem:[%s8074_s3 + $0x20] sm:$0xff]  ;;  %v155_v61 = vld [vmem:[%s8074_s3 + $0x30] sm:$0xff] }
   0xb   :  { %58 = vperm.xlu0 %5012, %v31_v6   ;;  %v154_v2 = vld [vmem:[%s8074_s3 + $0x28] sm:$0xff]  ;;  %v156_v6 = vld [vmem:[%s8074_s3 + $0x38] sm:$0xff] }
   0xc   :  { %4555 = vmatpush3.bf16.msra.mxu0 %v5016_v10  ;;  %v157_v10 = vld [vmem:[%s8074_s3 + $0x40] sm:$0xff] }
   0xd   :  { %4556 = vmatprep.subr.bf16.mxu0 %v5017_v13 }
   0xe   :  { %67 = vperm.xlu1 %5013, %v34_v9  }
   0xf   :  { %64 = vperm.xlu0 %5012, %v33_v11  }
  0x10   :  { %4557 = vmatpush3.bf16.msra.mxu0 %v5017_v13 }
  0x11   :  { %4558 = vmatprep.subr.bf16.mxu0 %v5018_v16 }
  0x12   :  { %73 = vperm.xlu1 %5013, %v36_v12  }
  0x13   :  { %70 = vperm.xlu0 %5012, %v35_v14   ;;  %v159_v14 = vld [vmem:[%s8074_s3 + $0x50] sm:$0xff] }
  0x14   :  { %4559 = vmatpush3.bf16.msra.mxu0 %v5018_v16 }
  0x15   :  { %4560 = vmatprep.subr.bf16.mxu0 %v5019_v19 }
  0x16   :  { %79 = vperm.xlu1 %5013, %v38_v15  }
  0x17   :  { %76 = vperm.xlu0 %5012, %v37_v17  }
  0x18   :  { %4561 = vmatpush3.bf16.msra.mxu0 %v5019_v19 }
  0x19   :  { %4562 = vmatprep.subr.bf16.mxu0 %v5020_v22 }
  0x1a   :  { %85 = vperm.xlu1 %5013, %v40_v18   ;;  %v158_v18 = vld [vmem:[%s8074_s3 + $0x48] sm:$0xff] }
  0x1b   :  { %82 = vperm.xlu0 %5012, %v39_v20  }
  0x1c   :  { %4563 = vmatpush3.bf16.msra.mxu0 %v5020_v22  ;;  %v160_v22 = vld [vmem:[%s8074_s3 + $0x58] sm:$0xff] }
  0x1d   :  { %4564 = vmatprep.subr.bf16.mxu0 %v5021_v24 }
  0x1e   :  { %91 = vperm.xlu1 %5013, %v42_v21  }
  0x1f   :  { %88 = vperm.xlu0 %5012, %v41_v23  }
  0x20   :  { %4565 = vmatpush3.bf16.msra.mxu0 %v5021_v24 }
  0x7d   :  { %v53_v26 = vpop.permute.xlu1 %52 }
  0x7e   :  { %v47_v28 = vpop.permute.xlu0 %46  ;;  %vm95_vm0 = vcmp.eq.s32.totalorder %v5580_v27, %v53_v26 }
  0x7f   :  { %vm93_vm3 = vcmp.eq.s32.totalorder %v5580_v27, %v47_v28  ;;  %v161_v28 = vld [vmem:[%s8074_s3 + $0x60] sm:$0xff] }
  0x81   :  { %v56_v29 = vpop.permute.xlu1 %55 }
  0x82   :  { %vm96_vm1 = vcmp.eq.s32.totalorder %v5580_v27, %v56_v29  ;;  %v50_v30 = vpop.permute.xlu0 %49 }
  0x83   :  { %vm4241_vm2 = vmpackc.low %vm96_vm1, %vm95_vm0  ;;  %vm94_vm4 = vcmp.eq.s32.totalorder %v5580_v27, %v50_v30 }
  0x84   :  { %vm4239_vm5 = vmpackc.low %vm94_vm4, %vm93_vm3 }
  0x85   :  { %4566 = vmatprep.mubr.msk.bf16.mxu0 %vm4239_vm5, %v8080_v31  ;;  %v62_v32 = vpop.permute.xlu1 %61 }
  0x86   :  { %vm98_vm6 = vcmp.eq.s32.totalorder %v5580_v27, %v62_v32  ;;  %4567 = vmatmul.mubr.msk.bf16.vlgmr.msra.gmra.mxu0 %vm4241_vm2, %v8080_v31  ;;  %v59_v33 = vpop.permute.xlu0 %58 }
  0x87   :  { %vm97_vm7 = vcmp.eq.s32.totalorder %v5580_v27, %v59_v33  ;;  %v163_v33 = vld [vmem:[%s8074_s3 + $0x70] sm:$0xff] }
  0x88   :  { %vm4243_vm8 = vmpackc.low %vm98_vm6, %vm97_vm7 }
  0x89   :  { %4570 = vmatprep.mubr.msk.bf16.mxu0 %vm4243_vm8, %v8080_v31  ;;  %v68_v34 = vpop.permute.xlu1 %67  ;;  %vm312_vm8 = vcmask 523264  }
  0x8a   :  { %vm100_vm9 = vcmp.eq.s32.totalorder %v5580_v27, %v68_v34  ;;  %v65_v35 = vpop.permute.xlu0 %64 }
  0x8b   :  { %vm99_vm10 = vcmp.eq.s32.totalorder %v5580_v27, %v65_v35 }
  0x8c   :  { %vm4245_vm11 = vmpackc.low %vm100_vm9, %vm99_vm10  ;;  %vm914_vm9 = vcmask 130048  }
  0x8d   :  { %v74_v36 = vpop.permute.xlu1 %73 }
  0x8e   :  { %vm102_vm12 = vcmp.eq.s32.totalorder %v5580_v27, %v74_v36  ;;  %4571 = vmatmul.mubr.msk.bf16.gmra.mxu0 %vm4245_vm11, %v8080_v31  ;;  %v71_v37 = vpop.permute.xlu0 %70 }
  0x8f   :  { %vm101_vm13 = vcmp.eq.s32.totalorder %v5580_v27, %v71_v37  ;;  %v162_v37 = vld [vmem:[%s8074_s3 + $0x68] sm:$0xff] }
  0x90   :  { %vm4247_vm14 = vmpackc.low %vm102_vm12, %vm101_vm13 }
  0x91   :  { %4574 = vmatprep.mubr.msk.bf16.mxu0 %vm4247_vm14, %v8080_v31  ;;  %v80_v38 = vpop.permute.xlu1 %79 }
  0x92   :  { %vm104_vm15 = vcmp.eq.s32.totalorder %v5580_v27, %v80_v38  ;;  %v77_v39 = vpop.permute.xlu0 %76 }
  0x93   :  { %vm103_vm0 = vcmp.eq.s32.totalorder %v5580_v27, %v77_v39 }
  0x94   :  { %vm4249_vm1 = vmpackc.low %vm104_vm15, %vm103_vm0 }
  0x95   :  { %v86_v40 = vpop.permute.xlu1 %85 }
  0x96   :  { %vm106_vm2 = vcmp.eq.s32.totalorder %v5580_v27, %v86_v40  ;;  %4575 = vmatmul.mubr.msk.bf16.gmra.mxu0 %vm4249_vm1, %v8080_v31  ;;  %v83_v41 = vpop.permute.xlu0 %82 }
  0x97   :  { %vm105_vm3 = vcmp.eq.s32.totalorder %v5580_v27, %v83_v41  ;;  %v164_v41 = vld [vmem:[%s8074_s3 + $0x78] sm:$0xff] }
  0x98   :  { %vm4251_vm4 = vmpackc.low %vm106_vm2, %vm105_vm3 }
  0x99   :  { %4578 = vmatprep.mubr.msk.bf16.mxu0 %vm4251_vm4, %v8080_v31  ;;  %v92_v42 = vpop.permute.xlu1 %91 }
  0x9a   :  { %vm108_vm5 = vcmp.eq.s32.totalorder %v5580_v27, %v92_v42  ;;  %v89_v43 = vpop.permute.xlu0 %88 }
  0x9b   :  { %vm107_vm6 = vcmp.eq.s32.totalorder %v5580_v27, %v89_v43 }
  0x9c   :  { %vm4253_vm7 = vmpackc.low %vm108_vm5, %vm107_vm6 }
  0x9e   :  { %4579 = vmatmul.mubr.msk.bf16.gmra.mxu0 %vm4253_vm7, %v8080_v31 }
 0x146   :  { %v4568_v44 = vpop.f32.mrf.mxu0 }
 0x147   :  { %v5617_v51 = vadd.f32 %v4568_v44, %v151_v46 }
 0x148   :  { %v247_v47 = vpop.f32.mrf.mxu0 }
 0x149   :  { %v5612_v48 = vadd.f32 %v247_v47, %v149_v45  ;;  %v319_v60 = vsel %vm312_vm8, %v5617_v51, 0.0 }
 0x14a   :  { %v4569_v49 = vpop.f32.mrf.mxu0 }
 0x14b   :  { %v313_v52 = vsel %vm312_vm8, %v5612_v48, 0.0  ;;  %v5629_v58 = vadd.f32 %v4569_v49, %v152_v53 }
 0x14c   :  { %v250_v54 = vpop.f32.mrf.mxu0  ;;  %314 = vadd.xlane.f32.xlu0 %v313_v52 }
 0x14d   :  { %v5624_v55 = vadd.f32 %v250_v54, %v150_v50  ;;  %v322_v4 = vsel %vm312_vm8, %v5629_v58, 0.0 }
 0x14e   :  { %v4572_v56 = vpop.f32.mrf.mxu0 }
 0x14f   :  { %v316_v59 = vsel %vm312_vm8, %v5624_v55, 0.0  ;;  %v5643_v3 = vadd.f32 %v4572_v56, %v155_v61 }
 0x150   :  { %317 = vadd.xlane.f32.xlu1 %v316_v59  ;;  %320 = vadd.xlane.f32.xlu0 %v319_v60  ;;  %v263_v62 = vpop.f32.mrf.mxu0 }
 0x151   :  { %v5638_v63 = vadd.f32 %v263_v62, %v153_v57  ;;  %v331_v13 = vsel %vm312_vm8, %v5643_v3, 0.0 }
 0x152   :  { %v4573_v1 = vpop.f32.mrf.mxu0 }
 0x153   :  { %v325_v5 = vsel %vm312_vm8, %v5638_v63, 0.0  ;;  %v5657_v11 = vadd.f32 %v4573_v1, %v156_v6 }
 0x154   :  { %323 = vadd.xlane.f32.xlu0 %v322_v4  ;;  %v266_v7 = vpop.f32.mrf.mxu0  ;;  %326 = vadd.xlane.f32.xlu1 %v325_v5 }
 0x155   :  { %v5652_v8 = vadd.f32 %v266_v7, %v154_v2  ;;  %v334_v20 = vsel %vm312_vm8, %v5657_v11, 0.0 }
 0x156   :  { %v4576_v9 = vpop.f32.mrf.mxu0 }
 0x157   :  { %v328_v12 = vsel %vm312_vm8, %v5652_v8, 0.0  ;;  %v5671_v19 = vadd.f32 %v4576_v9, %v159_v14 }
 0x158   :  { %329 = vadd.xlane.f32.xlu0 %v328_v12  ;;  %332 = vadd.xlane.f32.xlu1 %v331_v13  ;;  %v279_v15 = vpop.f32.mrf.mxu0 }
 0x159   :  { %v5666_v16 = vadd.f32 %v279_v15, %v157_v10  ;;  %v343_v32 = vsel %vm312_vm8, %v5671_v19, 0.0 }
 0x15a   :  { %v4577_v17 = vpop.f32.mrf.mxu0 }
 0x15b   :  { %v337_v21 = vsel %vm312_vm8, %v5666_v16, 0.0  ;;  %v5685_v29 = vadd.f32 %v4577_v17, %v160_v22 }
 0x15c   :  { %335 = vadd.xlane.f32.xlu0 %v334_v20  ;;  %v282_v23 = vpop.f32.mrf.mxu0  ;;  %338 = vadd.xlane.f32.xlu1 %v337_v21 }
 0x15d   :  { %v5680_v24 = vadd.f32 %v282_v23, %v158_v18  ;;  %v346_v39 = vsel %vm312_vm8, %v5685_v29, 0.0 }
 0x15e   :  { %v4580_v26 = vpop.f32.mrf.mxu0 }
 0x15f   :  { %v340_v30 = vsel %vm312_vm8, %v5680_v24, 0.0  ;;  %v5699_v38 = vadd.f32 %v4580_v26, %v163_v33 }
 0x160   :  { %341 = vadd.xlane.f32.xlu0 %v340_v30  ;;  %344 = vadd.xlane.f32.xlu1 %v343_v32  ;;  %v295_v34 = vpop.f32.mrf.mxu0 }
 0x161   :  { %v5694_v35 = vadd.f32 %v295_v34, %v161_v28  ;;  %v355_v46 = vsel %vm312_vm8, %v5699_v38, 0.0 }
 0x162   :  { %v4581_v36 = vpop.f32.mrf.mxu0 }
 0x163   :  { %v349_v40 = vsel %vm312_vm8, %v5694_v35, 0.0  ;;  %v5710_v44 = vadd.f32 %v4581_v36, %v164_v41 }
 0x164   :  { %347 = vadd.xlane.f32.xlu0 %v346_v39  ;;  %v298_v42 = vpop.f32.mrf.mxu0  ;;  %350 = vadd.xlane.f32.xlu1 %v349_v40 }
 0x165   :  { %v5708_v43 = vadd.f32 %v298_v42, %v162_v37  ;;  %v358_v47 = vsel %vm312_vm8, %v5710_v44, 0.0 }
 0x167   :  { %v352_v45 = vsel %vm312_vm8, %v5708_v43, 0.0 }
 0x168   :  { %353 = vadd.xlane.f32.xlu0 %v352_v45  ;;  %356 = vadd.xlane.f32.xlu1 %v355_v46 }
 0x16c   :  { %359 = vadd.xlane.f32.xlu0 %v358_v47 }
 0x1d5   :  { %v315_v49 = vpop.xlane.xlu0 %314 }
 0x1d6   :  { %v362_v50 = vmul.f32 0.015625, %v315_v49 }
 0x1d8   :  { %v5719_v52 = vsub.f32 %v5612_v48, %v362_v50 }
 0x1d9   :  { %v318_v53 = vpop.xlane.xlu1 %317  ;;  %v321_v54 = vpop.xlane.xlu0 %320 }
 0x1da   :  { %v363_v56 = vmul.f32 0.015625, %v318_v53  ;;  %v364_v57 = vmul.f32 0.015625, %v321_v54  ;;  %v394_v59 = vmul.f32 %v5719_v52, %v5719_v52 }
 0x1dc   :  { %v5724_v60 = vsub.f32 %v5624_v55, %v363_v56  ;;  %v5727_v61 = vsub.f32 %v5617_v51, %v364_v57  ;;  %v410_v62 = vsel %vm312_vm8, %v394_v59, 0.0 }
 0x1dd   :  { %v327_v1 = vpop.xlane.xlu1 %326  ;;  %411 = vadd.xlane.f32.xlu1 %v410_v62  ;;  %v324_v2 = vpop.xlane.xlu0 %323 }
 0x1de   :  { %v366_v48 = vmul.f32 0.015625, %v327_v1  ;;  %v365_v4 = vmul.f32 0.015625, %v324_v2  ;;  %v395_v5 = vmul.f32 %v5724_v60, %v5724_v60  ;;  %v396_v6 = vmul.f32 %v5727_v61, %v5727_v61 }
 0x1e0   :  { %v5735_v7 = vsub.f32 %v5638_v63, %v366_v48  ;;  %v5738_v55 = vsub.f32 %v5629_v58, %v365_v4  ;;  %v413_v51 = vsel %vm312_vm8, %v395_v5, 0.0  ;;  %v416_v9 = vsel %vm312_vm8, %v396_v6, 0.0 }
 0x1e1   :  { %v333_v10 = vpop.xlane.xlu1 %332  ;;  %414 = vadd.xlane.f32.xlu0 %v413_v51  ;;  %417 = vadd.xlane.f32.xlu1 %v416_v9  ;;  %v330_v12 = vpop.xlane.xlu0 %329  ;;  %v5022_v51 = vld [vmem:[%s8075_s4 + $0x7c] ss:$20 sps:$4 sm:$0xff]  }
 0x1e2   :  { %v368_v13 = vmul.f32 0.015625, %v333_v10  ;;  %v367_v14 = vmul.f32 0.015625, %v330_v12  ;;  %v398_v15 = vmul.f32 %v5735_v7, %v5735_v7  ;;  %v397_v63 = vmul.f32 %v5738_v55, %v5738_v55  ;;  %v5024_v10 = vld [vmem:[%s8075_s4 + $0x78] ss:$20 sps:$4 sm:$0xff]   ;;  %655 = vmatprep.subr.bf16.mxu1 %v5022_v51 }
 0x1e3   :  { %656 = vmatpush1.bf16.msra.mxu1 %v5024_v10 }
 0x1e4   :  { %v5747_v17 = vsub.f32 %v5643_v3, %v368_v13  ;;  %v5750_v58 = vsub.f32 %v5652_v8, %v367_v14  ;;  %v422_v18 = vsel %vm312_vm8, %v398_v15, 0.0  ;;  %v419_v20 = vsel %vm312_vm8, %v397_v63, 0.0  ;;  %v5025_v63 = vld [vmem:[%s8075_s4 + $0x54] ss:$20 sps:$4 sm:$0xff]  }
 0x1e5   :  { %v339_v21 = vpop.xlane.xlu1 %338  ;;  %423 = vadd.xlane.f32.xlu1 %v422_v18  ;;  %420 = vadd.xlane.f32.xlu0 %v419_v20  ;;  %v336_v22 = vpop.xlane.xlu0 %335  ;;  %v5027_v18 = vld [vmem:[%s8075_s4 + $0x50] ss:$20 sps:$4 sm:$0xff]  }
 0x1e6   :  { %v370_v23 = vmul.f32 0.015625, %v339_v21  ;;  %v369_v26 = vmul.f32 0.015625, %v336_v22  ;;  %v400_v28 = vmul.f32 %v5747_v17, %v5747_v17  ;;  %v399_v3 = vmul.f32 %v5750_v58, %v5750_v58  ;;  %657 = vmatprep.subr.bf16.mxu1 %v5025_v63  ;;  %v5028_v21 = vld [vmem:[%s8075_s4 + $0x2c] ss:$20 sps:$4 sm:$0xff]   ;;  %v5030_v22 = vld [vmem:[%s8075_s4 + $0x28] ss:$20 sps:$4 sm:$0xff]  }
 0x1e7   :  { %658 = vmatpush1.bf16.msra.mxu1 %v5027_v18 }
 0x1e8   :  { %v5759_v30 = vsub.f32 %v5666_v16, %v370_v23  ;;  %v5762_v8 = vsub.f32 %v5657_v11, %v369_v26  ;;  %v428_v32 = vsel %vm312_vm8, %v400_v28, 0.0  ;;  %v425_v33 = vsel %vm312_vm8, %v399_v3, 0.0  ;;  %659 = vmatprep.subr.bf16.mxu1 %v5028_v21  ;;  %v5031_v23 = vld [vmem:[%s8075_s4 + $0x4] ss:$20 sps:$4 sm:$0xff]   ;;  %v5033_v26 = vld [vmem:[%s8075_s4] ss:$20 sps:$4 sm:$0xff]  }
 0x1e9   :  { %v345_v34 = vpop.xlane.xlu1 %344  ;;  %429 = vadd.xlane.f32.xlu1 %v428_v32  ;;  %426 = vadd.xlane.f32.xlu0 %v425_v33  ;;  %v342_v36 = vpop.xlane.xlu0 %341 }
 0x1ea   :  { %v372_v37 = vmul.f32 0.015625, %v345_v34  ;;  %v371_v39 = vmul.f32 0.015625, %v342_v36  ;;  %v402_v40 = vmul.f32 %v5759_v30, %v5759_v30  ;;  %v401_v16 = vmul.f32 %v5762_v8, %v5762_v8 }
 0x1eb   :  { %660 = vmatpush1.bf16.msra.mxu1 %v5030_v22 }
 0x1ec   :  { %v5771_v41 = vsub.f32 %v5671_v19, %v372_v37  ;;  %v5774_v11 = vsub.f32 %v5680_v24, %v371_v39  ;;  %v434_v42 = vsel %vm312_vm8, %v402_v40, 0.0  ;;  %v431_v45 = vsel %vm312_vm8, %v401_v16, 0.0  ;;  %661 = vmatprep.subr.bf16.mxu1 %v5031_v23 }
 0x1ed   :  { %v351_v46 = vpop.xlane.xlu1 %350  ;;  %435 = vadd.xlane.f32.xlu1 %v434_v42  ;;  %432 = vadd.xlane.f32.xlu0 %v431_v45  ;;  %v348_v47 = vpop.xlane.xlu0 %347 }
 0x1ee   :  { %v374_v49 = vmul.f32 0.015625, %v351_v46  ;;  %v373_v50 = vmul.f32 0.015625, %v348_v47  ;;  %v404_v53 = vmul.f32 %v5771_v41, %v5771_v41  ;;  %v403_v19 = vmul.f32 %v5774_v11, %v5774_v11 }
 0x1ef   :  { %662 = vmatpush1.bf16.msra.mxu1 %v5033_v26 }
 0x1f0   :  { %v5783_v54 = vsub.f32 %v5694_v35, %v374_v49  ;;  %v5786_v24 = vsub.f32 %v5685_v29, %v373_v50  ;;  %v440_v56 = vsel %vm312_vm8, %v404_v53, 0.0  ;;  %v437_v57 = vsel %vm312_vm8, %v403_v19, 0.0 }
 0x1f1   :  { %v357_v59 = vpop.xlane.xlu1 %356  ;;  %441 = vadd.xlane.f32.xlu1 %v440_v56  ;;  %438 = vadd.xlane.f32.xlu0 %v437_v57  ;;  %v354_v62 = vpop.xlane.xlu0 %353 }
 0x1f2   :  { %v376_v1 = vmul.f32 0.015625, %v357_v59  ;;  %v375_v2 = vmul.f32 0.015625, %v354_v62  ;;  %v406_v48 = vmul.f32 %v5783_v54, %v5783_v54  ;;  %v405_v35 = vmul.f32 %v5786_v24, %v5786_v24 }
 0x1f4   :  { %v5795_v4 = vsub.f32 %v5699_v38, %v376_v1  ;;  %v5798_v29 = vsub.f32 %v5708_v43, %v375_v2  ;;  %v446_v5 = vsel %vm312_vm8, %v406_v48, 0.0  ;;  %v443_v6 = vsel %vm312_vm8, %v405_v35, 0.0  ;;  %v5842_v48 = vld [vmem:[%s8076_s6] ss:$0 sm:$0xff] }
 0x1f5   :  { %447 = vadd.xlane.f32.xlu1 %v446_v5  ;;  %444 = vadd.xlane.f32.xlu0 %v443_v6  ;;  %v360_v9 = vpop.xlane.xlu0 %359 }
 0x1f6   :  { %v377_v38 = vmul.f32 0.015625, %v360_v9  ;;  %v408_v43 = vmul.f32 %v5795_v4, %v5795_v4  ;;  %v407_v12 = vmul.f32 %v5798_v29, %v5798_v29 }
 0x1f8   :  { %v5813_v13 = vsub.f32 %v5710_v44, %v377_v38  ;;  %v452_v14 = vsel %vm312_vm8, %v408_v43, 0.0  ;;  %v449_v15 = vsel %vm312_vm8, %v407_v12, 0.0  ;;  %v5849_v12 = vld [vmem:[%s8076_s6 + $0x1] ss:$0 sm:$0xff] }
 0x1f9   :  { %453 = vadd.xlane.f32.xlu1 %v452_v14  ;;  %450 = vadd.xlane.f32.xlu0 %v449_v15 }
 0x1fa   :  { %v409_v20 = vmul.f32 %v5813_v13, %v5813_v13 }
 0x1fc   :  { %v455_v44 = vsel %vm312_vm8, %v409_v20, 0.0 }
 0x1fd   :  { %456 = vadd.xlane.f32.xlu0 %v455_v44 }
 0x266   :  { %v412_v28 = vpop.xlane.xlu1 %411 }
 0x267   :  { %v458_v3 = vmul.f32 0.015625, %v412_v28 }
 0x269   :  { %v474_v32 = vadd.f32 1e-12, %v458_v3 }
 0x26a   :  { %v418_v33 = vpop.xlane.xlu1 %417  ;;  %v415_v34 = vpop.xlane.xlu0 %414 }
 0x26b   :  { %5058 = vrsqrt.f32 %v474_v32  ;;  %v460_v36 = vmul.f32 0.015625, %v418_v33  ;;  %v459_v37 = vmul.f32 0.015625, %v415_v34 }
 0x26d   :  { %v475_v39 = vadd.f32 1e-12, %v459_v37  ;;  %v476_v40 = vadd.f32 1e-12, %v460_v36 }
 0x26e   :  { %v421_v16 = vpop.xlane.xlu0 %420  ;;  %v424_v42 = vpop.xlane.xlu1 %423 }
 0x26f   :  { %v461_v45 = vmul.f32 0.015625, %v421_v16  ;;  %5060 = vrsqrt.f32 %v475_v39  ;;  %v462_v47 = vmul.f32 0.015625, %v424_v42 }
 0x270   :  { %5062 = vrsqrt.f32 %v476_v40 }
 0x271   :  { %v477_v46 = vadd.f32 1e-12, %v461_v45  ;;  %v478_v19 = vadd.f32 1e-12, %v462_v47 }
 0x272   :  { %v427_v49 = vpop.xlane.xlu0 %426  ;;  %v430_v56 = vpop.xlane.xlu1 %429 }
 0x273   :  { %v463_v50 = vmul.f32 0.015625, %v427_v49  ;;  %5064 = vrsqrt.f32 %v477_v46  ;;  %v464_v1 = vmul.f32 0.015625, %v430_v56 }
 0x275   :  { %v479_v53 = vadd.f32 1e-12, %v463_v50  ;;  %v480_v6 = vadd.f32 1e-12, %v464_v1 }
 0x276   :  { %v433_v57 = vpop.xlane.xlu0 %432  ;;  %v436_v9 = vpop.xlane.xlu1 %435 }
 0x277   :  { %5066 = vrsqrt.f32 %v479_v53  ;;  %v465_v62 = vmul.f32 0.015625, %v433_v57  ;;  %v466_v63 = vmul.f32 0.015625, %v436_v9 }
 0x278   :  { %v5059_v59 = vpop.eup %5058  ;;  %5068 = vrsqrt.f32 %v478_v19 }
 0x279   :  { %v506_v2 = vmul.f32 %v5059_v59, %v5719_v52  ;;  %v481_v35 = vadd.f32 1e-12, %v465_v62  ;;  %v482_v3 = vadd.f32 1e-12, %v466_v63 }
 0x27a   :  { %v439_v51 = vpop.xlane.xlu0 %438  ;;  %v442_v34 = vpop.xlane.xlu1 %441 }
 0x27b   :  { %v522_v38 = vmul.f32 %v506_v2, %v5842_v48  ;;  %5070 = vrsqrt.f32 %v481_v35  ;;  %v467_v52 = vmul.f32 0.015625, %v439_v51  ;;  %v468_v37 = vmul.f32 0.015625, %v442_v34 }
 0x27c   :  { %v5061_v5 = vpop.eup %5060  ;;  %5072 = vrsqrt.f32 %v480_v6 }
 0x27d   :  { %v507_v10 = vmul.f32 %v5061_v5, %v5724_v60  ;;  %v5063_v43 = vpop.eup %5062  ;;  %v5853_v18 = vadd.f32 %v522_v38, %v5849_v12  ;;  %v483_v21 = vadd.f32 1e-12, %v467_v52  ;;  %v484_v50 = vadd.f32 1e-12, %v468_v37 }
 0x27e   :  { %v508_v20 = vmul.f32 %v5063_v43, %v5727_v61  ;;  %v445_v28 = vpop.xlane.xlu0 %444  ;;  %v448_v53 = vpop.xlane.xlu1 %447 }
 0x27f   :  { %v523_v14 = vmul.f32 %v507_v10, %v5842_v48  ;;  %8135 = vst [vmem:[#allocation3_spill] sm:$0xff] %v5853_v18  ;;  %5074 = vrsqrt.f32 %v483_v21  ;;  %v469_v61 = vmul.f32 0.015625, %v445_v28  ;;  %v470_v57 = vmul.f32 0.015625, %v448_v53 }
 0x280   :  { %v5065_v15 = vpop.eup %5064  ;;  %v524_v32 = vmul.f32 %v508_v20, %v5842_v48  ;;  %5076 = vrsqrt.f32 %v482_v3 }
 0x281   :  { %v5856_v60 = vadd.f32 %v523_v14, %v5849_v12  ;;  %v509_v44 = vmul.f32 %v5065_v15, %v5738_v55  ;;  %v485_v16 = vadd.f32 1e-12, %v469_v61  ;;  %v486_v51 = vadd.f32 1e-12, %v470_v57 }
 0x282   :  { %v5871_v39 = vadd.f32 %v524_v32, %v5849_v12  ;;  %v451_v47 = vpop.xlane.xlu0 %450  ;;  %v454_v10 = vpop.xlane.xlu1 %453  ;;  %v5960_v57 = vshrl.u32 %v43_v25, 7 }
 0x283   :  { %8136 = vst [vmem:[#allocation4_spill] sm:$0xff] %v5856_v60  ;;  %v554_v22 = vpack.c.bf16 %v5856_v60, %v5853_v18  ;;  %v525_v23 = vmul.f32 %v509_v44, %v5842_v48  ;;  %5078 = vrsqrt.f32 %v485_v16  ;;  %v471_v19 = vmul.f32 0.015625, %v451_v47 }
 0x284   :  { %v5067_v26 = vpop.eup %5066  ;;  %8138 = vst [vmem:[#allocation6_spill] sm:$0xff] %v5871_v39  ;;  %5080 = vrsqrt.f32 %v484_v50  ;;  %v472_v52 = vmul.f32 0.015625, %v454_v10  ;;  %8151 = vst [vmem:[#allocation19_spill] sm:$0xff] %v5960_v57 }
 0x285   :  { %4264 = vmatmul.mubr.msk.bf16.vlgmr.msra.gmra.mxu1 %vm312_vm8, %v554_v22  ;;  %v5069_v33 = vpop.eup %5068  ;;  %v5867_v55 = vadd.f32 %v525_v23, %v5849_v12  ;;  %v511_v36 = vmul.f32 %v5067_v26, %v5750_v58  ;;  %v487_v1 = vadd.f32 1e-12, %v471_v19 }
 0x286   :  { %689 = vmatprep.mubr.bf16.mxu1 %v5452_v0  ;;  %v510_v40 = vmul.f32 %v5069_v33, %v5735_v7  ;;  %v457_v6 = vpop.xlane.xlu0 %456  ;;  %v488_v22 = vadd.f32 1e-12, %v472_v52 }
 0x287   :  { %8137 = vst [vmem:[#allocation5_spill] sm:$0xff] %v5867_v55  ;;  %v555_v42 = vpack.c.bf16 %v5867_v55, %v5871_v39  ;;  %v527_v45 = vmul.f32 %v511_v36, %v5842_v48  ;;  %5082 = vrsqrt.f32 %v487_v1  ;;  %v473_v38 = vmul.f32 0.015625, %v457_v6 }
 0x288   :  { %v5071_v46 = vpop.eup %5070  ;;  %v526_v58 = vmul.f32 %v510_v40, %v5842_v48  ;;  %5084 = vrsqrt.f32 %v486_v51 }
 0x289   :  { %v5073_v49 = vpop.eup %5072  ;;  %v5881_v7 = vadd.f32 %v527_v45, %v5849_v12  ;;  %v513_v56 = vmul.f32 %v5071_v46, %v5762_v8  ;;  %v489_v63 = vadd.f32 1e-12, %v473_v38 }
 0x28a   :  { %v5885_v59 = vadd.f32 %v526_v58, %v5849_v12  ;;  %v512_v62 = vmul.f32 %v5073_v49, %v5747_v17 }
 0x28b   :  { %8139 = vst [vmem:[#allocation7_spill] sm:$0xff] %v5881_v7  ;;  %v529_v35 = vmul.f32 %v513_v56, %v5842_v48  ;;  %5086 = vrsqrt.f32 %v489_v63 }
 0x28c   :  { %8140 = vst [vmem:[#allocation8_spill] sm:$0xff] %v5885_v59  ;;  %v556_v2 = vpack.c.bf16 %v5881_v7, %v5885_v59  ;;  %v5075_v5 = vpop.eup %5074  ;;  %v528_v8 = vmul.f32 %v512_v62, %v5842_v48  ;;  %5088 = vrsqrt.f32 %v488_v22  ;;  %v575_v62 = vsub.s32 0, %v5960_v57 }
 0x28d   :  { %4265 = vmatmul.mubr.msk.bf16.gmra.mxu1 %vm312_vm8, %v555_v42  ;;  %v5077_v9 = vpop.eup %5076  ;;  %v5895_v17 = vadd.f32 %v529_v35, %v5849_v12  ;;  %v515_v43 = vmul.f32 %v5075_v5, %v5774_v11 }
 0x28e   :  { %699 = vmatprep.mubr.bf16.mxu1 %v5452_v0  ;;  %v5899_v14 = vadd.f32 %v528_v8, %v5849_v12  ;;  %v514_v15 = vmul.f32 %v5077_v9, %v5759_v30 }
 0x28f   :  { %8141 = vst [vmem:[#allocation9_spill] sm:$0xff] %v5895_v17  ;;  %v531_v44 = vmul.f32 %v515_v43, %v5842_v48 }
 0x290   :  { %8142 = vst [vmem:[#allocation10_spill] sm:$0xff] %v5899_v14  ;;  %v557_v20 = vpack.c.bf16 %v5895_v17, %v5899_v14  ;;  %v5079_v21 = vpop.eup %5078  ;;  %v530_v23 = vmul.f32 %v514_v15, %v5842_v48 }
 0x291   :  { %v5081_v11 = vpop.eup %5080  ;;  %v5909_v26 = vadd.f32 %v531_v44, %v5849_v12  ;;  %v517_v30 = vmul.f32 %v5079_v21, %v5786_v24 }
 0x292   :  { %v5913_v28 = vadd.f32 %v530_v23, %v5849_v12  ;;  %v516_v3 = vmul.f32 %v5081_v11, %v5771_v41 }
 0x293   :  { %8143 = vst [vmem:[#allocation11_spill] sm:$0xff] %v5909_v26  ;;  %v533_v33 = vmul.f32 %v517_v30, %v5842_v48 }
 0x294   :  { %8144 = vst [vmem:[#allocation12_spill] sm:$0xff] %v5913_v28  ;;  %v558_v32 = vpack.c.bf16 %v5909_v26, %v5913_v28  ;;  %v5083_v34 = vpop.eup %5082  ;;  %v532_v61 = vmul.f32 %v516_v3, %v5842_v48 }
 0x295   :  { %4266 = vmatmul.mubr.msk.bf16.gmra.mxu1 %vm312_vm8, %v556_v2  ;;  %v5085_v36 = vpop.eup %5084  ;;  %v5923_v24 = vadd.f32 %v533_v33, %v5849_v12  ;;  %v519_v37 = vmul.f32 %v5083_v34, %v5798_v29 }
 0x296   :  { %709 = vmatprep.mubr.bf16.mxu1 %v5452_v0  ;;  %v5927_v41 = vadd.f32 %v532_v61, %v5849_v12  ;;  %v518_v40 = vmul.f32 %v5085_v36, %v5783_v54 }
 0x297   :  { %8145 = vst [vmem:[#allocation13_spill] sm:$0xff] %v5923_v24  ;;  %v535_v42 = vmul.f32 %v519_v37, %v5842_v48 }
 0x298   :  { %8146 = vst [vmem:[#allocation14_spill] sm:$0xff] %v5927_v41  ;;  %v559_v16 = vpack.c.bf16 %v5923_v24, %v5927_v41  ;;  %v5087_v45 = vpop.eup %5086  ;;  %v534_v46 = vmul.f32 %v518_v40, %v5842_v48 }
 0x299   :  { %v5089_v47 = vpop.eup %5088  ;;  %v5937_v29 = vadd.f32 %v535_v42, %v5849_v12  ;;  %v521_v49 = vmul.f32 %v5087_v45, %v5813_v13 }
 0x29a   :  { %v5941_v54 = vadd.f32 %v534_v46, %v5849_v12  ;;  %v520_v50 = vmul.f32 %v5089_v47, %v5795_v4 }
 0x29b   :  { %8147 = vst [vmem:[#allocation15_spill] sm:$0xff] %v5937_v29  ;;  %v537_v53 = vmul.f32 %v521_v49, %v5842_v48 }
 0x29c   :  { %8148 = vst [vmem:[#allocation16_spill] sm:$0xff] %v5941_v54  ;;  %v560_v58 = vpack.c.bf16 %v5937_v29, %v5941_v54  ;;  %v536_v19 = vmul.f32 %v520_v50, %v5842_v48  ;;  %v4255_v48 = vld [vmem:[%s8076_s6 + $0x2] ss:$8 sm:$0x3]  ;;  %v579_v50 = vsub.s32 1, %v5960_v57 }
 0x29d   :  { %4267 = vmatmul.mubr.msk.bf16.gmra.mxu1 %vm312_vm8, %v557_v20  ;;  %v5951_v56 = vadd.f32 %v537_v53, %v5849_v12  ;;  %v5968_v2 = vrot.slane %v4255_v48, %v575_v62 }
 0x29e   :  { %719 = vmatprep.mubr.bf16.mxu1 %v5452_v0  ;;  %v5954_v13 = vadd.f32 %v536_v19, %v5849_v12 }
 0x29f   :  { %8149 = vst [vmem:[#allocation17_spill] sm:$0xff] %v5951_v56 }
 0x2a0   :  { %8150 = vst [vmem:[#allocation18_spill] sm:$0xff] %v5954_v13  ;;  %v561_v4 = vpack.c.bf16 %v5951_v56, %v5954_v13 }
 0x2a5   :  { %4268 = vmatmul.mubr.msk.bf16.gmra.mxu1 %vm312_vm8, %v558_v32 }
 0x2a6   :  { %729 = vmatprep.mubr.bf16.mxu1 %v5452_v0 }
 0x2ad   :  { %4269 = vmatmul.mubr.msk.bf16.gmra.mxu1 %vm312_vm8, %v559_v16 }
 0x2ae   :  { %739 = vmatprep.mubr.bf16.mxu1 %v5452_v0 }
 0x2b5   :  { %4270 = vmatmul.mubr.msk.bf16.gmra.mxu1 %vm312_vm8, %v560_v58 }
 0x2b6   :  { %749 = vmatprep.mubr.bf16.mxu1 %v5452_v0 }
 0x2bd   :  { %4271 = vmatmul.mubr.msk.bf16.gmra.mxu1 %vm312_vm8, %v561_v4 }
 0x345   :  { %v681_v1 = vpop.f32.mrf.mxu1 }
 0x346   :  { %v682_v5 = vadd.f32 %v681_v1, %v5968_v2 }
 0x347   :  { %v5970_v12 = vpop.f32.mrf.mxu1 }
 0x349   :  { %v685_v35 = vpop.f32.mrf.mxu1 }
 0x34a   :  { %v686_v6 = vadd.f32 %v685_v35, %v5968_v2 }
 0x34b   :  { %v5974_v25 = vpop.f32.mrf.mxu1 }
 0x34c   :  { %v5976_v51 = vpack.c.bf16 %v686_v6, %v682_v5  ;;  %v580_v5 = vrot.slane %v4255_v48, %v579_v50 }
 0x34d   :  { %v691_v8 = vpop.f32.mrf.mxu1 }
 0x34e   :  { %4598 = vmatprep.mubr.msk.bf16.mxu1 %vm914_vm9, %v5976_v51  ;;  %v692_v1 = vadd.f32 %v691_v8, %v5968_v2 }
 0x34f   :  { %v5980_v9 = vpop.f32.mrf.mxu1 }
 0x351   :  { %v695_v10 = vpop.f32.mrf.mxu1 }
 0x352   :  { %v696_v53 = vadd.f32 %v695_v10, %v5968_v2 }
 0x353   :  { %v5982_v38 = vpop.f32.mrf.mxu1 }
 0x355   :  { %v5984_v43 = vpop.f32.mrf.mxu1 }
 0x357   :  { %v5986_v52 = vpop.f32.mrf.mxu1 }
 0x359   :  { %v705_v15 = vpop.f32.mrf.mxu1 }
 0x35b   :  { %v5988_v63 = vpop.f32.mrf.mxu1 }
 0x35d   :  { %v711_v20 = vpop.f32.mrf.mxu1 }
 0x35e   :  { %v712_v58 = vadd.f32 %v711_v20, %v5968_v2  ;;  %v6011_v20 = vpack.c.bf16 %v696_v53, %v692_v1  ;;  %v706_v53 = vadd.f32 %v705_v15, %v5968_v2  ;;  %v702_v1 = vadd.f32 %v5984_v43, %v5968_v2 }
 0x35f   :  { %v5990_v44 = vpop.f32.mrf.mxu1 }
 0x361   :  { %v715_v21 = vpop.f32.mrf.mxu1 }
 0x362   :  { %v716_v46 = vadd.f32 %v715_v21, %v5968_v2 }
 0x363   :  { %v5992_v22 = vpop.f32.mrf.mxu1 }
 0x364   :  { %v6004_v4 = vpack.c.bf16 %v716_v46, %v712_v58  ;;  %v718_v15 = vadd.f32 %v5992_v22, %v580_v5 }
 0x365   :  { %v721_v23 = vpop.f32.mrf.mxu1 }
 0x367   :  { %v723_v11 = vpop.f32.mrf.mxu1 }
 0x369   :  { %v725_v30 = vpop.f32.mrf.mxu1 }
 0x36b   :  { %v727_v3 = vpop.f32.mrf.mxu1 }
 0x36d   :  { %v731_v32 = vpop.f32.mrf.mxu1 }
 0x36e   :  { %v732_v8 = vadd.f32 %v731_v32, %v5968_v2  ;;  %v722_v32 = vadd.f32 %v721_v23, %v5968_v2  ;;  %v6045_v23 = vpack.c.bf16 %v706_v53, %v702_v1  ;;  %v826_v1 = vld [vmem:[%s8077_s1] sm:$0x1]  ;;  %s5457_s1 = smov 112  }
 0x36f   :  { %v733_v33 = vpop.f32.mrf.mxu1  ;;  %vm827_vm10 = vcmp.gt.f32.partialorder %v826_v1, 0.0 }
 0x371   :  { %v735_v34 = vpop.f32.mrf.mxu1 }
 0x373   :  { %v737_v61 = vpop.f32.mrf.mxu1 }
 0x375   :  { %v741_v36 = vpop.f32.mrf.mxu1 }
 0x376   :  { %v742_v16 = vadd.f32 %v741_v36, %v5968_v2  ;;  %v736_v36 = vadd.f32 %v735_v34, %v5968_v2 }
 0x377   :  { %v743_v37 = vpop.f32.mrf.mxu1 }
 0x378   :  { %v744_v48 = vadd.f32 %v743_v37, %v580_v5  ;;  %v6024_v34 = vpack.c.bf16 %v736_v36, %v732_v8  ;;  %v734_v37 = vadd.f32 %v733_v33, %v580_v5 }
 0x379   :  { %v745_v40 = vpop.f32.mrf.mxu1 }
 0x37a   :  { %v746_v42 = vadd.f32 %v745_v40, %v5968_v2 }
 0x37b   :  { %v747_v45 = vpop.f32.mrf.mxu1 }
 0x37c   :  { %v5997_v47 = vpack.c.bf16 %v746_v42, %v742_v16  ;;  %v748_v10 = vadd.f32 %v747_v45, %v580_v5  ;;  %v738_v45 = vadd.f32 %v737_v61, %v580_v5 }
 0x37d   :  { %v751_v49 = vpop.f32.mrf.mxu1 }
 0x37e   :  { %910 = vrot.lane.b32.xlu0 %v5997_v47, %s5454_s30  ;;  %v752_v6 = vadd.f32 %v751_v49, %v5968_v2  ;;  %v726_v49 = vadd.f32 %v725_v30, %v5968_v2  ;;  %v6026_v58 = vpack.c.bf16 %v748_v10, %v744_v48  ;;  %v6037_v61 = vpack.c.bf16 %v738_v45, %v734_v37 }
 0x37f   :  { %v753_v19 = vpop.f32.mrf.mxu1 }
 0x380   :  { %v754_v16 = vadd.f32 %v753_v19, %v580_v5  ;;  %v6035_v30 = vpack.c.bf16 %v726_v49, %v722_v32  ;;  %v728_v19 = vadd.f32 %v727_v3, %v580_v5  ;;  %v714_v3 = vadd.f32 %v5990_v44, %v580_v5 }
 0x381   :  { %v755_v35 = vpop.f32.mrf.mxu1  ;;  %v698_v44 = vadd.f32 %v5982_v38, %v580_v5  ;;  %v684_v38 = vadd.f32 %v5970_v12, %v580_v5 }
 0x382   :  { %v756_v21 = vadd.f32 %v755_v35, %v5968_v2  ;;  %904 = vrot.lane.b32.xlu0 %v6004_v4, %s5454_s30  ;;  %v724_v35 = vadd.f32 %v723_v11, %v580_v5  ;;  %v708_v2 = vadd.f32 %v5988_v63, %v580_v5  ;;  %v6056_v43 = vpack.c.bf16 %v718_v15, %v714_v3 }
 0x383   :  { %v757_v40 = vpop.f32.mrf.mxu1  ;;  %v704_v11 = vadd.f32 %v5986_v52, %v580_v5  ;;  %v688_v52 = vadd.f32 %v5974_v25, %v580_v5  ;;  %v828_v15 = vsel %vm827_vm10, 1, %v5452_v0  ;;  %v780_v3 = vadd.s32 24, %v5960_v57 }
 0x384   :  { %v6014_v42 = vpack.c.bf16 %v756_v21, %v752_v6  ;;  %v758_v46 = vadd.f32 %v757_v40, %v580_v5  ;;  %v6048_v33 = vpack.c.bf16 %v728_v19, %v724_v35  ;;  %v694_v6 = vadd.f32 %v5980_v9, %v580_v5 }
 0x385   :  { %v6064_v22 = vpack.c.bf16 %v708_v2, %v704_v11  ;;  %v6077_v21 = vpack.c.bf16 %v688_v52, %v684_v38  ;;  %v779_v35 = vadd.s32 16, %v5960_v57  ;;  %v6124_v2 = vrot.slane %v828_v15, %v575_v62 }
 0x386   :  { %v6017_v50 = vpack.c.bf16 %v758_v46, %v754_v16  ;;  %900 = vrot.lane.b32.xlu0 %v6011_v20, %s5454_s30  ;;  %912 = vrot.lane.b32.xlu1 %v6014_v42, %s5454_s30  ;;  %v6072_v63 = vpack.c.bf16 %v698_v44, %v694_v6  ;;  %v6127_v44 = vshrl.u32 %v5580_v27, 4  ;;  %v796_v6 = vshrl.u32 %v780_v3, 4 }
 0x387   :  { %v795_v11 = vshrl.u32 %v779_v35, 4  ;;  %v778_v52 = vadd.s32 8, %v5960_v57  ;;  %vm833_vm11 = vcmp.eq.s32.totalorder %v6124_v2, 1  ;;  %v793_v38 = vshrl.u32 %v5960_v57, 4 }
 0x388   :  { %4614 = vmatprep.subr.bf16.mxu0 %v6017_v50  ;;  %vm813_vm13 = vcmp.eq.s32.totalorder %v796_v6, %v6127_v44  ;;  %v783_v62 = vadd.s32 48, %v5960_v57  ;;  %v785_v15 = vadd.s32 64, %v5960_v57 }
 0x389   :  { %4615 = vmatpush3.bf16.msra.mxu0 %v6017_v50  ;;  %vm812_vm12 = vcmp.eq.s32.totalorder %v795_v11, %v6127_v44  ;;  %v794_v0 = vshrl.u32 %v778_v52, 4  ;;  %vm837_vm15 = vmand %vm813_vm13, %vm833_vm11  ;;  %vm810_vm0 = vcmp.eq.s32.totalorder %v793_v38, %v6127_v44  ;;  %v786_v11 = vadd.s32 72, %v5960_v57 }
 0x38a   :  { %4616 = vmatprep.subr.bf16.mxu0 %v6026_v58  ;;  %908 = vrot.lane.b32.xlu1 %v6024_v34, %s5454_s30  ;;  %vm836_vm14 = vmand %vm812_vm12, %vm833_vm11 }
 0x38b   :  { %vm811_vm1 = vcmp.eq.s32.totalorder %v794_v0, %v6127_v44  ;;  %vm834_vm2 = vmand %vm810_vm0, %vm833_vm11 }
 0x38c   :  { %vm835_vm3 = vmand %vm811_vm1, %vm833_vm11 }
 0x38d   :  { %4617 = vmatpush3.bf16.msra.mxu0 %v6026_v58 }
 0x38e   :  { %4618 = vmatprep.subr.bf16.mxu0 %v6037_v61  ;;  %906 = vrot.lane.b32.xlu1 %v6035_v30, %s5454_s30 }
 0x391   :  { %4619 = vmatpush3.bf16.msra.mxu0 %v6037_v61 }
 0x392   :  { %4620 = vmatprep.subr.bf16.mxu0 %v6048_v33  ;;  %902 = vrot.lane.b32.xlu1 %v6045_v23, %s5454_s30 }
 0x395   :  { %4621 = vmatpush3.bf16.msra.mxu0 %v6048_v33 }
 0x396   :  { %4622 = vmatprep.subr.bf16.mxu0 %v6056_v43  ;;  %898 = vrot.lane.b32.xlu1 %v5976_v51, %s5454_s30 }
 0x399   :  { %4623 = vmatpush3.bf16.msra.mxu0 %v6056_v43 }
 0x39a   :  { %4624 = vmatprep.subr.bf16.mxu0 %v6064_v22  ;;  %1347 = vrot.lane.b32.xlu1 %v6014_v42, %s5455_s8 }
 0x39d   :  { %4625 = vmatpush3.bf16.msra.mxu0 %v6064_v22 }
 0x39e   :  { %4626 = vmatprep.subr.bf16.mxu0 %v6072_v63 }
 0x3a1   :  { %4627 = vmatpush3.bf16.msra.mxu0 %v6072_v63 }
 0x3a2   :  { %4628 = vmatprep.subr.bf16.mxu0 %v6077_v21 }
 0x3a5   :  { %4629 = vmatpush3.bf16.msra.mxu0 %v6077_v21 }
 0x3f0   :  { %v911_v36 = vpop.permute.xlu0 %910 }
 0x3f1   :  { %v958_v40 = vsel %vm914_vm9, %v911_v36, 0 }
 0x3f4   :  { %v905_v49 = vpop.permute.xlu0 %904 }
 0x3f5   :  { %v949_v45 = vsel %vm914_vm9, %v905_v49, 0 }
 0x3f8   :  { %v913_v9 = vpop.permute.xlu1 %912  ;;  %v901_v37 = vpop.permute.xlu0 %900 }
 0x3f9   :  { %4968 = vmatprep.subr.msk.bf16.mxu1 %vm914_vm9, %v913_v9  ;;  %v961_v25 = vsel %vm914_vm9, %v913_v9, 0  ;;  %v943_v53 = vsel %vm914_vm9, %v901_v37, 0  ;;  %v784_v9 = vadd.s32 56, %v5960_v57 }
 0x3fa   :  { %4583 = vmatpush3.bf16.xpose.msra.mxu1 %v961_v25  ;;  %v5456_v25 = vmov -1e+09  }
 0x3fb   :  { %4969 = vmatprep.subr.msk.bf16.mxu1 %vm914_vm9, %v911_v36  ;;  %v852_v36 = vsel %vm836_vm14, 0.0, %v5456_v25 }
 0x3fc   :  { %v909_v12 = vpop.permute.xlu1 %908 }
 0x3fd   :  { %v955_v46 = vsel %vm914_vm9, %v909_v12, 0 }
 0x400   :  { %v907_v5 = vpop.permute.xlu1 %906 }
 0x401   :  { %v952_v48 = vsel %vm914_vm9, %v907_v5, 0 }
 0x402   :  { %4585 = vmatpush3.bf16.xpose.msra.mxu1 %v958_v40  ;;  %v781_v40 = vadd.s32 32, %v5960_v57 }
 0x403   :  { %4970 = vmatprep.subr.msk.bf16.mxu1 %vm914_vm9, %v909_v12  ;;  %v853_v12 = vsel %vm837_vm15, 0.0, %v5456_v25 }
 0x404   :  { %v903_v10 = vpop.permute.xlu1 %902 }
 0x405   :  { %v946_v32 = vsel %vm914_vm9, %v903_v10, 0 }
 0x408   :  { %v899_v16 = vpop.permute.xlu1 %898 }
 0x409   :  { %v940_v19 = vsel %vm914_vm9, %v899_v16, 0 }
 0x40a   :  { %4587 = vmatpush3.bf16.xpose.msra.mxu1 %v955_v46  ;;  %v867_v46 = vpack.c.bf16 %v853_v12, %v852_v36  ;;  %v791_v36 = vadd.s32 112, %v5960_v57 }
 0x40b   :  { %4971 = vmatprep.subr.msk.bf16.mxu1 %vm914_vm9, %v907_v5  ;;  %v799_v5 = vshrl.u32 %v783_v62, 4 }
 0x40c   :  { %v6089_v8 = vpop.permute.xlu1 %1347  ;;  %v6158_v1 = vunpack.c.l.bf16 %v867_v46 }
 0x40d   :  { %4976 = vmatprep.subr.msk.bf16.mxu0 %vm914_vm9, %v6089_v8  ;;  %vm816_vm4 = vcmp.eq.s32.totalorder %v799_v5, %v6127_v44  ;;  %v802_v5 = vshrl.u32 %v786_v11, 4 }
 0x40e   :  { %vm840_vm6 = vmand %vm816_vm4, %vm833_vm11 }
 0x40f   :  { %v856_v38 = vsel %vm840_vm6, 0.0, %v5456_v25  ;;  %vm819_vm4 = vcmp.eq.s32.totalorder %v802_v5, %v6127_v44 }
 0x410   :  { %vm843_vm6 = vmand %vm819_vm4, %vm833_vm11 }
 0x411   :  { %v859_v27 = vsel %vm843_vm6, 0.0, %v5456_v25  ;;  %vm4067_vm6 = vcmask 64512  }
 0x412   :  { %4589 = vmatpush3.bf16.xpose.msra.mxu1 %v952_v48  ;;  %v850_v48 = vsel %vm834_vm2, 0.0, %v5456_v25 }
 0x413   :  { %4972 = vmatprep.subr.msk.bf16.mxu1 %vm914_vm9, %v905_v49  ;;  %v851_v49 = vsel %vm835_vm3, 0.0, %v5456_v25 }
 0x41a   :  { %4591 = vmatpush3.bf16.xpose.msra.mxu1 %v949_v45  ;;  %v797_v45 = vshrl.u32 %v781_v40, 4  ;;  %v792_v40 = vadd.s32 120, %v5960_v57 }
 0x41b   :  { %4973 = vmatprep.subr.msk.bf16.mxu1 %vm914_vm9, %v903_v10  ;;  %v800_v10 = vshrl.u32 %v784_v9, 4  ;;  %v801_v9 = vshrl.u32 %v785_v15, 4  ;;  %v790_v15 = vadd.s32 104, %v5960_v57 }
 0x41c   :  { %vm814_vm10 = vcmp.eq.s32.totalorder %v797_v45, %v6127_v44 }
 0x41d   :  { %vm817_vm5 = vcmp.eq.s32.totalorder %v800_v10, %v6127_v44  ;;  %vm838_vm13 = vmand %vm814_vm10, %vm833_vm11  ;;  %vm818_vm3 = vcmp.eq.s32.totalorder %v801_v9, %v6127_v44 }
 0x41e   :  { %vm841_vm7 = vmand %vm817_vm5, %vm833_vm11  ;;  %v854_v45 = vsel %vm838_vm13, 0.0, %v5456_v25 }
 0x41f   :  { %v857_v0 = vsel %vm841_vm7, 0.0, %v5456_v25  ;;  %vm842_vm5 = vmand %vm818_vm3, %vm833_vm11 }
 0x420   :  { %v858_v31 = vsel %vm842_vm5, 0.0, %v5456_v25  ;;  %vm4071_vm5 = vcmask 1043456  }
 0x422   :  { %4593 = vmatpush3.bf16.xpose.msra.mxu1 %v946_v32  ;;  %v787_v32 = vadd.s32 80, %v5960_v57 }
 0x423   :  { %4974 = vmatprep.subr.msk.bf16.mxu1 %vm914_vm9, %v901_v37 }
 0x424   :  { %v803_v35 = vshrl.u32 %v787_v32, 4 }
 0x426   :  { %vm820_vm15 = vcmp.eq.s32.totalorder %v803_v35, %v6127_v44  ;;  %v808_v35 = vshrl.u32 %v792_v40, 4  ;;  %v806_v40 = vshrl.u32 %v790_v15, 4  ;;  %v870_v15 = vpack.c.bf16 %v859_v27, %v858_v31 }
 0x427   :  { %vm844_vm1 = vmand %vm820_vm15, %vm833_vm11 }
 0x428   :  { %vm825_vm10 = vcmp.eq.s32.totalorder %v808_v35, %v6127_v44  ;;  %vm823_vm15 = vcmp.eq.s32.totalorder %v806_v40, %v6127_v44  ;;  %v6293_v41 = vunpack.c.h.bf16 %v870_v15 }
 0x429   :  { %vm849_vm13 = vmand %vm825_vm10, %vm833_vm11 }
 0x42a   :  { %4595 = vmatpush3.bf16.xpose.msra.mxu1 %v943_v53  ;;  %v788_v53 = vadd.s32 88, %v5960_v57 }
 0x42b   :  { %4975 = vmatprep.subr.msk.bf16.mxu1 %vm914_vm9, %v899_v16  ;;  %v782_v16 = vadd.s32 40, %v5960_v57 }
 0x42c   :  { %v804_v3 = vshrl.u32 %v788_v53, 4  ;;  %v807_v53 = vshrl.u32 %v791_v36, 4 }
 0x42d   :  { %v798_v37 = vshrl.u32 %v782_v16, 4  ;;  %v6184_v16 = vpack.c.bf16 %v857_v0, %v856_v38  ;;  %v860_v0 = vsel %vm844_vm1, 0.0, %v5456_v25  ;;  %vm847_vm1 = vmand %vm823_vm15, %vm833_vm11 }
 0x42e   :  { %vm821_vm0 = vcmp.eq.s32.totalorder %v804_v3, %v6127_v44  ;;  %vm824_vm7 = vcmp.eq.s32.totalorder %v807_v53, %v6127_v44 }
 0x42f   :  { %vm815_vm12 = vcmp.eq.s32.totalorder %v798_v37, %v6127_v44  ;;  %vm845_vm2 = vmand %vm821_vm0, %vm833_vm11  ;;  %v6206_v11 = vunpack.c.l.bf16 %v6184_v16 }
 0x430   :  { %vm839_vm14 = vmand %vm815_vm12, %vm833_vm11  ;;  %v861_v9 = vsel %vm845_vm2, 0.0, %v5456_v25  ;;  %vm2812_vm2 = vcmask 392192  }
 0x431   :  { %v855_v32 = vsel %vm839_vm14, 0.0, %v5456_v25  ;;  %vm848_vm12 = vmand %vm824_vm7, %vm833_vm11 }
 0x432   :  { %4597 = vmatpush3.bf16.xpose.msra.mxu1 %v940_v19  ;;  %v866_v19 = vpack.c.bf16 %v851_v49, %v850_v48  ;;  %v6186_v48 = vunpack.c.h.bf16 %v867_v46  ;;  %v789_v46 = vadd.s32 96, %v5960_v57  ;;  %v863_v57 = vsel %vm847_vm1, 0.0, %v5456_v25 }
 0x434   :  { %v6166_v52 = vunpack.c.l.bf16 %v866_v19  ;;  %v6182_v10 = vunpack.c.h.bf16 %v866_v19 }
 0x439   :  { %4599 = vmatmul.mubr.msk.bf16.vlgmr.msra.gmra.mxu1 %vm914_vm9, %v6011_v20 }
 0x43a   :  { %4602 = vmatprep.mubr.msk.bf16.mxu1 %vm914_vm9, %v6045_v23 }
 0x441   :  { %4603 = vmatmul.mubr.msk.bf16.gmra.mxu1 %vm914_vm9, %v6004_v4 }
 0x442   :  { %4606 = vmatprep.mubr.msk.bf16.mxu1 %vm914_vm9, %v6035_v30 }
 0x449   :  { %4607 = vmatmul.mubr.msk.bf16.gmra.mxu1 %vm914_vm9, %v6024_v34 }
 0x44a   :  { %4610 = vmatprep.mubr.msk.bf16.mxu1 %vm914_vm9, %v5997_v47 }
 0x451   :  { %4611 = vmatmul.mubr.msk.bf16.gmra.mxu1 %vm914_vm9, %v6014_v42 }
 0x4f9   :  { %v4600_v6 = vpop.f32.mrf.mxu1 }
 0x4fa   :  { %v6173_v62 = vadd.f32 %v4600_v6, %v6158_v1  ;;  %v868_v6 = vpack.c.bf16 %v855_v32, %v854_v45 }
 0x4fb   :  { %v997_v12 = vpop.f32.mrf.mxu1 }
 0x4fc   :  { %1064 = vmax.xlane.f32.xlu0 %v6173_v62  ;;  %v6193_v37 = vadd.f32 %v997_v12, %v6166_v52  ;;  %v805_v12 = vshrl.u32 %v789_v46, 4  ;;  %v6223_v32 = vunpack.c.l.bf16 %v868_v6 }
 0x4fd   :  { %v4601_v49 = vpop.f32.mrf.mxu1 }
 0x4fe   :  { %v6213_v36 = vadd.f32 %v4601_v49, %v6186_v48  ;;  %v871_v49 = vpack.c.bf16 %v861_v9, %v860_v0  ;;  %vm822_vm14 = vcmp.eq.s32.totalorder %v805_v12, %v6127_v44  ;;  %v864_v0 = vsel %vm848_vm12, 0.0, %v5456_v25 }
 0x4ff   :  { %v1000_v19 = vpop.f32.mrf.mxu1  ;;  %v865_v9 = vsel %vm849_vm13, 0.0, %v5456_v25  ;;  %vm846_vm0 = vmand %vm822_vm14, %vm833_vm11  ;;  %vm2795_vm11 = vcmask 261120  }
 0x500   :  { %v6202_v3 = vadd.f32 %v1000_v19, %v6182_v10  ;;  %1060 = vmax.xlane.f32.xlu0 %v6193_v37  ;;  %v6238_v35 = vunpack.c.l.bf16 %v871_v49  ;;  %v873_v27 = vpack.c.bf16 %v865_v9, %v864_v0  ;;  %v862_v40 = vsel %vm846_vm0, 0.0, %v5456_v25 }
 0x501   :  { %v4604_v38 = vpop.f32.mrf.mxu1  ;;  %v872_v13 = vpack.c.bf16 %v863_v57, %v862_v40  ;;  %v6276_v57 = vunpack.c.h.bf16 %v6184_v16 }
 0x502   :  { %1062 = vmax.xlane.f32.xlu1 %v6202_v3  ;;  %v6221_v45 = vadd.f32 %v4604_v38, %v6206_v11  ;;  %v6258_v2 = vunpack.c.l.bf16 %v873_v27 }
 0x503   :  { %v1013_v5 = vpop.f32.mrf.mxu1  ;;  %v6264_v0 = vunpack.c.l.bf16 %v872_v13 }
 0x504   :  { %1066 = vmax.xlane.f32.xlu0 %v6213_v36  ;;  %v6236_v46 = vadd.f32 %v1013_v5, %v6223_v32  ;;  %v6250_v5 = vunpack.c.l.bf16 %v870_v15 }
 0x505   :  { %v4605_v19 = vpop.f32.mrf.mxu1 }
 0x506   :  { %1072 = vmax.xlane.f32.xlu1 %v6221_v45 }
 0x507   :  { %v1016_v53 = vpop.f32.mrf.mxu1 }
 0x509   :  { %v4608_v38 = vpop.f32.mrf.mxu1 }
 0x50a   :  { %1068 = vmax.xlane.f32.xlu1 %v6236_v46  ;;  %v6248_v12 = vadd.f32 %v4608_v38, %v6238_v35 }
 0x50b   :  { %v1029_v44 = vpop.f32.mrf.mxu1 }
 0x50c   :  { %v6256_v29 = vadd.f32 %v1029_v44, %v6250_v5  ;;  %v6281_v44 = vunpack.c.h.bf16 %v868_v6  ;;  %v6299_v6 = vunpack.c.h.bf16 %v873_v27 }
 0x50d   :  { %v4609_v31 = vpop.f32.mrf.mxu1 }
 0x50e   :  { %1080 = vmax.xlane.f32.xlu1 %v6248_v12  ;;  %v6285_v40 = vadd.f32 %v1016_v53, %v6281_v44  ;;  %8152 = vst [vmem:[#allocation20_spill] sm:$0xff] %v6299_v6  ;;  %v6305_v53 = vunpack.c.h.bf16 %v872_v13 }
 0x50f   :  { %v1032_v56 = vpop.f32.mrf.mxu1 }
 0x510   :  { %v6297_v16 = vadd.f32 %v1032_v56, %v6293_v41  ;;  %8153 = vst [vmem:[#allocation21_spill] sm:$0xff] %v6305_v53 }
 0x511   :  { %v4612_v54 = vpop.f32.mrf.mxu1 }
 0x512   :  { %1076 = vmax.xlane.f32.xlu1 %v6256_v29  ;;  %v6262_v38 = vadd.f32 %v4612_v54, %v6258_v2  ;;  %v6279_v54 = vadd.f32 %v4605_v19, %v6276_v57 }
 0x513   :  { %v1045_v9 = vpop.f32.mrf.mxu1 }
 0x514   :  { %v6268_v25 = vadd.f32 %v1045_v9, %v6264_v0  ;;  %v6287_v9 = vunpack.c.h.bf16 %v871_v49 }
 0x515   :  { %v4613_v19 = vpop.f32.mrf.mxu1 }
 0x516   :  { %1088 = vmax.xlane.f32.xlu1 %v6262_v38  ;;  %v6291_v24 = vadd.f32 %v4609_v31, %v6287_v9  ;;  %v6303_v49 = vadd.f32 %v4613_v19, %v6299_v6 }
 0x517   :  { %v1048_v26 = vpop.f32.mrf.mxu1 }
 0x518   :  { %v6309_v15 = vadd.f32 %v1048_v26, %v6305_v53 }
 0x51a   :  { %1084 = vmax.xlane.f32.xlu1 %v6268_v25  ;;  %1345 = vrot.lane.b32.xlu0 %v5997_v47, %s5455_s8 }
 0x52b   :  { %1343 = vrot.lane.b32.xlu1 %v6024_v34, %s5455_s8 }
 0x539   :  { %1074 = vmax.xlane.f32.xlu0 %v6279_v54 }
 0x53d   :  { %1070 = vmax.xlane.f32.xlu0 %v6285_v40 }
 0x541   :  { %1082 = vmax.xlane.f32.xlu0 %v6291_v24 }
 0x545   :  { %1078 = vmax.xlane.f32.xlu0 %v6297_v16 }
 0x549   :  { %1090 = vmax.xlane.f32.xlu0 %v6303_v49 }
 0x54d   :  { %1086 = vmax.xlane.f32.xlu0 %v6309_v15 }
 0x585   :  { %v1065_v56 = vpop.xlane.xlu0 %1064 }
 0x586   :  { %v1094_v27 = vsub.f32 %v6173_v62, %v1065_v56 }
 0x588   :  { %v1112_v31 = vmul.f32 1.442695, %v1094_v27 }
 0x589   :  { %v1061_v28 = vpop.xlane.xlu0 %1060 }
 0x58a   :  { %5090 = vpow2.f32 %v1112_v31  ;;  %v1092_v17 = vsub.f32 %v6193_v37, %v1061_v28 }
 0x58b   :  { %v1063_v19 = vpop.xlane.xlu1 %1062 }
 0x58c   :  { %v1108_v14 = vmul.f32 1.442695, %v1092_v17  ;;  %v1093_v7 = vsub.f32 %v6202_v3, %v1063_v19 }
 0x58d   :  { %v1067_v13 = vpop.xlane.xlu0 %1066 }
 0x58e   :  { %5092 = vpow2.f32 %v1108_v14  ;;  %v1095_v59 = vsub.f32 %v6213_v36, %v1067_v13  ;;  %v1110_v55 = vmul.f32 1.442695, %v1093_v7 }
 0x58f   :  { %v1073_v26 = vpop.xlane.xlu1 %1072 }
 0x590   :  { %v1114_v39 = vmul.f32 1.442695, %v1095_v59  ;;  %v1098_v60 = vsub.f32 %v6221_v45, %v1073_v26 }
 0x591   :  { %v6340_v7 = vpop.permute.xlu0 %1345 }
 0x592   :  { %5094 = vpow2.f32 %v1114_v39  ;;  %v1120_v62 = vmul.f32 1.442695, %v1098_v60 }
 0x593   :  { %v1069_v56 = vpop.xlane.xlu1 %1068 }
 0x594   :  { %5096 = vpow2.f32 %v1120_v62  ;;  %v1096_v27 = vsub.f32 %v6236_v46, %v1069_v56 }
 0x595   :  { %5098 = vpow2.f32 %v1110_v55 }
 0x596   :  { %v1116_v28 = vmul.f32 1.442695, %v1096_v27 }
 0x597   :  { %v6318_v17 = vpop.eup %5090  ;;  %v1081_v45 = vpop.xlane.xlu1 %1080 }
 0x598   :  { %5100 = vpow2.f32 %v1116_v28  ;;  %1144 = vadd.xlane.f32.xlu1 %v6318_v17  ;;  %v1102_v26 = vsub.f32 %v6248_v12, %v1081_v45 }
 0x59a   :  { %v1128_v18 = vmul.f32 1.442695, %v1102_v26 }
 0x59b   :  { %v6321_v14 = vpop.eup %5092  ;;  %v1077_v62 = vpop.xlane.xlu1 %1076 }
 0x59c   :  { %1140 = vadd.xlane.f32.xlu1 %v6321_v14  ;;  %v1100_v27 = vsub.f32 %v6256_v29, %v1077_v62 }
 0x59e   :  { %v1124_v53 = vmul.f32 1.442695, %v1100_v27 }
 0x59f   :  { %v6324_v59 = vpop.eup %5094 }
 0x5a0   :  { %1146 = vadd.xlane.f32.xlu0 %v6324_v59 }
 0x5a1   :  { %v6327_v60 = vpop.eup %5096 }
 0x5a2   :  { %1152 = vadd.xlane.f32.xlu1 %v6327_v60  ;;  %v6330_v39 = vpop.eup %5098 }
 0x5a4   :  { %1142 = vadd.xlane.f32.xlu0 %v6330_v39 }
 0x5a5   :  { %v6333_v55 = vpop.eup %5100 }
 0x5a6   :  { %1148 = vadd.xlane.f32.xlu1 %v6333_v55 }
 0x5b7   :  { %1341 = vrot.lane.b32.xlu1 %v6035_v30, %s5455_s8 }
 0x5ba   :  { %1339 = vrot.lane.b32.xlu0 %v6004_v4, %s5455_s8 }
 0x5be   :  { %1337 = vrot.lane.b32.xlu0 %v6045_v23, %s5455_s8 }
 0x5c2   :  { %v1075_v37 = vpop.xlane.xlu0 %1074 }
 0x5c3   :  { %v1099_v36 = vsub.f32 %v6279_v54, %v1075_v37 }
 0x5c5   :  { %v1122_v31 = vmul.f32 1.442695, %v1099_v36 }
 0x5c6   :  { %v1071_v3 = vpop.xlane.xlu0 %1070 }
 0x5c7   :  { %v1097_v19 = vsub.f32 %v6285_v40, %v1071_v3  ;;  %5102 = vpow2.f32 %v1122_v31  ;;  %v1089_v40 = vpop.xlane.xlu1 %1088 }
 0x5c8   :  { %v1106_v29 = vsub.f32 %v6262_v38, %v1089_v40 }
 0x5c9   :  { %v1118_v56 = vmul.f32 1.442695, %v1097_v19 }
 0x5ca   :  { %v1083_v46 = vpop.xlane.xlu0 %1082 }
 0x5cb   :  { %5104 = vpow2.f32 %v1118_v56  ;;  %v1103_v54 = vsub.f32 %v6291_v24, %v1083_v46  ;;  %v1085_v24 = vpop.xlane.xlu1 %1084 }
 0x5cc   :  { %5106 = vpow2.f32 %v1128_v18 }
 0x5cd   :  { %5108 = vpow2.f32 %v1124_v53  ;;  %v1130_v3 = vmul.f32 1.442695, %v1103_v54  ;;  %v1104_v53 = vsub.f32 %v6268_v25, %v1085_v24 }
 0x5ce   :  { %v1079_v13 = vpop.xlane.xlu0 %1078 }
 0x5cf   :  { %v1101_v12 = vsub.f32 %v6297_v16, %v1079_v13  ;;  %v1132_v46 = vmul.f32 1.442695, %v1104_v53  ;;  %v1344_v27 = vpop.permute.xlu1 %1343 }
 0x5d1   :  { %v1126_v31 = vmul.f32 1.442695, %v1101_v12 }
 0x5d2   :  { %v1091_v28 = vpop.xlane.xlu0 %1090 }
 0x5d3   :  { %v1107_v38 = vsub.f32 %v6303_v49, %v1091_v28 }
 0x5d4   :  { %v6351_v45 = vpop.eup %5102 }
 0x5d5   :  { %v1138_v13 = vmul.f32 1.442695, %v1107_v38 }
 0x5d6   :  { %v1087_v6 = vpop.xlane.xlu0 %1086 }
 0x5d7   :  { %v1105_v37 = vsub.f32 %v6309_v15, %v1087_v6  ;;  %v1136_v6 = vmul.f32 1.442695, %v1106_v29 }
 0x5d8   :  { %v6355_v18 = vpop.eup %5104 }
 0x5d9   :  { %v1134_v36 = vmul.f32 1.442695, %v1105_v37  ;;  %v6359_v15 = vpop.eup %5106 }
 0x5da   :  { %v6362_v16 = vpop.eup %5108 }
 0x5db   :  { %5110 = vpow2.f32 %v1134_v36 }
 0x5dc   :  { %5112 = vpow2.f32 %v1130_v3 }
 0x5dd   :  { %1154 = vadd.xlane.f32.xlu0 %v6351_v45  ;;  %5114 = vpow2.f32 %v1126_v31 }
 0x5de   :  { %5116 = vpow2.f32 %v1136_v6 }
 0x5df   :  { %5118 = vpow2.f32 %v1132_v46 }
 0x5e0   :  { %5120 = vpow2.f32 %v1138_v13  ;;  %v1395_v13 = vsel %vm914_vm9, %v6089_v8, 0 }
 0x5e1   :  { %1150 = vadd.xlane.f32.xlu0 %v6355_v18 }
 0x5e5   :  { %1160 = vadd.xlane.f32.xlu0 %v6359_v15 }
 0x5e8   :  { %v6365_v19 = vpop.eup %5110 }
 0x5e9   :  { %1156 = vadd.xlane.f32.xlu0 %v6362_v16  ;;  %1166 = vadd.xlane.f32.xlu1 %v6365_v19  ;;  %v6369_v25 = vpop.eup %5112 }
 0x5ea   :  { %v6372_v26 = vpop.eup %5114 }
 0x5eb   :  { %v6375_v62 = vpop.eup %5116 }
 0x5ec   :  { %v6378_v49 = vpop.eup %5118 }
 0x5ed   :  { %1162 = vadd.xlane.f32.xlu0 %v6369_v25  ;;  %v6383_v56 = vpop.eup %5120 }
 0x5f1   :  { %1158 = vadd.xlane.f32.xlu0 %v6372_v26 }
 0x5f5   :  { %1168 = vadd.xlane.f32.xlu0 %v6375_v62 }
 0x5f9   :  { %1164 = vadd.xlane.f32.xlu0 %v6378_v49 }
 0x5fa   :  { %1333 = vrot.lane.b32.xlu1 %v5976_v51, %s5455_s8 }
 0x5fd   :  { %1170 = vadd.xlane.f32.xlu0 %v6383_v56 }
 0x5fe   :  { %1325 = vrot.lane.b32.xlu1 %v6035_v30, %s5457_s1 }
 0x602   :  { %1329 = vrot.lane.b32.xlu1 %v5997_v47, %s5457_s1 }
 0x606   :  { %1666 = vrot.lane.b32.xlu1 %v6026_v58, %s5457_s1 }
 0x613   :  { %1335 = vrot.lane.b32.xlu0 %v6011_v20, %s5455_s8 }
 0x617   :  { %1317 = vrot.lane.b32.xlu0 %v5976_v51, %s5457_s1 }
 0x61b   :  { %1319 = vrot.lane.b32.xlu0 %v6011_v20, %s5457_s1 }
 0x61f   :  { %1321 = vrot.lane.b32.xlu0 %v6045_v23, %s5457_s1 }
 0x621   :  { %v1145_v28 = vpop.xlane.xlu1 %1144 }
 0x623   :  { %1323 = vrot.lane.b32.xlu0 %v6004_v4, %s5457_s1 }
 0x625   :  { %v1141_v54 = vpop.xlane.xlu1 %1140 }
 0x627   :  { %1327 = vrot.lane.b32.xlu0 %v6024_v34, %s5457_s1 }
 0x629   :  { %v1147_v37 = vpop.xlane.xlu0 %1146 }
 0x62a   :  { %5122 = vrcp.f32 %v1147_v37 }
 0x62b   :  { %1331 = vrot.lane.b32.xlu0 %v6014_v42, %s5457_s1  ;;  %5124 = vrcp.f32 %v1141_v54 }
 0x62c   :  { %5126 = vrcp.f32 %v1145_v28  ;;  %v1153_v28 = vpop.xlane.xlu1 %1152 }
 0x62d   :  { %v1143_v36 = vpop.xlane.xlu0 %1142 }
 0x62e   :  { %5128 = vrcp.f32 %v1143_v36 }
 0x62f   :  { %1668 = vrot.lane.b32.xlu0 %v6017_v50, %s5457_s1 }
 0x631   :  { %v1340_v54 = vpop.permute.xlu0 %1339 }
 0x632   :  { %v1383_v37 = vsel %vm914_vm9, %v1340_v54, 0 }
 0x633   :  { %1664 = vrot.lane.b32.xlu0 %v6037_v61, %s5457_s1 }
 0x635   :  { %v1338_v36 = vpop.permute.xlu0 %1337 }
 0x637   :  { %1662 = vrot.lane.b32.xlu0 %v6048_v33, %s5457_s1  ;;  %v5123_v40 = vpop.eup %5122 }
 0x638   :  { %v5125_v3 = vpop.eup %5124  ;;  %v1191_v31 = vmul.f32 %v5123_v40, %v6324_v59  ;;  %v1392_v59 = vsel %vm914_vm9, %v6340_v7, 0 }
 0x639   :  { %v5127_v12 = vpop.eup %5126  ;;  %v1188_v24 = vmul.f32 %v5125_v3, %v6321_v14  ;;  %v1149_v14 = vpop.xlane.xlu1 %1148 }
 0x63a   :  { %v1190_v53 = vmul.f32 %v5127_v12, %v6318_v17  ;;  %v1389_v17 = vsel %vm914_vm9, %v1344_v27, 0 }
 0x63b   :  { %v5129_v29 = vpop.eup %5128  ;;  %1660 = vrot.lane.b32.xlu0 %v6056_v43, %s5457_s1 }
 0x63c   :  { %v1189_v6 = vmul.f32 %v5129_v29, %v6330_v39  ;;  %v1205_v38 = vpack.c.bf16 %v1191_v31, %v1190_v53 }
 0x63d   :  { %v1342_v39 = vpop.permute.xlu1 %1341 }
 0x63e   :  { %v1204_v46 = vpack.c.bf16 %v1189_v6, %v1188_v24  ;;  %v1386_v8 = vsel %vm914_vm9, %v1342_v39, 0 }
 0x640   :  { %4630 = vmatprep.mubr.bf16.mxu0 %v1204_v46 }
 0x641   :  { %4631 = vmatmul.mubr.bf16.vlgmr.msra.gmra.mxu0 %v1205_v38 }
 0x642   :  { %4647 = vmatpush3.bf16.xpose.msra.mxu0 %v1395_v13 }
 0x643   :  { %4977 = vmatprep.subr.msk.bf16.mxu0 %vm914_vm9, %v6340_v7 }
 0x64a   :  { %4649 = vmatpush3.bf16.xpose.msra.mxu0 %v1392_v59 }
 0x64b   :  { %4978 = vmatprep.subr.msk.bf16.mxu0 %vm914_vm9, %v1344_v27  ;;  %v1380_v27 = vsel %vm914_vm9, %v1338_v36, 0 }
 0x652   :  { %4651 = vmatpush3.bf16.xpose.msra.mxu0 %v1389_v17 }
 0x653   :  { %4979 = vmatprep.subr.msk.bf16.mxu0 %vm914_vm9, %v1342_v39 }
 0x65a   :  { %4653 = vmatpush3.bf16.xpose.msra.mxu0 %v1386_v8 }
 0x65b   :  { %4980 = vmatprep.subr.msk.bf16.mxu0 %vm914_vm9, %v1340_v54 }
 0x662   :  { %4655 = vmatpush3.bf16.xpose.msra.mxu0 %v1383_v37 }
 0x663   :  { %4981 = vmatprep.subr.msk.bf16.mxu0 %vm914_vm9, %v1338_v36 }
 0x666   :  { %v1155_v7 = vpop.xlane.xlu0 %1154 }
 0x667   :  { %5130 = vrcp.f32 %v1155_v7 }
 0x668   :  { %5132 = vrcp.f32 %v1149_v14 }
 0x669   :  { %5134 = vrcp.f32 %v1153_v28 }
 0x66a   :  { %4657 = vmatpush3.bf16.xpose.msra.mxu0 %v1380_v27  ;;  %v1151_v40 = vpop.xlane.xlu0 %1150 }
 0x66b   :  { %5136 = vrcp.f32 %v1151_v40 }
 0x66e   :  { %v1161_v3 = vpop.xlane.xlu0 %1160 }
 0x672   :  { %v1157_v12 = vpop.xlane.xlu0 %1156  ;;  %v1167_v39 = vpop.xlane.xlu1 %1166 }
 0x674   :  { %v5131_v29 = vpop.eup %5130 }
 0x675   :  { %v5133_v31 = vpop.eup %5132  ;;  %v1195_v46 = vmul.f32 %v5131_v29, %v6351_v45 }
 0x676   :  { %v1163_v24 = vpop.xlane.xlu0 %1162  ;;  %v5135_v6 = vpop.eup %5134  ;;  %v1192_v38 = vmul.f32 %v5133_v31, %v6333_v55 }
 0x677   :  { %5138 = vrcp.f32 %v1163_v24  ;;  %v1194_v59 = vmul.f32 %v5135_v6, %v6327_v60  ;;  %v1334_v31 = vpop.permute.xlu1 %1333 }
 0x678   :  { %v5137_v53 = vpop.eup %5136  ;;  %5140 = vrcp.f32 %v1157_v12 }
 0x679   :  { %v1193_v13 = vmul.f32 %v5137_v53, %v6355_v18  ;;  %5142 = vrcp.f32 %v1161_v3  ;;  %v1207_v17 = vpack.c.bf16 %v1195_v46, %v1194_v59 }
 0x67a   :  { %v1159_v28 = vpop.xlane.xlu0 %1158 }
 0x67b   :  { %5144 = vrcp.f32 %v1159_v28  ;;  %v1206_v14 = vpack.c.bf16 %v1193_v13, %v1192_v38  ;;  %v1374_v38 = vsel %vm914_vm9, %v1334_v31, 0 }
 0x67c   :  { %5146 = vrcp.f32 %v1167_v39 }
 0x67d   :  { %4634 = vmatprep.mubr.bf16.mxu0 %v1206_v14 }
 0x67e   :  { %4635 = vmatmul.mubr.bf16.gmra.mxu0 %v1207_v17  ;;  %v1169_v8 = vpop.xlane.xlu0 %1168 }
 0x682   :  { %v1165_v54 = vpop.xlane.xlu0 %1164 }
 0x683   :  { %5148 = vrcp.f32 %v1165_v54 }
 0x684   :  { %v5139_v45 = vpop.eup %5138  ;;  %5150 = vrcp.f32 %v1169_v8  ;;  %v1326_v8 = vpop.permute.xlu1 %1325 }
 0x685   :  { %v5141_v37 = vpop.eup %5140  ;;  %v1199_v7 = vmul.f32 %v5139_v45, %v6369_v25 }
 0x686   :  { %v1171_v55 = vpop.xlane.xlu0 %1170  ;;  %v5143_v36 = vpop.eup %5142  ;;  %v1196_v60 = vmul.f32 %v5141_v37, %v6362_v16 }
 0x687   :  { %5152 = vrcp.f32 %v1171_v55  ;;  %v1198_v3 = vmul.f32 %v5143_v36, %v6359_v15 }
 0x688   :  { %v5145_v18 = vpop.eup %5144  ;;  %v1330_v54 = vpop.permute.xlu1 %1329 }
 0x689   :  { %v1197_v27 = vmul.f32 %v5145_v18, %v6372_v26  ;;  %v1209_v24 = vpack.c.bf16 %v1199_v7, %v1198_v3  ;;  %v5147_v6 = vpop.eup %5146 }
 0x68a   :  { %v1336_v40 = vpop.permute.xlu0 %1335  ;;  %v1201_v53 = vmul.f32 %v5147_v6, %v6365_v19 }
 0x68b   :  { %4982 = vmatprep.subr.msk.bf16.mxu0 %vm914_vm9, %v1336_v40  ;;  %v1377_v12 = vsel %vm914_vm9, %v1336_v40, 0  ;;  %v1208_v29 = vpack.c.bf16 %v1197_v27, %v1196_v60 }
 0x68c   :  { %4659 = vmatpush3.bf16.xpose.msra.mxu0 %v1377_v12  ;;  %v1667_v55 = vpop.permute.xlu1 %1666 }
 0x68d   :  { %4638 = vmatprep.mubr.bf16.mxu0 %v1208_v29  ;;  %4983 = vmatprep.subr.msk.bf16.mxu0 %vm914_vm9, %v1334_v31 }
 0x68e   :  { %4639 = vmatmul.mubr.bf16.gmra.mxu0 %v1209_v24  ;;  %v1318_v25 = vpop.permute.xlu0 %1317 }
 0x690   :  { %v5149_v16 = vpop.eup %5148 }
 0x691   :  { %v1200_v26 = vmul.f32 %v5149_v16, %v6378_v49  ;;  %v5151_v15 = vpop.eup %5150 }
 0x692   :  { %v1320_v46 = vpop.permute.xlu0 %1319  ;;  %v1202_v59 = vmul.f32 %v5151_v15, %v6375_v62 }
 0x693   :  { %v1210_v13 = vpack.c.bf16 %v1201_v53, %v1200_v26 }
 0x694   :  { %v5153_v28 = vpop.eup %5152  ;;  %4661 = vmatpush3.bf16.xpose.msra.mxu0 %v1374_v38 }
 0x695   :  { %4642 = vmatprep.mubr.bf16.mxu0 %v1210_v13  ;;  %v1203_v14 = vmul.f32 %v5153_v28, %v6383_v56 }
 0x696   :  { %v1322_v17 = vpop.permute.xlu0 %1321 }
 0x697   :  { %v1211_v39 = vpack.c.bf16 %v1203_v14, %v1202_v59 }
 0x699   :  { %4643 = vmatmul.mubr.bf16.gmra.mxu0 %v1211_v39 }
 0x69a   :  { %4662 = vmatprep.mubr.msk.bf16.mxu0 %vm914_vm9, %v1318_v25  ;;  %v1324_v49 = vpop.permute.xlu0 %1323 }
 0x69e   :  { %v1328_v19 = vpop.permute.xlu0 %1327 }
 0x6a1   :  { %4663 = vmatmul.mubr.msk.bf16.vlgmr.msra.gmra.mxu0 %vm914_vm9, %v1320_v46 }
 0x6a2   :  { %4666 = vmatprep.mubr.msk.bf16.mxu0 %vm914_vm9, %v1322_v17  ;;  %v1332_v45 = vpop.permute.xlu0 %1331 }
 0x6a6   :  { %v1669_v37 = vpop.permute.xlu0 %1668 }
 0x6a7   :  { %4678 = vmatprep.subr.bf16.mxu1 %v1669_v37 }
 0x6a8   :  { %4679 = vmatpush3.bf16.msra.mxu1 %v1669_v37 }
 0x6a9   :  { %4667 = vmatmul.mubr.msk.bf16.gmra.mxu0 %vm914_vm9, %v1324_v49  ;;  %4680 = vmatprep.subr.bf16.mxu1 %v1667_v55 }
 0x6aa   :  { %4670 = vmatprep.mubr.msk.bf16.mxu0 %vm914_vm9, %v1326_v8  ;;  %v1665_v62 = vpop.permute.xlu0 %1664 }
 0x6ac   :  { %4681 = vmatpush3.bf16.msra.mxu1 %v1667_v55 }
 0x6ad   :  { %4682 = vmatprep.subr.bf16.mxu1 %v1665_v62 }
 0x6ae   :  { %v1663_v56 = vpop.permute.xlu0 %1662 }
 0x6b0   :  { %4683 = vmatpush3.bf16.msra.mxu1 %v1665_v62 }
 0x6b1   :  { %4671 = vmatmul.mubr.msk.bf16.gmra.mxu0 %vm914_vm9, %v1328_v19  ;;  %4684 = vmatprep.subr.bf16.mxu1 %v1663_v56 }
 0x6b2   :  { %4674 = vmatprep.mubr.msk.bf16.mxu0 %vm914_vm9, %v1330_v54  ;;  %v1661_v36 = vpop.permute.xlu0 %1660 }
 0x6b4   :  { %4685 = vmatpush3.bf16.msra.mxu1 %v1663_v56 }
 0x6b5   :  { %4686 = vmatprep.subr.bf16.mxu1 %v1661_v36 }
 0x6b8   :  { %4687 = vmatpush3.bf16.msra.mxu1 %v1661_v36 }
 0x6b9   :  { %4675 = vmatmul.mubr.msk.bf16.gmra.mxu0 %vm914_vm9, %v1332_v45 }
 0x701   :  { %v6456_v18 = vpop.f32.mrf.mxu0 }
 0x702   :  { %8154 = vst [vmem:[#allocation22_spill] sm:$0xff] %v6456_v18 }
 0x703   :  { %v6458_v7 = vpop.f32.mrf.mxu0 }
 0x704   :  { %8155 = vst [vmem:[#allocation23_spill] sm:$0xff] %v6458_v7 }
 0x705   :  { %v6460_v60 = vpop.f32.mrf.mxu0 }
 0x706   :  { %8156 = vst [vmem:[#allocation24_spill] sm:$0xff] %v6460_v60 }
 0x707   :  { %v6464_v40 = vpop.f32.mrf.mxu0 }
 0x708   :  { %8157 = vst [vmem:[#allocation25_spill] sm:$0xff] %v6464_v40 }
 0x73e   :  { %v6468_v12 = vpop.f32.mrf.mxu0 }
 0x73f   :  { %8158 = vst [vmem:[#allocation26_spill] sm:$0xff] %v6468_v12 }
 0x740   :  { %v6470_v29 = vpop.f32.mrf.mxu0 }
 0x741   :  { %8159 = vst [vmem:[#allocation27_spill] sm:$0xff] %v6470_v29 }
 0x742   :  { %v6472_v31 = vpop.f32.mrf.mxu0 }
 0x743   :  { %8160 = vst [vmem:[#allocation28_spill] sm:$0xff] %v6472_v31 }
 0x744   :  { %v6476_v6 = vpop.f32.mrf.mxu0 }
 0x745   :  { %8161 = vst [vmem:[#allocation29_spill] sm:$0xff] %v6476_v6 }
 0x74e   :  { %v6480_v16 = vpop.f32.mrf.mxu0 }
 0x74f   :  { %8162 = vst [vmem:[#allocation30_spill] sm:$0xff] %v6480_v16 }
 0x750   :  { %v6482_v26 = vpop.f32.mrf.mxu0 }
 0x751   :  { %8163 = vst [vmem:[#allocation31_spill] sm:$0xff] %v6482_v26 }
 0x752   :  { %v6484_v53 = vpop.f32.mrf.mxu0 }
 0x753   :  { %8164 = vst [vmem:[#allocation32_spill] sm:$0xff] %v6484_v53 }
 0x754   :  { %v6488_v46 = vpop.f32.mrf.mxu0 }
 0x755   :  { %8165 = vst [vmem:[#allocation33_spill] sm:$0xff] %v6488_v46 }
 0x759   :  { %v6492_v13 = vpop.f32.mrf.mxu0 }
 0x75a   :  { %8166 = vst [vmem:[#allocation34_spill] sm:$0xff] %v6492_v13 }
 0x75b   :  { %v6494_v28 = vpop.f32.mrf.mxu0 }
 0x75c   :  { %8167 = vst [vmem:[#allocation35_spill] sm:$0xff] %v6494_v28  ;;  %v8171_v28 = vld [vmem:[#allocation21_spill] sm:$0xff] }
 0x75d   :  { %v6496_v59 = vpop.f32.mrf.mxu0 }
 0x75e   :  { %8168 = vst [vmem:[#allocation36_spill] sm:$0xff] %v6496_v59 }
 0x75f   :  { %v6500_v17 = vpop.f32.mrf.mxu0 }
 0x760   :  { %8169 = vst [vmem:[#allocation37_spill] sm:$0xff] %v6500_v17 }
 0x761   :  { %v4664_v49 = vpop.f32.mrf.mxu0 }
 0x762   :  { %v1440_v8 = vadd.f32 %v4664_v49, %v6158_v1 }
 0x763   :  { %v1431_v19 = vpop.f32.mrf.mxu0 }
 0x764   :  { %v1432_v54 = vadd.f32 %v1431_v19, %v6166_v52  ;;  %1498 = vmax.xlane.f32.xlu0 %v1440_v8 }
 0x765   :  { %v4665_v45 = vpop.f32.mrf.mxu0 }
 0x766   :  { %1494 = vmax.xlane.f32.xlu1 %v1432_v54  ;;  %v1443_v55 = vadd.f32 %v4665_v45, %v6186_v48 }
 0x767   :  { %v1434_v37 = vpop.f32.mrf.mxu0 }
 0x768   :  { %v6508_v62 = vadd.f32 %v1434_v37, %v6182_v10 }
 0x769   :  { %v4668_v56 = vpop.f32.mrf.mxu0 }
 0x76a   :  { %1496 = vmax.xlane.f32.xlu0 %v6508_v62  ;;  %1500 = vmax.xlane.f32.xlu1 %v1443_v55  ;;  %v6516_v14 = vadd.f32 %v4668_v56, %v6206_v11 }
 0x76b   :  { %v1447_v36 = vpop.f32.mrf.mxu0 }
 0x76c   :  { %v6524_v15 = vadd.f32 %v1447_v36, %v6223_v32 }
 0x76d   :  { %v4669_v49 = vpop.f32.mrf.mxu0 }
 0x76e   :  { %v6519_v45 = vadd.f32 %v4669_v49, %v6276_v57 }
 0x76f   :  { %v1450_v19 = vpop.f32.mrf.mxu0 }
 0x770   :  { %v6527_v38 = vadd.f32 %v1450_v19, %v6281_v44 }
 0x771   :  { %v4672_v39 = vpop.f32.mrf.mxu0 }
 0x772   :  { %v6532_v56 = vadd.f32 %v4672_v39, %v6238_v35 }
 0x773   :  { %v1463_v37 = vpop.f32.mrf.mxu0 }
 0x774   :  { %v6540_v36 = vadd.f32 %v1463_v37, %v6250_v5 }
 0x775   :  { %v4673_v24 = vpop.f32.mrf.mxu0 }
 0x776   :  { %v6535_v49 = vadd.f32 %v4673_v24, %v6287_v9 }
 0x777   :  { %v1466_v25 = vpop.f32.mrf.mxu0 }
 0x778   :  { %v6543_v19 = vadd.f32 %v1466_v25, %v6293_v41  ;;  %v8170_v25 = vld [vmem:[#allocation20_spill] sm:$0xff] }
 0x779   :  { %v4676_v27 = vpop.f32.mrf.mxu0 }
 0x77a   :  { %v6548_v39 = vadd.f32 %v4676_v27, %v6258_v2 }
 0x77b   :  { %1656 = vrot.lane.b32.xlu1 %v6072_v63, %s5457_s1  ;;  %v1479_v24 = vpop.f32.mrf.mxu0 }
 0x77c   :  { %v6552_v3 = vadd.f32 %v1479_v24, %v6264_v0 }
 0x77d   :  { %v4677_v27 = vpop.f32.mrf.mxu0 }
 0x77e   :  { %v6566_v37 = vadd.f32 %v4677_v27, %v8170_v25 }
 0x77f   :  { %v1482_v24 = vpop.f32.mrf.mxu0 }
 0x780   :  { %1658 = vrot.lane.b32.xlu0 %v6064_v22, %s5457_s1  ;;  %v6570_v17 = vadd.f32 %v1482_v24, %v8171_v28 }
 0x79f   :  { %1506 = vmax.xlane.f32.xlu0 %v6516_v14  ;;  %1508 = vmax.xlane.f32.xlu1 %v6519_v45 }
 0x7a3   :  { %1504 = vmax.xlane.f32.xlu1 %v6527_v38  ;;  %1502 = vmax.xlane.f32.xlu0 %v6524_v15 }
 0x7a7   :  { %1514 = vmax.xlane.f32.xlu0 %v6532_v56  ;;  %1516 = vmax.xlane.f32.xlu1 %v6535_v49 }
 0x7ab   :  { %1512 = vmax.xlane.f32.xlu1 %v6543_v19  ;;  %1510 = vmax.xlane.f32.xlu0 %v6540_v36 }
 0x7af   :  { %1522 = vmax.xlane.f32.xlu0 %v6548_v39 }
 0x7b3   :  { %1518 = vmax.xlane.f32.xlu0 %v6552_v3 }
 0x7bc   :  { %1813 = vrot.lane.b32.xlu1 %v6014_v42, %s5458_s10 }
 0x7c9   :  { %1654 = vrot.lane.b32.xlu0 %v6077_v21, %s5457_s1 }
 0x7cd   :  { %1811 = vrot.lane.b32.xlu0 %v5997_v47, %s5458_s10 }
 0x7d1   :  { %1809 = vrot.lane.b32.xlu0 %v6024_v34, %s5458_s10 }
 0x7d5   :  { %1805 = vrot.lane.b32.xlu0 %v6004_v4, %s5458_s10 }
 0x7e0   :  { %1524 = vmax.xlane.f32.xlu1 %v6566_v37 }
 0x7e4   :  { %1520 = vmax.xlane.f32.xlu1 %v6570_v17 }
 0x7ed   :  { %v1499_v13 = vpop.xlane.xlu0 %1498 }
 0x7ee   :  { %v1528_v59 = vsub.f32 %v1440_v8, %v1499_v13 }
 0x7ef   :  { %v1495_v16 = vpop.xlane.xlu1 %1494 }
 0x7f0   :  { %v1546_v53 = vmul.f32 1.442695, %v1528_v59  ;;  %v1526_v26 = vsub.f32 %v1432_v54, %v1495_v16 }
 0x7f2   :  { %5154 = vpow2.f32 %v1546_v53  ;;  %v1542_v46 = vmul.f32 1.442695, %v1526_v26 }
 0x7f3   :  { %v1501_v12 = vpop.xlane.xlu1 %1500  ;;  %v1497_v31 = vpop.xlane.xlu0 %1496 }
 0x7f4   :  { %v1529_v29 = vsub.f32 %v1443_v55, %v1501_v12  ;;  %5156 = vpow2.f32 %v1542_v46  ;;  %v1527_v6 = vsub.f32 %v6508_v62, %v1497_v31 }
 0x7f6   :  { %v1548_v27 = vmul.f32 1.442695, %v1529_v29  ;;  %v1544_v60 = vmul.f32 1.442695, %v1527_v6 }
 0x7f7   :  { %v1659_v18 = vpop.permute.xlu0 %1658  ;;  %v1657_v24 = vpop.permute.xlu1 %1656 }
 0x7f8   :  { %4688 = vmatprep.subr.bf16.mxu1 %v1659_v18  ;;  %5158 = vpow2.f32 %v1548_v27 }
 0x7f9   :  { %4689 = vmatpush3.bf16.msra.mxu1 %v1659_v18  ;;  %5160 = vpow2.f32 %v1544_v60 }
 0x7fa   :  { %4690 = vmatprep.subr.bf16.mxu1 %v1657_v24 }
 0x7fd   :  { %4691 = vmatpush3.bf16.msra.mxu1 %v1657_v24 }
 0x7ff   :  { %v6574_v13 = vpop.eup %5154 }
 0x800   :  { %1578 = vadd.xlane.f32.xlu1 %v6574_v13 }
 0x801   :  { %v6577_v16 = vpop.eup %5156 }
 0x804   :  { %1574 = vadd.xlane.f32.xlu1 %v6577_v16 }
 0x805   :  { %v6580_v12 = vpop.eup %5158 }
 0x806   :  { %v6583_v29 = vpop.eup %5160 }
 0x808   :  { %1580 = vadd.xlane.f32.xlu1 %v6580_v12 }
 0x80c   :  { %1576 = vadd.xlane.f32.xlu1 %v6583_v29 }
 0x81d   :  { %1807 = vrot.lane.b32.xlu1 %v6035_v30, %s5458_s10 }
 0x828   :  { %v1509_v18 = vpop.xlane.xlu1 %1508  ;;  %v1507_v60 = vpop.xlane.xlu0 %1506 }
 0x829   :  { %v1532_v31 = vsub.f32 %v6516_v14, %v1507_v60  ;;  %v1533_v8 = vsub.f32 %v6519_v45, %v1509_v18 }
 0x82b   :  { %v1554_v6 = vmul.f32 1.442695, %v1532_v31  ;;  %v1556_v27 = vmul.f32 1.442695, %v1533_v8 }
 0x82c   :  { %v1505_v26 = vpop.xlane.xlu1 %1504  ;;  %v1503_v53 = vpop.xlane.xlu0 %1502 }
 0x82d   :  { %v1531_v46 = vsub.f32 %v6527_v38, %v1505_v26  ;;  %v1530_v59 = vsub.f32 %v6524_v15, %v1503_v53  ;;  %5162 = vpow2.f32 %v1554_v6 }
 0x82f   :  { %v1552_v54 = vmul.f32 1.442695, %v1531_v46  ;;  %v1550_v55 = vmul.f32 1.442695, %v1530_v59 }
 0x830   :  { %v1515_v62 = vpop.xlane.xlu0 %1514  ;;  %v1517_v14 = vpop.xlane.xlu1 %1516 }
 0x831   :  { %5164 = vpow2.f32 %v1552_v54  ;;  %v1536_v24 = vsub.f32 %v6532_v56, %v1515_v62  ;;  %v1537_v45 = vsub.f32 %v6535_v49, %v1517_v14 }
 0x832   :  { %5166 = vpow2.f32 %v1550_v55 }
 0x833   :  { %5168 = vpow2.f32 %v1556_v27  ;;  %v1562_v60 = vmul.f32 1.442695, %v1536_v24 }
 0x834   :  { %v1511_v7 = vpop.xlane.xlu0 %1510  ;;  %v1513_v53 = vpop.xlane.xlu1 %1512 }
 0x835   :  { %v1534_v31 = vsub.f32 %v6540_v36, %v1511_v7  ;;  %5170 = vpow2.f32 %v1562_v60  ;;  %v1564_v7 = vmul.f32 1.442695, %v1537_v45  ;;  %v1535_v36 = vsub.f32 %v6543_v19, %v1513_v53 }
 0x837   :  { %v1558_v18 = vmul.f32 1.442695, %v1534_v31 }
 0x838   :  { %v1523_v38 = vpop.xlane.xlu0 %1522  ;;  %v6607_v54 = vpop.permute.xlu1 %1813 }
 0x839   :  { %v1540_v15 = vsub.f32 %v6548_v39, %v1523_v38 }
 0x83a   :  { %v6595_v6 = vpop.eup %5162 }
 0x83b   :  { %v1570_v26 = vmul.f32 1.442695, %v1540_v15  ;;  %1586 = vadd.xlane.f32.xlu0 %v6595_v6 }
 0x83c   :  { %v1519_v56 = vpop.xlane.xlu0 %1518 }
 0x83d   :  { %5172 = vpow2.f32 %v1570_v26  ;;  %v1538_v46 = vsub.f32 %v6552_v3, %v1519_v56  ;;  %v1560_v3 = vmul.f32 1.442695, %v1535_v36 }
 0x83e   :  { %v6600_v59 = vpop.eup %5164  ;;  %5174 = vpow2.f32 %v1558_v18 }
 0x83f   :  { %v1566_v39 = vmul.f32 1.442695, %v1538_v46  ;;  %v6603_v8 = vpop.eup %5166  ;;  %1584 = vadd.xlane.f32.xlu0 %v6600_v59 }
 0x840   :  { %v1655_v49 = vpop.permute.xlu0 %1654  ;;  %v6611_v19 = vpop.eup %5168 }
 0x841   :  { %5176 = vpow2.f32 %v1566_v39  ;;  %1582 = vadd.xlane.f32.xlu1 %v6603_v8  ;;  %4692 = vmatprep.subr.bf16.mxu1 %v1655_v49 }
 0x842   :  { %4693 = vmatpush3.bf16.msra.mxu1 %v1655_v49  ;;  %5178 = vpow2.f32 %v1564_v7  ;;  %v6614_v55 = vpop.eup %5170 }
 0x843   :  { %4984 = vmatprep.subr.msk.bf16.mxu1 %vm914_vm9, %v6607_v54  ;;  %5180 = vpow2.f32 %v1560_v3 }
 0x845   :  { %1588 = vadd.xlane.f32.xlu1 %v6611_v19 }
 0x849   :  { %1594 = vadd.xlane.f32.xlu1 %v6614_v55 }
 0x84a   :  { %v6617_v62 = vpop.eup %5172 }
 0x84b   :  { %1602 = vadd.xlane.f32.xlu0 %v6617_v62  ;;  %v6620_v27 = vpop.eup %5174 }
 0x84d   :  { %1590 = vadd.xlane.f32.xlu1 %v6620_v27 }
 0x84e   :  { %v6623_v24 = vpop.eup %5176 }
 0x84f   :  { %1598 = vadd.xlane.f32.xlu0 %v6623_v24  ;;  %v6626_v14 = vpop.eup %5178 }
 0x850   :  { %v6629_v60 = vpop.eup %5180 }
 0x851   :  { %1596 = vadd.xlane.f32.xlu1 %v6626_v14 }
 0x855   :  { %1592 = vadd.xlane.f32.xlu1 %v6629_v60 }
 0x869   :  { %v1525_v31 = vpop.xlane.xlu1 %1524 }
 0x86a   :  { %v1541_v38 = vsub.f32 %v6566_v37, %v1525_v31 }
 0x86c   :  { %v1572_v15 = vmul.f32 1.442695, %v1541_v38 }
 0x86d   :  { %v1521_v45 = vpop.xlane.xlu1 %1520 }
 0x86e   :  { %5182 = vpow2.f32 %v1572_v15  ;;  %v1539_v18 = vsub.f32 %v6570_v17, %v1521_v45 }
 0x870   :  { %v1568_v26 = vmul.f32 1.442695, %v1539_v18 }
 0x872   :  { %5184 = vpow2.f32 %v1568_v26 }
 0x87b   :  { %v6634_v53 = vpop.eup %5182 }
 0x87c   :  { %1604 = vadd.xlane.f32.xlu0 %v6634_v53 }
 0x87f   :  { %v6637_v56 = vpop.eup %5184 }
 0x880   :  { %1600 = vadd.xlane.f32.xlu1 %v6637_v56 }
 0x889   :  { %v1579_v46 = vpop.xlane.xlu1 %1578 }
 0x88d   :  { %v1575_v7 = vpop.xlane.xlu1 %1574 }
 0x891   :  { %v1581_v36 = vpop.xlane.xlu1 %1580  ;;  %1803 = vrot.lane.b32.xlu1 %v6045_v23, %s5458_s10 }
 0x892   :  { %1801 = vrot.lane.b32.xlu0 %v6011_v20, %s5458_s10  ;;  %5186 = vrcp.f32 %v1581_v36 }
 0x893   :  { %5188 = vrcp.f32 %v1575_v7 }
 0x894   :  { %5190 = vrcp.f32 %v1579_v46  ;;  %v1861_v46 = vsel %vm914_vm9, %v6607_v54, 0 }
 0x895   :  { %v1577_v17 = vpop.xlane.xlu1 %1576  ;;  %1783 = vrot.lane.b32.xlu1 %v5976_v51, %s5459_s11 }
 0x896   :  { %5192 = vrcp.f32 %v1577_v17  ;;  %1799 = vrot.lane.b32.xlu0 %v5976_v51, %s5458_s10 }
 0x899   :  { %1787 = vrot.lane.b32.xlu1 %v6045_v23, %s5459_s11  ;;  %v1808_v54 = vpop.permute.xlu1 %1807 }
 0x89a   :  { %1785 = vrot.lane.b32.xlu0 %v6011_v20, %s5459_s11  ;;  %v1852_v36 = vsel %vm914_vm9, %v1808_v54, 0 }
 0x89d   :  { %1791 = vrot.lane.b32.xlu1 %v6035_v30, %s5459_s11 }
 0x89e   :  { %1789 = vrot.lane.b32.xlu0 %v6004_v4, %s5459_s11 }
 0x89f   :  { %v5187_v37 = vpop.eup %5186 }
 0x8a0   :  { %v5189_v39 = vpop.eup %5188  ;;  %v1625_v31 = vmul.f32 %v5187_v37, %v6580_v12  ;;  %v1812_v12 = vpop.permute.xlu0 %1811 }
 0x8a1   :  { %1795 = vrot.lane.b32.xlu1 %v5997_v47, %s5459_s11  ;;  %v5191_v49 = vpop.eup %5190  ;;  %v1622_v38 = vmul.f32 %v5189_v39, %v6577_v16 }
 0x8a2   :  { %1793 = vrot.lane.b32.xlu0 %v6024_v34, %s5459_s11  ;;  %v1624_v45 = vmul.f32 %v5191_v49, %v6574_v13  ;;  %v1858_v13 = vsel %vm914_vm9, %v1812_v12, 0 }
 0x8a3   :  { %v5193_v3 = vpop.eup %5192 }
 0x8a4   :  { %v1623_v15 = vmul.f32 %v5193_v3, %v6583_v29  ;;  %v1639_v26 = vpack.c.bf16 %v1625_v31, %v1624_v45  ;;  %v1810_v16 = vpop.permute.xlu0 %1809 }
 0x8a5   :  { %2124 = vrot.lane.b32.xlu1 %v6026_v58, %s5459_s11  ;;  %v1855_v29 = vsel %vm914_vm9, %v1810_v16, 0 }
 0x8a6   :  { %1797 = vrot.lane.b32.xlu0 %v6014_v42, %s5459_s11  ;;  %v1638_v18 = vpack.c.bf16 %v1623_v15, %v1622_v38 }
 0x8a8   :  { %4694 = vmatprep.mubr.bf16.mxu1 %v1638_v18  ;;  %v1806_v7 = vpop.permute.xlu0 %1805 }
 0x8a9   :  { %4695 = vmatmul.mubr.bf16.vlgmr.msra.gmra.mxu1 %v1639_v26  ;;  %v1849_v39 = vsel %vm914_vm9, %v1806_v7, 0 }
 0x8aa   :  { %4711 = vmatpush3.bf16.xpose.msra.mxu1 %v1861_v46  ;;  %2126 = vrot.lane.b32.xlu0 %v6017_v50, %s5459_s11 }
 0x8ab   :  { %4985 = vmatprep.subr.msk.bf16.mxu1 %vm914_vm9, %v1812_v12 }
 0x8ae   :  { %2122 = vrot.lane.b32.xlu0 %v6037_v61, %s5459_s11 }
 0x8b2   :  { %4713 = vmatpush3.bf16.xpose.msra.mxu1 %v1858_v13  ;;  %2120 = vrot.lane.b32.xlu0 %v6048_v33, %s5459_s11 }
 0x8b3   :  { %4986 = vmatprep.subr.msk.bf16.mxu1 %vm914_vm9, %v1810_v16 }
 0x8b6   :  { %2118 = vrot.lane.b32.xlu0 %v6056_v43, %s5459_s11 }
 0x8ba   :  { %4715 = vmatpush3.bf16.xpose.msra.mxu1 %v1855_v29 }
 0x8bb   :  { %4987 = vmatprep.subr.msk.bf16.mxu1 %vm914_vm9, %v1808_v54 }
 0x8c2   :  { %4717 = vmatpush3.bf16.xpose.msra.mxu1 %v1852_v36 }
 0x8c3   :  { %4988 = vmatprep.subr.msk.bf16.mxu1 %vm914_vm9, %v1806_v7 }
 0x8c4   :  { %v1587_v17 = vpop.xlane.xlu0 %1586 }
 0x8c8   :  { %v1585_v37 = vpop.xlane.xlu0 %1584 }
 0x8c9   :  { %5194 = vrcp.f32 %v1585_v37 }
 0x8ca   :  { %4719 = vmatpush3.bf16.xpose.msra.mxu1 %v1849_v39  ;;  %v1583_v49 = vpop.xlane.xlu1 %1582 }
 0x8cb   :  { %5196 = vrcp.f32 %v1583_v49 }
 0x8cc   :  { %5198 = vrcp.f32 %v1587_v17 }
 0x8ce   :  { %v1589_v3 = vpop.xlane.xlu1 %1588 }
 0x8cf   :  { %5200 = vrcp.f32 %v1589_v3 }
 0x8d2   :  { %v1595_v31 = vpop.xlane.xlu1 %1594 }
 0x8d6   :  { %v1591_v38 = vpop.xlane.xlu1 %1590  ;;  %v5195_v15 = vpop.eup %5194 }
 0x8d7   :  { %v1627_v26 = vmul.f32 %v5195_v15, %v6600_v59 }
 0x8d8   :  { %v5197_v45 = vpop.eup %5196 }
 0x8d9   :  { %v1626_v18 = vmul.f32 %v5197_v45, %v6603_v8  ;;  %v5199_v46 = vpop.eup %5198 }
 0x8da   :  { %v1597_v12 = vpop.xlane.xlu1 %1596  ;;  %v1628_v29 = vmul.f32 %v5199_v46, %v6595_v6 }
 0x8db   :  { %v1640_v13 = vpack.c.bf16 %v1627_v26, %v1626_v18  ;;  %5202 = vrcp.f32 %v1597_v12 }
 0x8dc   :  { %v5201_v16 = vpop.eup %5200  ;;  %5204 = vrcp.f32 %v1591_v38 }
 0x8dd   :  { %4698 = vmatprep.mubr.bf16.mxu1 %v1640_v13  ;;  %v1629_v54 = vmul.f32 %v5201_v16, %v6611_v19  ;;  %5206 = vrcp.f32 %v1595_v31  ;;  %v1603_v19 = vpop.xlane.xlu0 %1602 }
 0x8de   :  { %v1593_v7 = vpop.xlane.xlu1 %1592 }
 0x8df   :  { %5208 = vrcp.f32 %v1593_v7  ;;  %v1641_v36 = vpack.c.bf16 %v1629_v54, %v1628_v29 }
 0x8e1   :  { %4699 = vmatmul.mubr.bf16.gmra.mxu1 %v1641_v36  ;;  %v1599_v31 = vpop.xlane.xlu0 %1598 }
 0x8e8   :  { %v5203_v17 = vpop.eup %5202 }
 0x8e9   :  { %v5205_v8 = vpop.eup %5204  ;;  %v1633_v39 = vmul.f32 %v5203_v17, %v6626_v14 }
 0x8ea   :  { %v5207_v37 = vpop.eup %5206  ;;  %v1630_v49 = vmul.f32 %v5205_v8, %v6620_v27 }
 0x8eb   :  { %v1632_v38 = vmul.f32 %v5207_v37, %v6614_v55 }
 0x8ec   :  { %v5209_v59 = vpop.eup %5208 }
 0x8ed   :  { %v1631_v3 = vmul.f32 %v5209_v59, %v6629_v60  ;;  %v1643_v15 = vpack.c.bf16 %v1633_v39, %v1632_v38 }
 0x8ef   :  { %v1642_v6 = vpack.c.bf16 %v1631_v3, %v1630_v49 }
 0x8f1   :  { %4702 = vmatprep.mubr.bf16.mxu1 %v1642_v6 }
 0x8f2   :  { %4703 = vmatmul.mubr.bf16.gmra.mxu1 %v1643_v15 }
 0x905   :  { %v1605_v45 = vpop.xlane.xlu0 %1604 }
 0x906   :  { %5210 = vrcp.f32 %v1605_v45 }
 0x907   :  { %5212 = vrcp.f32 %v1599_v31 }
 0x908   :  { %5214 = vrcp.f32 %v1603_v19 }
 0x909   :  { %v1601_v18 = vpop.xlane.xlu1 %1600  ;;  %v1802_v26 = vpop.permute.xlu0 %1801 }
 0x90a   :  { %5216 = vrcp.f32 %v1601_v18  ;;  %v1843_v7 = vsel %vm914_vm9, %v1802_v26, 0 }
 0x90d   :  { %v1804_v14 = vpop.permute.xlu1 %1803  ;;  %v1800_v46 = vpop.permute.xlu0 %1799 }
 0x90e   :  { %4989 = vmatprep.subr.msk.bf16.mxu1 %vm914_vm9, %v1804_v14  ;;  %v1846_v27 = vsel %vm914_vm9, %v1804_v14, 0 }
 0x90f   :  { %4721 = vmatpush3.bf16.xpose.msra.mxu1 %v1846_v27 }
 0x910   :  { %4990 = vmatprep.subr.msk.bf16.mxu1 %vm914_vm9, %v1802_v26 }
 0x911   :  { %v1784_v55 = vpop.permute.xlu1 %1783  ;;  %v1786_v60 = vpop.permute.xlu0 %1785 }
 0x913   :  { %v5211_v12 = vpop.eup %5210 }
 0x914   :  { %v5213_v13 = vpop.eup %5212  ;;  %v1637_v17 = vmul.f32 %v5211_v12, %v6634_v53  ;;  %v1840_v53 = vsel %vm914_vm9, %v1800_v46, 0 }
 0x915   :  { %v1788_v16 = vpop.permute.xlu1 %1787  ;;  %v1790_v29 = vpop.permute.xlu0 %1789  ;;  %v1634_v8 = vmul.f32 %v5213_v13, %v6623_v24 }
 0x916   :  { %v5215_v54 = vpop.eup %5214 }
 0x917   :  { %v5217_v36 = vpop.eup %5216  ;;  %4723 = vmatpush3.bf16.xpose.msra.mxu1 %v1843_v7  ;;  %v1636_v49 = vmul.f32 %v5215_v54, %v6617_v62 }
 0x918   :  { %4991 = vmatprep.subr.msk.bf16.mxu1 %vm914_vm9, %v1800_v46  ;;  %v1635_v37 = vmul.f32 %v5217_v36, %v6637_v56 }
 0x919   :  { %v1792_v59 = vpop.permute.xlu1 %1791  ;;  %v1794_v39 = vpop.permute.xlu0 %1793  ;;  %v1645_v38 = vpack.c.bf16 %v1637_v17, %v1636_v49 }
 0x91a   :  { %v1644_v3 = vpack.c.bf16 %v1635_v37, %v1634_v8 }
 0x91c   :  { %4706 = vmatprep.mubr.bf16.mxu1 %v1644_v3 }
 0x91d   :  { %v1796_v6 = vpop.permute.xlu1 %1795  ;;  %4707 = vmatmul.mubr.bf16.gmra.mxu1 %v1645_v38  ;;  %v1798_v15 = vpop.permute.xlu0 %1797 }
 0x91e   :  { %4726 = vmatprep.mubr.msk.bf16.mxu1 %vm914_vm9, %v1784_v55 }
 0x91f   :  { %4725 = vmatpush3.bf16.xpose.msra.mxu1 %v1840_v53 }
 0x921   :  { %v2127_v19 = vpop.permute.xlu0 %2126  ;;  %v2125_v24 = vpop.permute.xlu1 %2124 }
 0x922   :  { %4742 = vmatprep.subr.bf16.mxu0 %v2127_v19 }
 0x923   :  { %4743 = vmatpush3.bf16.msra.mxu0 %v2127_v19 }
 0x924   :  { %4744 = vmatprep.subr.bf16.mxu0 %v2125_v24 }
 0x925   :  { %v2123_v56 = vpop.permute.xlu0 %2122 }
 0x926   :  { %4727 = vmatmul.mubr.msk.bf16.vlgmr.msra.gmra.mxu1 %vm914_vm9, %v1786_v60 }
 0x927   :  { %4730 = vmatprep.mubr.msk.bf16.mxu1 %vm914_vm9, %v1788_v16  ;;  %4745 = vmatpush3.bf16.msra.mxu0 %v2125_v24 }
 0x928   :  { %4746 = vmatprep.subr.bf16.mxu0 %v2123_v56 }
 0x929   :  { %v2121_v62 = vpop.permute.xlu0 %2120 }
 0x92b   :  { %4747 = vmatpush3.bf16.msra.mxu0 %v2123_v56 }
 0x92c   :  { %4748 = vmatprep.subr.bf16.mxu0 %v2121_v62 }
 0x92d   :  { %v2119_v31 = vpop.permute.xlu0 %2118 }
 0x92e   :  { %4731 = vmatmul.mubr.msk.bf16.gmra.mxu1 %vm914_vm9, %v1790_v29 }
 0x92f   :  { %4734 = vmatprep.mubr.msk.bf16.mxu1 %vm914_vm9, %v1792_v59  ;;  %4749 = vmatpush3.bf16.msra.mxu0 %v2121_v62 }
 0x930   :  { %4750 = vmatprep.subr.bf16.mxu0 %v2119_v31 }
 0x933   :  { %4751 = vmatpush3.bf16.msra.mxu0 %v2119_v31 }
 0x936   :  { %4735 = vmatmul.mubr.msk.bf16.gmra.mxu1 %vm914_vm9, %v1794_v39 }
 0x937   :  { %4738 = vmatprep.mubr.msk.bf16.mxu1 %vm914_vm9, %v1796_v6 }
 0x93e   :  { %4739 = vmatmul.mubr.msk.bf16.gmra.mxu1 %vm914_vm9, %v1798_v15 }
 0x969   :  { %v6712_v45 = vpop.f32.mrf.mxu1 }
 0x96a   :  { %8172 = vst [vmem:[#allocation20_spill] sm:$0xff] %v6712_v45 }
 0x96b   :  { %v6714_v18 = vpop.f32.mrf.mxu1 }
 0x96c   :  { %8173 = vst [vmem:[#allocation21_spill] sm:$0xff] %v6714_v18 }
 0x96d   :  { %v6716_v26 = vpop.f32.mrf.mxu1 }
 0x96e   :  { %8174 = vst [vmem:[#allocation38_spill] sm:$0xff] %v6716_v26 }
 0x96f   :  { %v6720_v46 = vpop.f32.mrf.mxu1 }
 0x970   :  { %8175 = vst [vmem:[#allocation39_spill] sm:$0xff] %v6720_v46 }
 0x9a1   :  { %v6724_v55 = vpop.f32.mrf.mxu1 }
 0x9a2   :  { %8176 = vst [vmem:[#allocation40_spill] sm:$0xff] %v6724_v55 }
 0x9a3   :  { %v6726_v60 = vpop.f32.mrf.mxu1 }
 0x9a4   :  { %8177 = vst [vmem:[#allocation41_spill] sm:$0xff] %v6726_v60 }
 0x9a5   :  { %v6728_v12 = vpop.f32.mrf.mxu1 }
 0x9a6   :  { %8178 = vst [vmem:[#allocation42_spill] sm:$0xff] %v6728_v12 }
 0x9a7   :  { %v6732_v16 = vpop.f32.mrf.mxu1 }
 0x9b2   :  { %v6736_v54 = vpop.f32.mrf.mxu1 }
 0x9b3   :  { %8179 = vst [vmem:[#allocation43_spill] sm:$0xff] %v6736_v54 }
 0x9b4   :  { %v6738_v7 = vpop.f32.mrf.mxu1 }
 0x9b5   :  { %8180 = vst [vmem:[#allocation44_spill] sm:$0xff] %v6738_v7 }
 0x9b6   :  { %v6740_v36 = vpop.f32.mrf.mxu1 }
 0x9b7   :  { %8181 = vst [vmem:[#allocation45_spill] sm:$0xff] %v6740_v36 }
 0x9b8   :  { %v6744_v8 = vpop.f32.mrf.mxu1 }
 0x9b9   :  { %8182 = vst [vmem:[#allocation46_spill] sm:$0xff] %v6744_v8 }
 0x9dd   :  { %v6748_v59 = vpop.f32.mrf.mxu1 }
 0x9de   :  { %8183 = vst [vmem:[#allocation47_spill] sm:$0xff] %v6748_v59 }
 0x9df   :  { %v6750_v39 = vpop.f32.mrf.mxu1 }
 0x9e0   :  { %8184 = vst [vmem:[#allocation48_spill] sm:$0xff] %v6750_v39 }
 0x9e1   :  { %v6752_v49 = vpop.f32.mrf.mxu1 }
 0x9e2   :  { %8185 = vst [vmem:[#allocation49_spill] sm:$0xff] %v6752_v49 }
 0x9e3   :  { %v6756_v38 = vpop.f32.mrf.mxu1 }
 0x9e4   :  { %8186 = vst [vmem:[#allocation50_spill] sm:$0xff] %v6756_v38 }
 0x9e6   :  { %v4728_v15 = vpop.f32.mrf.mxu1 }
 0x9e7   :  { %v1906_v53 = vadd.f32 %v4728_v15, %v6158_v1 }
 0x9e8   :  { %v1897_v19 = vpop.f32.mrf.mxu1 }
 0x9e9   :  { %v1898_v24 = vadd.f32 %v1897_v19, %v6166_v52  ;;  %1964 = vmax.xlane.f32.xlu0 %v1906_v53 }
 0x9ea   :  { %v4729_v56 = vpop.f32.mrf.mxu1 }
 0x9eb   :  { %1960 = vmax.xlane.f32.xlu1 %v1898_v24  ;;  %v1909_v31 = vadd.f32 %v4729_v56, %v6186_v48 }
 0x9ec   :  { %v1900_v62 = vpop.f32.mrf.mxu1 }
 0x9ed   :  { %v6764_v17 = vadd.f32 %v1900_v62, %v6182_v10 }
 0x9ee   :  { %v4732_v15 = vpop.f32.mrf.mxu1 }
 0x9ef   :  { %1962 = vmax.xlane.f32.xlu0 %v6764_v17  ;;  %1966 = vmax.xlane.f32.xlu1 %v1909_v31  ;;  %v6772_v14 = vadd.f32 %v4732_v15, %v6206_v11 }
 0x9f0   :  { %v1913_v19 = vpop.f32.mrf.mxu1 }
 0x9f1   :  { %v6780_v27 = vadd.f32 %v1913_v19, %v6223_v32 }
 0x9f2   :  { %v4733_v6 = vpop.f32.mrf.mxu1 }
 0x9f3   :  { %v6775_v56 = vadd.f32 %v4733_v6, %v6276_v57 }
 0x9f4   :  { %v1916_v3 = vpop.f32.mrf.mxu1 }
 0x9f5   :  { %v6783_v37 = vadd.f32 %v1916_v3, %v6281_v44 }
 0x9f6   :  { %v4736_v13 = vpop.f32.mrf.mxu1 }
 0x9f7   :  { %v6788_v15 = vadd.f32 %v4736_v13, %v6238_v35 }
 0x9f8   :  { %v1929_v62 = vpop.f32.mrf.mxu1 }
 0x9f9   :  { %v6796_v19 = vadd.f32 %v1929_v62, %v6250_v5 }
 0x9fa   :  { %v4737_v29 = vpop.f32.mrf.mxu1 }
 0x9fb   :  { %v6791_v6 = vadd.f32 %v4737_v29, %v6287_v9 }
 0x9fc   :  { %v1932_v40 = vpop.f32.mrf.mxu1 }
 0x9fd   :  { %v6799_v3 = vadd.f32 %v1932_v40, %v6293_v41 }
 0x9fe   :  { %v4740_v39 = vpop.f32.mrf.mxu1 }
 0x9ff   :  { %v6804_v13 = vadd.f32 %v4740_v39, %v6258_v2 }
 0xa00   :  { %2114 = vrot.lane.b32.xlu1 %v6072_v63, %s5459_s11  ;;  %v1945_v29 = vpop.f32.mrf.mxu1 }
 0xa01   :  { %v6808_v38 = vadd.f32 %v1945_v29, %v6264_v0 }
 0xa02   :  { %v4741_v40 = vpop.f32.mrf.mxu1 }
 0xa03   :  { %v6822_v39 = vadd.f32 %v4741_v40, %v8170_v25 }
 0xa04   :  { %v1948_v62 = vpop.f32.mrf.mxu1 }
 0xa05   :  { %2116 = vrot.lane.b32.xlu0 %v6064_v22, %s5459_s11  ;;  %v6826_v29 = vadd.f32 %v1948_v62, %v8171_v28 }
 0xa24   :  { %1972 = vmax.xlane.f32.xlu0 %v6772_v14  ;;  %1974 = vmax.xlane.f32.xlu1 %v6775_v56 }
 0xa28   :  { %1970 = vmax.xlane.f32.xlu1 %v6783_v37  ;;  %1968 = vmax.xlane.f32.xlu0 %v6780_v27 }
 0xa2c   :  { %1980 = vmax.xlane.f32.xlu0 %v6788_v15  ;;  %1982 = vmax.xlane.f32.xlu1 %v6791_v6 }
 0xa30   :  { %1978 = vmax.xlane.f32.xlu1 %v6799_v3  ;;  %1976 = vmax.xlane.f32.xlu0 %v6796_v19 }
 0xa34   :  { %1988 = vmax.xlane.f32.xlu0 %v6804_v13 }
 0xa38   :  { %1984 = vmax.xlane.f32.xlu0 %v6808_v38 }
 0xa41   :  { %2271 = vrot.lane.b32.xlu1 %v6014_v42, %s5460_s12 }
 0xa4e   :  { %2112 = vrot.lane.b32.xlu0 %v6077_v21, %s5459_s11 }
 0xa52   :  { %2269 = vrot.lane.b32.xlu0 %v5997_v47, %s5460_s12 }
 0xa56   :  { %2267 = vrot.lane.b32.xlu0 %v6024_v34, %s5460_s12 }
 0xa5a   :  { %2263 = vrot.lane.b32.xlu0 %v6004_v4, %s5460_s12 }
 0xa65   :  { %1990 = vmax.xlane.f32.xlu1 %v6822_v39 }
 0xa69   :  { %1986 = vmax.xlane.f32.xlu1 %v6826_v29 }
 0xa72   :  { %v1965_v59 = vpop.xlane.xlu0 %1964 }
 0xa73   :  { %v1994_v49 = vsub.f32 %v1906_v53, %v1965_v59 }
 0xa74   :  { %v1961_v54 = vpop.xlane.xlu1 %1960 }
 0xa75   :  { %v2012_v36 = vmul.f32 1.442695, %v1994_v49  ;;  %v1992_v55 = vsub.f32 %v1898_v24, %v1961_v54 }
 0xa77   :  { %5218 = vpow2.f32 %v2012_v36  ;;  %v2008_v12 = vmul.f32 1.442695, %v1992_v55 }
 0xa78   :  { %v1967_v45 = vpop.xlane.xlu1 %1966  ;;  %v1963_v26 = vpop.xlane.xlu0 %1962 }
 0xa79   :  { %v1995_v18 = vsub.f32 %v1909_v31, %v1967_v45  ;;  %5220 = vpow2.f32 %v2008_v12  ;;  %v1993_v46 = vsub.f32 %v6764_v17, %v1963_v26 }
 0xa7b   :  { %v2014_v40 = vmul.f32 1.442695, %v1995_v18  ;;  %v2010_v8 = vmul.f32 1.442695, %v1993_v46 }
 0xa7c   :  { %v2117_v7 = vpop.permute.xlu0 %2116  ;;  %v2115_v62 = vpop.permute.xlu1 %2114 }
 0xa7d   :  { %4752 = vmatprep.subr.bf16.mxu0 %v2117_v7  ;;  %5222 = vpow2.f32 %v2014_v40 }
 0xa7e   :  { %4753 = vmatpush3.bf16.msra.mxu0 %v2117_v7  ;;  %5224 = vpow2.f32 %v2010_v8 }
 0xa7f   :  { %4754 = vmatprep.subr.bf16.mxu0 %v2115_v62 }
 0xa82   :  { %4755 = vmatpush3.bf16.msra.mxu0 %v2115_v62 }
 0xa84   :  { %v6830_v59 = vpop.eup %5218 }
 0xa85   :  { %2044 = vadd.xlane.f32.xlu1 %v6830_v59 }
 0xa86   :  { %v6833_v55 = vpop.eup %5220 }
 0xa89   :  { %2040 = vadd.xlane.f32.xlu1 %v6833_v55 }
 0xa8a   :  { %v6836_v45 = vpop.eup %5222 }
 0xa8b   :  { %v6839_v18 = vpop.eup %5224 }
 0xa8d   :  { %2046 = vadd.xlane.f32.xlu1 %v6836_v45 }
 0xa91   :  { %2042 = vadd.xlane.f32.xlu1 %v6839_v18 }
 0xaa2   :  { %2265 = vrot.lane.b32.xlu1 %v6035_v30, %s5460_s12 }
 0xaad   :  { %v1975_v26 = vpop.xlane.xlu1 %1974  ;;  %v1973_v46 = vpop.xlane.xlu0 %1972 }
 0xaae   :  { %v1998_v12 = vsub.f32 %v6772_v14, %v1973_v46  ;;  %v1999_v49 = vsub.f32 %v6775_v56, %v1975_v26 }
 0xab0   :  { %v2020_v54 = vmul.f32 1.442695, %v1998_v12  ;;  %v2022_v40 = vmul.f32 1.442695, %v1999_v49 }
 0xab1   :  { %v1971_v7 = vpop.xlane.xlu1 %1970  ;;  %v1969_v36 = vpop.xlane.xlu0 %1968 }
 0xab2   :  { %v1997_v17 = vsub.f32 %v6783_v37, %v1971_v7  ;;  %v1996_v8 = vsub.f32 %v6780_v27, %v1969_v36  ;;  %5226 = vpow2.f32 %v2020_v54 }
 0xab4   :  { %v2018_v53 = vmul.f32 1.442695, %v1997_v17  ;;  %v2016_v24 = vmul.f32 1.442695, %v1996_v8 }
 0xab5   :  { %v1981_v31 = vpop.xlane.xlu0 %1980  ;;  %v1983_v14 = vpop.xlane.xlu1 %1982 }
 0xab6   :  { %5228 = vpow2.f32 %v2018_v53  ;;  %v2002_v62 = vsub.f32 %v6788_v15, %v1981_v31  ;;  %v2003_v56 = vsub.f32 %v6791_v6, %v1983_v14 }
 0xab7   :  { %5230 = vpow2.f32 %v2016_v24 }
 0xab8   :  { %5232 = vpow2.f32 %v2022_v40  ;;  %v2028_v46 = vmul.f32 1.442695, %v2002_v62 }
 0xab9   :  { %v1977_v60 = vpop.xlane.xlu0 %1976  ;;  %v1979_v36 = vpop.xlane.xlu1 %1978 }
 0xaba   :  { %v2000_v12 = vsub.f32 %v6796_v19, %v1977_v60  ;;  %5234 = vpow2.f32 %v2028_v46  ;;  %v2030_v60 = vmul.f32 1.442695, %v2003_v56  ;;  %v2001_v19 = vsub.f32 %v6799_v3, %v1979_v36 }
 0xabc   :  { %v2024_v26 = vmul.f32 1.442695, %v2000_v12 }
 0xabd   :  { %v1989_v37 = vpop.xlane.xlu0 %1988  ;;  %v6863_v53 = vpop.permute.xlu1 %2271 }
 0xabe   :  { %v2006_v27 = vsub.f32 %v6804_v13, %v1989_v37 }
 0xabf   :  { %v6851_v54 = vpop.eup %5226 }
 0xac0   :  { %v2036_v7 = vmul.f32 1.442695, %v2006_v27  ;;  %2052 = vadd.xlane.f32.xlu0 %v6851_v54 }
 0xac1   :  { %v1985_v15 = vpop.xlane.xlu0 %1984 }
 0xac2   :  { %5236 = vpow2.f32 %v2036_v7  ;;  %v2004_v17 = vsub.f32 %v6808_v38, %v1985_v15  ;;  %v2026_v38 = vmul.f32 1.442695, %v2001_v19 }
 0xac3   :  { %v6856_v8 = vpop.eup %5228  ;;  %5238 = vpow2.f32 %v2024_v26 }
 0xac4   :  { %v2032_v13 = vmul.f32 1.442695, %v2004_v17  ;;  %v6859_v49 = vpop.eup %5230  ;;  %2050 = vadd.xlane.f32.xlu0 %v6856_v8 }
 0xac5   :  { %v2113_v6 = vpop.permute.xlu0 %2112  ;;  %v6867_v3 = vpop.eup %5232 }
 0xac6   :  { %5240 = vpow2.f32 %v2032_v13  ;;  %2048 = vadd.xlane.f32.xlu1 %v6859_v49  ;;  %4756 = vmatprep.subr.bf16.mxu0 %v2113_v6 }
 0xac7   :  { %4757 = vmatpush3.bf16.msra.mxu0 %v2113_v6  ;;  %5242 = vpow2.f32 %v2030_v60  ;;  %v6870_v24 = vpop.eup %5234 }
 0xac8   :  { %4992 = vmatprep.subr.msk.bf16.mxu0 %vm914_vm9, %v6863_v53  ;;  %5244 = vpow2.f32 %v2026_v38 }
 0xaca   :  { %2054 = vadd.xlane.f32.xlu1 %v6867_v3 }
 0xace   :  { %2060 = vadd.xlane.f32.xlu1 %v6870_v24 }
 0xacf   :  { %v6873_v31 = vpop.eup %5236 }
 0xad0   :  { %2068 = vadd.xlane.f32.xlu0 %v6873_v31  ;;  %v6876_v40 = vpop.eup %5238 }
 0xad2   :  { %2056 = vadd.xlane.f32.xlu1 %v6876_v40 }
 0xad3   :  { %v6879_v62 = vpop.eup %5240 }
 0xad4   :  { %2064 = vadd.xlane.f32.xlu0 %v6879_v62  ;;  %v6882_v14 = vpop.eup %5242 }
 0xad5   :  { %v6885_v46 = vpop.eup %5244 }
 0xad6   :  { %2062 = vadd.xlane.f32.xlu1 %v6882_v14 }
 0xada   :  { %2058 = vadd.xlane.f32.xlu1 %v6885_v46 }
 0xaee   :  { %v1991_v12 = vpop.xlane.xlu1 %1990 }
 0xaef   :  { %v2007_v37 = vsub.f32 %v6822_v39, %v1991_v12 }
 0xaf1   :  { %v2038_v27 = vmul.f32 1.442695, %v2007_v37 }
 0xaf2   :  { %v1987_v56 = vpop.xlane.xlu1 %1986 }
 0xaf3   :  { %5246 = vpow2.f32 %v2038_v27  ;;  %v2005_v26 = vsub.f32 %v6826_v29, %v1987_v56 }
 0xaf5   :  { %v2034_v7 = vmul.f32 1.442695, %v2005_v26 }
 0xaf7   :  { %5248 = vpow2.f32 %v2034_v7 }
 0xb00   :  { %v6890_v36 = vpop.eup %5246 }
 0xb01   :  { %2070 = vadd.xlane.f32.xlu0 %v6890_v36 }
 0xb04   :  { %v6893_v15 = vpop.eup %5248 }
 0xb05   :  { %2066 = vadd.xlane.f32.xlu1 %v6893_v15 }
 0xb0e   :  { %v2045_v17 = vpop.xlane.xlu1 %2044 }
 0xb12   :  { %v2041_v60 = vpop.xlane.xlu1 %2040 }
 0xb16   :  { %v2047_v19 = vpop.xlane.xlu1 %2046  ;;  %2261 = vrot.lane.b32.xlu1 %v6045_v23, %s5460_s12 }
 0xb17   :  { %2259 = vrot.lane.b32.xlu0 %v6011_v20, %s5460_s12  ;;  %5250 = vrcp.f32 %v2047_v19 }
 0xb18   :  { %5252 = vrcp.f32 %v2041_v60 }
 0xb19   :  { %5254 = vrcp.f32 %v2045_v17 }
 0xb1a   :  { %v2043_v39 = vpop.xlane.xlu1 %2042  ;;  %2241 = vrot.lane.b32.xlu1 %v5976_v51, %s5461_s13 }
 0xb1b   :  { %5256 = vrcp.f32 %v2043_v39  ;;  %2257 = vrot.lane.b32.xlu0 %v5976_v51, %s5460_s12 }
 0xb1e   :  { %2245 = vrot.lane.b32.xlu1 %v6045_v23, %s5461_s13 }
 0xb1f   :  { %2243 = vrot.lane.b32.xlu0 %v6011_v20, %s5461_s13 }
 0xb22   :  { %2249 = vrot.lane.b32.xlu1 %v6035_v30, %s5461_s13 }
 0xb23   :  { %2247 = vrot.lane.b32.xlu0 %v6004_v4, %s5461_s13 }
 0xb24   :  { %v5251_v29 = vpop.eup %5250 }
 0xb25   :  { %v5253_v13 = vpop.eup %5252  ;;  %v2091_v23 = vmul.f32 %v5251_v29, %v6836_v45  ;;  %v2270_v45 = vpop.permute.xlu0 %2269 }
 0xb26   :  { %2253 = vrot.lane.b32.xlu1 %v5997_v47, %s5461_s13  ;;  %v5255_v6 = vpop.eup %5254  ;;  %v2088_v20 = vmul.f32 %v5253_v13, %v6833_v55  ;;  %v2266_v55 = vpop.permute.xlu1 %2265 }
 0xb27   :  { %2251 = vrot.lane.b32.xlu0 %v6024_v34, %s5461_s13  ;;  %v2090_v4 = vmul.f32 %v5255_v6, %v6830_v59  ;;  %v2319_v34 = vsel %vm914_vm9, %v6863_v53, 0  ;;  %v2310_v53 = vsel %vm914_vm9, %v2266_v55, 0 }
 0xb28   :  { %v5257_v51 = vpop.eup %5256 }
 0xb29   :  { %v2089_v38 = vmul.f32 %v5257_v51, %v6839_v18  ;;  %v2105_v30 = vpack.c.bf16 %v2091_v23, %v2090_v4  ;;  %v2268_v59 = vpop.permute.xlu0 %2267 }
 0xb2a   :  { %2582 = vrot.lane.b32.xlu1 %v6026_v58, %s5461_s13  ;;  %v2316_v58 = vsel %vm914_vm9, %v2270_v45, 0 }
 0xb2b   :  { %2255 = vrot.lane.b32.xlu0 %v6014_v42, %s5461_s13  ;;  %v2104_v47 = vpack.c.bf16 %v2089_v38, %v2088_v20  ;;  %v2313_v42 = vsel %vm914_vm9, %v2268_v59, 0 }
 0xb2d   :  { %4758 = vmatprep.mubr.bf16.mxu0 %v2104_v47  ;;  %v2264_v18 = vpop.permute.xlu0 %2263 }
 0xb2e   :  { %4759 = vmatmul.mubr.bf16.vlgmr.msra.gmra.mxu0 %v2105_v30  ;;  %v2307_v37 = vsel %vm914_vm9, %v2264_v18, 0 }
 0xb2f   :  { %4775 = vmatpush3.bf16.xpose.msra.mxu0 %v2319_v34  ;;  %2584 = vrot.lane.b32.xlu0 %v6017_v50, %s5461_s13 }
 0xb30   :  { %4993 = vmatprep.subr.msk.bf16.mxu0 %vm914_vm9, %v2270_v45 }
 0xb37   :  { %4777 = vmatpush3.bf16.xpose.msra.mxu0 %v2316_v58 }
 0xb38   :  { %4994 = vmatprep.subr.msk.bf16.mxu0 %vm914_vm9, %v2268_v59 }
 0xb3f   :  { %4779 = vmatpush3.bf16.xpose.msra.mxu0 %v2313_v42 }
 0xb40   :  { %4995 = vmatprep.subr.msk.bf16.mxu0 %vm914_vm9, %v2266_v55 }
 0xb47   :  { %4781 = vmatpush3.bf16.xpose.msra.mxu0 %v2310_v53 }
 0xb48   :  { %4996 = vmatprep.subr.msk.bf16.mxu0 %vm914_vm9, %v2264_v18 }
 0xb49   :  { %v2053_v50 = vpop.xlane.xlu0 %2052 }
 0xb4d   :  { %v2051_v12 = vpop.xlane.xlu0 %2050 }
 0xb4e   :  { %5258 = vrcp.f32 %v2051_v12 }
 0xb4f   :  { %4783 = vmatpush3.bf16.xpose.msra.mxu0 %v2307_v37  ;;  %v2049_v27 = vpop.xlane.xlu1 %2048 }
 0xb50   :  { %5260 = vrcp.f32 %v2049_v27 }
 0xb51   :  { %5262 = vrcp.f32 %v2053_v50 }
 0xb53   :  { %v2055_v56 = vpop.xlane.xlu1 %2054 }
 0xb54   :  { %5264 = vrcp.f32 %v2055_v56 }
 0xb57   :  { %v2061_v26 = vpop.xlane.xlu1 %2060 }
 0xb5b   :  { %v2057_v7 = vpop.xlane.xlu1 %2056  ;;  %v5259_v17 = vpop.eup %5258 }
 0xb5c   :  { %v2093_v39 = vmul.f32 %v5259_v17, %v6856_v8 }
 0xb5d   :  { %v5261_v60 = vpop.eup %5260 }
 0xb5e   :  { %v2092_v19 = vmul.f32 %v5261_v60, %v6859_v49  ;;  %v5263_v29 = vpop.eup %5262 }
 0xb5f   :  { %v2063_v13 = vpop.xlane.xlu1 %2062  ;;  %v2094_v23 = vmul.f32 %v5263_v29, %v6851_v54 }
 0xb60   :  { %v2106_v6 = vpack.c.bf16 %v2093_v39, %v2092_v19  ;;  %5266 = vrcp.f32 %v2063_v13 }
 0xb61   :  { %v5265_v51 = vpop.eup %5264  ;;  %5268 = vrcp.f32 %v2057_v7 }
 0xb62   :  { %4762 = vmatprep.mubr.bf16.mxu0 %v2106_v6  ;;  %v2095_v20 = vmul.f32 %v5265_v51, %v6867_v3  ;;  %5270 = vrcp.f32 %v2061_v26  ;;  %v2069_v3 = vpop.xlane.xlu0 %2068 }
 0xb63   :  { %v2059_v38 = vpop.xlane.xlu1 %2058 }
 0xb64   :  { %5272 = vrcp.f32 %v2059_v38  ;;  %v2107_v4 = vpack.c.bf16 %v2095_v20, %v2094_v23 }
 0xb66   :  { %4763 = vmatmul.mubr.bf16.gmra.mxu0 %v2107_v4  ;;  %v2065_v55 = vpop.xlane.xlu0 %2064 }
 0xb6d   :  { %v5267_v47 = vpop.eup %5266 }
 0xb6e   :  { %v5269_v49 = vpop.eup %5268  ;;  %v2099_v34 = vmul.f32 %v5267_v47, %v6882_v14 }
 0xb6f   :  { %v5271_v30 = vpop.eup %5270  ;;  %v2096_v45 = vmul.f32 %v5269_v49, %v6876_v40 }
 0xb70   :  { %v2098_v59 = vmul.f32 %v5271_v30, %v6870_v24 }
 0xb71   :  { %v5273_v8 = vpop.eup %5272 }
 0xb72   :  { %v2097_v58 = vmul.f32 %v5273_v8, %v6885_v46  ;;  %v2109_v42 = vpack.c.bf16 %v2099_v34, %v2098_v59 }
 0xb74   :  { %v2108_v54 = vpack.c.bf16 %v2097_v58, %v2096_v45 }
 0xb76   :  { %4766 = vmatprep.mubr.bf16.mxu0 %v2108_v54 }
 0xb77   :  { %4767 = vmatmul.mubr.bf16.gmra.mxu0 %v2109_v42 }
 0xb8a   :  { %v2071_v18 = vpop.xlane.xlu0 %2070 }
 0xb8b   :  { %5274 = vrcp.f32 %v2071_v18 }
 0xb8c   :  { %5276 = vrcp.f32 %v2065_v55 }
 0xb8d   :  { %5278 = vrcp.f32 %v2069_v3 }
 0xb8e   :  { %v2067_v53 = vpop.xlane.xlu1 %2066  ;;  %v2260_v50 = vpop.permute.xlu0 %2259 }
 0xb8f   :  { %5280 = vrcp.f32 %v2067_v53  ;;  %v2301_v17 = vsel %vm914_vm9, %v2260_v50, 0 }
 0xb92   :  { %v2262_v14 = vpop.permute.xlu1 %2261  ;;  %v2258_v12 = vpop.permute.xlu0 %2257 }
 0xb93   :  { %4997 = vmatprep.subr.msk.bf16.mxu0 %vm914_vm9, %v2262_v14  ;;  %v2304_v40 = vsel %vm914_vm9, %v2262_v14, 0 }
 0xb94   :  { %4785 = vmatpush3.bf16.xpose.msra.mxu0 %v2304_v40 }
 0xb95   :  { %4998 = vmatprep.subr.msk.bf16.mxu0 %vm914_vm9, %v2260_v50 }
 0xb96   :  { %v2242_v24 = vpop.permute.xlu1 %2241  ;;  %v2244_v46 = vpop.permute.xlu0 %2243 }
 0xb98   :  { %v5275_v37 = vpop.eup %5274 }
 0xb99   :  { %v5277_v27 = vpop.eup %5276  ;;  %v2103_v19 = vmul.f32 %v5275_v37, %v6890_v36  ;;  %v2298_v36 = vsel %vm914_vm9, %v2258_v12, 0 }
 0xb9a   :  { %v2246_v56 = vpop.permute.xlu1 %2245  ;;  %v2248_v26 = vpop.permute.xlu0 %2247  ;;  %v2100_v39 = vmul.f32 %v5277_v27, %v6879_v62 }
 0xb9b   :  { %v5279_v7 = vpop.eup %5278 }
 0xb9c   :  { %v5281_v60 = vpop.eup %5280  ;;  %4787 = vmatpush3.bf16.xpose.msra.mxu0 %v2301_v17  ;;  %v2102_v51 = vmul.f32 %v5279_v7, %v6873_v31 }
 0xb9d   :  { %4999 = vmatprep.subr.msk.bf16.mxu0 %vm914_vm9, %v2258_v12  ;;  %v2101_v29 = vmul.f32 %v5281_v60, %v6893_v15 }
 0xb9e   :  { %v2250_v13 = vpop.permute.xlu1 %2249  ;;  %v2252_v6 = vpop.permute.xlu0 %2251  ;;  %v2111_v20 = vpack.c.bf16 %v2103_v19, %v2102_v51 }
 0xb9f   :  { %v2110_v23 = vpack.c.bf16 %v2101_v29, %v2100_v39 }
 0xba1   :  { %4770 = vmatprep.mubr.bf16.mxu0 %v2110_v23 }
 0xba2   :  { %v2254_v38 = vpop.permute.xlu1 %2253  ;;  %4771 = vmatmul.mubr.bf16.gmra.mxu0 %v2111_v20  ;;  %v2256_v4 = vpop.permute.xlu0 %2255 }
 0xba3   :  { %4790 = vmatprep.mubr.msk.bf16.mxu0 %vm914_vm9, %v2242_v24 }
 0xba4   :  { %4789 = vmatpush3.bf16.xpose.msra.mxu0 %v2298_v36 }
 0xba6   :  { %v2585_v47 = vpop.permute.xlu0 %2584  ;;  %v2583_v62 = vpop.permute.xlu1 %2582 }
 0xba7   :  { %4806 = vmatprep.subr.bf16.mxu1 %v2585_v47 }
 0xba8   :  { %4807 = vmatpush3.bf16.msra.mxu1 %v2585_v47 }
 0xba9   :  { %4808 = vmatprep.subr.bf16.mxu1 %v2583_v62 }
 0xbab   :  { %4791 = vmatmul.mubr.msk.bf16.vlgmr.msra.gmra.mxu0 %vm914_vm9, %v2244_v46 }
 0xbac   :  { %4794 = vmatprep.mubr.msk.bf16.mxu0 %vm914_vm9, %v2246_v56  ;;  %4809 = vmatpush3.bf16.msra.mxu1 %v2583_v62 }
 0xbb3   :  { %4795 = vmatmul.mubr.msk.bf16.gmra.mxu0 %vm914_vm9, %v2248_v26 }
 0xbb4   :  { %4798 = vmatprep.mubr.msk.bf16.mxu0 %vm914_vm9, %v2250_v13 }
 0xbbb   :  { %4799 = vmatmul.mubr.msk.bf16.gmra.mxu0 %vm914_vm9, %v2252_v6 }
 0xbbc   :  { %4802 = vmatprep.mubr.msk.bf16.mxu0 %vm914_vm9, %v2254_v38 }
 0xbc3   :  { %4803 = vmatmul.mubr.msk.bf16.gmra.mxu0 %vm914_vm9, %v2256_v4 }
 0xbee   :  { %v6962_v31 = vpop.f32.mrf.mxu0 }
 0xbf0   :  { %v6964_v15 = vpop.f32.mrf.mxu0 }
 0xbf2   :  { %v6966_v49 = vpop.f32.mrf.mxu0 }
 0xbf3   :  { %v2234_v30 = vpack.c.bf16 %v6966_v49, %v6962_v31 }
 0xbf4   :  { %v6970_v8 = vpop.f32.mrf.mxu0 }
 0xbf5   :  { %v2233_v34 = vpack.c.bf16 %v6970_v8, %v6964_v15  ;;  %v8189_v15 = vld [vmem:[#allocation46_spill] sm:$0xff]  ;;  %v8190_v8 = vld [vmem:[#allocation44_spill] sm:$0xff] }
 0xc26   :  { %v6974_v45 = vpop.f32.mrf.mxu0 }
 0xc28   :  { %v6976_v58 = vpop.f32.mrf.mxu0 }
 0xc2a   :  { %v6978_v59 = vpop.f32.mrf.mxu0 }
 0xc2b   :  { %v2236_v54 = vpack.c.bf16 %v6978_v59, %v6974_v45 }
 0xc2c   :  { %v6982_v42 = vpop.f32.mrf.mxu0 }
 0xc2d   :  { %v2235_v3 = vpack.c.bf16 %v6982_v42, %v6976_v58  ;;  %v8192_v58 = vld [vmem:[#allocation39_spill] sm:$0xff]  ;;  %v8193_v42 = vld [vmem:[#allocation21_spill] sm:$0xff] }
 0xc37   :  { %v6986_v55 = vpop.f32.mrf.mxu0 }
 0xc39   :  { %v6988_v18 = vpop.f32.mrf.mxu0 }
 0xc3b   :  { %v6990_v53 = vpop.f32.mrf.mxu0 }
 0xc3c   :  { %v2238_v50 = vpack.c.bf16 %v6990_v53, %v6986_v55 }
 0xc3d   :  { %v6994_v14 = vpop.f32.mrf.mxu0 }
 0xc3e   :  { %v2237_v12 = vpack.c.bf16 %v6994_v14, %v6988_v18 }
 0xc62   :  { %v6998_v40 = vpop.f32.mrf.mxu0 }
 0xc64   :  { %v7000_v24 = vpop.f32.mrf.mxu0 }
 0xc66   :  { %v7002_v46 = vpop.f32.mrf.mxu0 }
 0xc67   :  { %v2240_v37 = vpack.c.bf16 %v7002_v46, %v6998_v40 }
 0xc68   :  { %v7006_v27 = vpop.f32.mrf.mxu0 }
 0xc69   :  { %v2239_v56 = vpack.c.bf16 %v7006_v27, %v7000_v24 }
 0xc6b   :  { %v4792_v26 = vpop.f32.mrf.mxu0 }
 0xc6c   :  { %v2364_v7 = vadd.f32 %v4792_v26, %v6158_v1 }
 0xc6d   :  { %v2355_v17 = vpop.f32.mrf.mxu0 }
 0xc6e   :  { %v2356_v60 = vadd.f32 %v2355_v17, %v6166_v52  ;;  %2422 = vmax.xlane.f32.xlu0 %v2364_v7 }
 0xc6f   :  { %v4793_v19 = vpop.f32.mrf.mxu0 }
 0xc70   :  { %2418 = vmax.xlane.f32.xlu1 %v2356_v60  ;;  %v2367_v29 = vadd.f32 %v4793_v19, %v6186_v48 }
 0xc71   :  { %v2358_v39 = vpop.f32.mrf.mxu0 }
 0xc72   :  { %v2359_v13 = vadd.f32 %v2358_v39, %v6182_v10 }
 0xc73   :  { %v4796_v6 = vpop.f32.mrf.mxu0 }
 0xc74   :  { %2420 = vmax.xlane.f32.xlu0 %v2359_v13  ;;  %2424 = vmax.xlane.f32.xlu1 %v2367_v29  ;;  %v2380_v23 = vadd.f32 %v4796_v6, %v6206_v11 }
 0xc75   :  { %v2371_v51 = vpop.f32.mrf.mxu0 }
 0xc76   :  { %v2372_v38 = vadd.f32 %v2371_v51, %v6223_v32 }
 0xc77   :  { %v4797_v20 = vpop.f32.mrf.mxu0 }
 0xc78   :  { %v7016_v1 = vadd.f32 %v4797_v20, %v6276_v57  ;;  %2430 = vmax.xlane.f32.xlu0 %v2380_v23 }
 0xc79   :  { %v2374_v52 = vpop.f32.mrf.mxu0 }
 0xc7a   :  { %2432 = vmax.xlane.f32.xlu1 %v7016_v1  ;;  %v2375_v48 = vadd.f32 %v2374_v52, %v6281_v44 }
 0xc7b   :  { %v4800_v4 = vpop.f32.mrf.mxu0 }
 0xc7c   :  { %2426 = vmax.xlane.f32.xlu0 %v2372_v38  ;;  %v7022_v36 = vadd.f32 %v4800_v4, %v6238_v35 }
 0xc7d   :  { %v2387_v10 = vpop.f32.mrf.mxu0 }
 0xc7e   :  { %2428 = vmax.xlane.f32.xlu1 %v2375_v48  ;;  %v7029_v32 = vadd.f32 %v2387_v10, %v6250_v5 }
 0xc7f   :  { %v4801_v11 = vpop.f32.mrf.mxu0 }
 0xc80   :  { %v7025_v47 = vadd.f32 %v4801_v11, %v6287_v9  ;;  %2438 = vmax.xlane.f32.xlu0 %v7022_v36 }
 0xc81   :  { %v2390_v57 = vpop.f32.mrf.mxu0 }
 0xc82   :  { %2440 = vmax.xlane.f32.xlu1 %v7025_v47  ;;  %v7033_v44 = vadd.f32 %v2390_v57, %v6293_v41 }
 0xc83   :  { %v4804_v62 = vpop.f32.mrf.mxu0 }
 0xc84   :  { %2434 = vmax.xlane.f32.xlu0 %v7029_v32  ;;  %v7037_v35 = vadd.f32 %v4804_v62, %v6258_v2 }
 0xc85   :  { %v2403_v9 = vpop.f32.mrf.mxu0 }
 0xc86   :  { %2436 = vmax.xlane.f32.xlu1 %v7033_v44  ;;  %v7042_v26 = vadd.f32 %v2403_v9, %v6264_v0 }
 0xc87   :  { %v4805_v41 = vpop.f32.mrf.mxu0 }
 0xc88   :  { %2446 = vmax.xlane.f32.xlu0 %v7037_v35  ;;  %v7054_v5 = vadd.f32 %v4805_v41, %v8170_v25 }
 0xc89   :  { %v2406_v2 = vpop.f32.mrf.mxu0 }
 0xc8a   :  { %v7058_v0 = vadd.f32 %v2406_v2, %v8171_v28 }
 0xc8c   :  { %2442 = vmax.xlane.f32.xlu0 %v7042_v26 }
 0xc97   :  { %2576 = vrot.lane.b32.xlu1 %v6056_v43, %s5461_s13 }
 0xca2   :  { %2580 = vrot.lane.b32.xlu0 %v6037_v61, %s5461_s13 }
 0xca6   :  { %2578 = vrot.lane.b32.xlu0 %v6048_v33, %s5461_s13 }
 0xcaa   :  { %2572 = vrot.lane.b32.xlu0 %v6072_v63, %s5461_s13 }
 0xcbb   :  { %2448 = vmax.xlane.f32.xlu1 %v7054_v5 }
 0xcbf   :  { %2444 = vmax.xlane.f32.xlu1 %v7058_v0 }
 0xcd0   :  { %2574 = vrot.lane.b32.xlu1 %v6064_v22, %s5461_s13 }
 0xcf7   :  { %v2423_v61 = vpop.xlane.xlu0 %2422 }
 0xcf8   :  { %v2452_v33 = vsub.f32 %v2364_v7, %v2423_v61 }
 0xcf9   :  { %v2419_v43 = vpop.xlane.xlu1 %2418 }
 0xcfa   :  { %v2470_v17 = vmul.f32 1.442695, %v2452_v33  ;;  %v2450_v63 = vsub.f32 %v2356_v60, %v2419_v43 }
 0xcfc   :  { %5282 = vpow2.f32 %v2470_v17  ;;  %v2466_v19 = vmul.f32 1.442695, %v2450_v63 }
 0xcfd   :  { %v2425_v25 = vpop.xlane.xlu1 %2424  ;;  %v2421_v39 = vpop.xlane.xlu0 %2420 }
 0xcfe   :  { %v2453_v6 = vsub.f32 %v2367_v29, %v2425_v25  ;;  %5284 = vpow2.f32 %v2466_v19  ;;  %v2451_v20 = vsub.f32 %v2359_v13, %v2421_v39 }
 0xd00   :  { %v2472_v51 = vmul.f32 1.442695, %v2453_v6  ;;  %v2468_v10 = vmul.f32 1.442695, %v2451_v20 }
 0xd01   :  { %v2431_v28 = vpop.xlane.xlu0 %2430 }
 0xd02   :  { %v2456_v52 = vsub.f32 %v2380_v23, %v2431_v28  ;;  %5286 = vpow2.f32 %v2472_v51 }
 0xd03   :  { %v2433_v4 = vpop.xlane.xlu1 %2432 }
 0xd04   :  { %v2478_v11 = vmul.f32 1.442695, %v2456_v52  ;;  %v2457_v7 = vsub.f32 %v7016_v1, %v2433_v4 }
 0xd05   :  { %v2427_v22 = vpop.xlane.xlu0 %2426 }
 0xd06   :  { %5288 = vpow2.f32 %v2478_v11  ;;  %v2454_v57 = vsub.f32 %v2372_v38, %v2427_v22  ;;  %v2480_v2 = vmul.f32 1.442695, %v2457_v7 }
 0xd07   :  { %v2429_v60 = vpop.xlane.xlu1 %2428  ;;  %5290 = vpow2.f32 %v2468_v10 }
 0xd08   :  { %v2474_v62 = vmul.f32 1.442695, %v2454_v57  ;;  %v2455_v9 = vsub.f32 %v2375_v48, %v2429_v60 }
 0xd09   :  { %v7064_v41 = vpop.eup %5282  ;;  %v2439_v29 = vpop.xlane.xlu0 %2438 }
 0xd0a   :  { %5292 = vpow2.f32 %v2474_v62  ;;  %v2476_v13 = vmul.f32 1.442695, %v2455_v9  ;;  %v2460_v23 = vsub.f32 %v7022_v36, %v2439_v29  ;;  %2502 = vadd.xlane.f32.xlu1 %v7064_v41 }
 0xd0b   :  { %v2441_v61 = vpop.xlane.xlu1 %2440  ;;  %v7068_v33 = vpop.eup %5284 }
 0xd0c   :  { %5294 = vpow2.f32 %v2476_v13  ;;  %v2486_v38 = vmul.f32 1.442695, %v2460_v23  ;;  %v2461_v36 = vsub.f32 %v7025_v47, %v2441_v61  ;;  %v5035_v13 = vld [vmem:[%s8075_s4 + $0x2c] ss:$20 sps:$4 sm:$0xff]   ;;  %v5036_v23 = vld [vmem:[%s8075_s4 + $0x4] ss:$20 sps:$4 sm:$0xff]  }
 0xd0d   :  { %v2435_v1 = vpop.xlane.xlu0 %2434  ;;  %5296 = vpow2.f32 %v2480_v2  ;;  %v5034_v2 = vld [vmem:[%s8075_s4 + $0x54] ss:$20 sps:$4 sm:$0xff]  }
 0xd0e   :  { %v2458_v43 = vsub.f32 %v7029_v32, %v2435_v1  ;;  %2498 = vadd.xlane.f32.xlu1 %v7068_v33  ;;  %5298 = vpow2.f32 %v2486_v38  ;;  %v2488_v28 = vmul.f32 1.442695, %v2461_v36 }
 0xd0f   :  { %v2437_v48 = vpop.xlane.xlu1 %2436  ;;  %v7073_v63 = vpop.eup %5286 }
 0xd10   :  { %v2459_v17 = vsub.f32 %v7033_v44, %v2437_v48  ;;  %v2482_v25 = vmul.f32 1.442695, %v2458_v43 }
 0xd11   :  { %v2447_v19 = vpop.xlane.xlu0 %2446 }
 0xd12   :  { %v2484_v39 = vmul.f32 1.442695, %v2459_v17  ;;  %v2464_v6 = vsub.f32 %v7037_v35, %v2447_v19  ;;  %2504 = vadd.xlane.f32.xlu1 %v7073_v63  ;;  %v8187_v19 = vld [vmem:[#allocation41_spill] sm:$0xff] }
 0xd13   :  { %v7078_v51 = vpop.eup %5288  ;;  %v2577_v7 = vpop.permute.xlu1 %2576 }
 0xd14   :  { %5300 = vpow2.f32 %v2484_v39  ;;  %v2494_v32 = vmul.f32 1.442695, %v2464_v6  ;;  %2510 = vadd.xlane.f32.xlu0 %v7078_v51  ;;  %v7081_v20 = vpop.eup %5290  ;;  %v8195_v39 = vld [vmem:[#allocation38_spill] sm:$0xff]  ;;  %v8196_v6 = vld [vmem:[#allocation20_spill] sm:$0xff] }
 0xd15   :  { %v2443_v44 = vpop.xlane.xlu0 %2442  ;;  %5302 = vpow2.f32 %v2482_v25  ;;  %v8188_v25 = vpack.c.bf16 %v6732_v16, %v8187_v19  ;;  %v5037_v16 = vld [vmem:[%s8075_s4 + $0x7c] ss:$20 sps:$4 sm:$0xff]  }
 0xd16   :  { %v2462_v47 = vsub.f32 %v7042_v26, %v2443_v44  ;;  %2500 = vadd.xlane.f32.xlu1 %v7081_v20  ;;  %5304 = vpow2.f32 %v2494_v32  ;;  %v8197_v32 = vpack.c.bf16 %v8195_v39, %v8196_v6  ;;  %v8198_v44 = vld [vmem:[#allocation42_spill] sm:$0xff] }
 0xd17   :  { %v7085_v52 = vpop.eup %5292  ;;  %5306 = vpow2.f32 %v2488_v28  ;;  %v8199_v28 = vld [vmem:[#allocation40_spill] sm:$0xff] }
 0xd18   :  { %v2490_v35 = vmul.f32 1.442695, %v2462_v47  ;;  %2506 = vadd.xlane.f32.xlu0 %v7085_v52  ;;  %v8200_v47 = vpack.c.bf16 %v8198_v44, %v8199_v28 }
 0xd19   :  { %v7088_v4 = vpop.eup %5294  ;;  %v2581_v10 = vpop.permute.xlu0 %2580 }
 0xd1a   :  { %2508 = vadd.xlane.f32.xlu1 %v7088_v4  ;;  %4810 = vmatprep.subr.bf16.mxu1 %v2581_v10  ;;  %v7091_v11 = vpop.eup %5296  ;;  %5308 = vpow2.f32 %v2490_v35  ;;  %v8201_v35 = vld [vmem:[#allocation45_spill] sm:$0xff] }
 0xd1b   :  { %4811 = vmatpush3.bf16.msra.mxu1 %v2581_v10  ;;  %v7094_v22 = vpop.eup %5298  ;;  %v8202_v10 = vld [vmem:[#allocation43_spill] sm:$0xff] }
 0xd1c   :  { %2512 = vadd.xlane.f32.xlu0 %v7091_v11 }
 0xd1d   :  { %v2579_v26 = vpop.permute.xlu0 %2578 }
 0xd1e   :  { %4812 = vmatprep.subr.bf16.mxu1 %v2579_v26 }
 0xd1f   :  { %4813 = vmatpush3.bf16.msra.mxu1 %v2579_v26  ;;  %v8203_v26 = vpack.c.bf16 %v8201_v35, %v8202_v10 }
 0xd20   :  { %2518 = vadd.xlane.f32.xlu0 %v7094_v22  ;;  %4814 = vmatprep.subr.bf16.mxu1 %v2577_v7 }
 0xd21   :  { %v7097_v57 = vpop.eup %5300  ;;  %v2573_v36 = vpop.permute.xlu0 %2572 }
 0xd22   :  { %2516 = vadd.xlane.f32.xlu1 %v7097_v57  ;;  %v7100_v60 = vpop.eup %5302 }
 0xd23   :  { %4815 = vmatpush3.bf16.msra.mxu1 %v2577_v7  ;;  %v7103_v62 = vpop.eup %5304 }
 0xd24   :  { %2514 = vadd.xlane.f32.xlu0 %v7100_v60  ;;  %v7106_v9 = vpop.eup %5306 }
 0xd26   :  { %2526 = vadd.xlane.f32.xlu1 %v7103_v62 }
 0xd27   :  { %v7109_v29 = vpop.eup %5308 }
 0xd28   :  { %2520 = vadd.xlane.f32.xlu0 %v7106_v9 }
 0xd2a   :  { %2522 = vadd.xlane.f32.xlu1 %v7109_v29 }
 0xd3b   :  { %2570 = vrot.lane.b32.xlu1 %v6077_v21, %s5461_s13 }
 0xd3f   :  { %2862 = vrot.lane.b32.xlu1 %v5034_v2, %s5454_s30 }
 0xd43   :  { %2860 = vrot.lane.b32.xlu1 %v5035_v13, %s5454_s30 }
 0xd44   :  { %v2449_v61 = vpop.xlane.xlu1 %2448 }
 0xd45   :  { %v2465_v1 = vsub.f32 %v7054_v5, %v2449_v61 }
 0xd47   :  { %2858 = vrot.lane.b32.xlu1 %v5036_v23, %s5454_s30  ;;  %v2496_v17 = vmul.f32 1.442695, %v2465_v1 }
 0xd48   :  { %v2445_v21 = vpop.xlane.xlu1 %2444 }
 0xd49   :  { %v2463_v38 = vsub.f32 %v7058_v0, %v2445_v21 }
 0xd4b   :  { %v2492_v43 = vmul.f32 1.442695, %v2463_v38  ;;  %2731 = vrot.lane.b32.xlu1 %v2233_v34, %s5458_s10  ;;  %v8191_v34 = vpack.c.bf16 %v8189_v15, %v8190_v8 }
 0xd4c   :  { %v2575_v48 = vpop.permute.xlu1 %2574 }
 0xd4d   :  { %5310 = vpow2.f32 %v2492_v43  ;;  %4816 = vmatprep.subr.bf16.mxu1 %v2575_v48 }
 0xd4e   :  { %4817 = vmatpush3.bf16.msra.mxu1 %v2575_v48  ;;  %5312 = vpow2.f32 %v2496_v17 }
 0xd4f   :  { %2711 = vrot.lane.b32.xlu1 %v8188_v25, %s5460_s12  ;;  %4818 = vmatprep.subr.bf16.mxu1 %v2573_v36 }
 0xd52   :  { %4819 = vmatpush3.bf16.msra.mxu1 %v2573_v36 }
 0xd53   :  { %2735 = vrot.lane.b32.xlu1 %v2235_v3, %s5458_s10  ;;  %v8194_v3 = vpack.c.bf16 %v8192_v58, %v8193_v42 }
 0xd57   :  { %2715 = vrot.lane.b32.xlu1 %v8191_v34, %s5460_s12 }
 0xd5a   :  { %v7144_v5 = vpop.eup %5310 }
 0xd5b   :  { %2524 = vadd.xlane.f32.xlu0 %v7144_v5  ;;  %v7147_v0 = vpop.eup %5312 }
 0xd5f   :  { %2528 = vadd.xlane.f32.xlu0 %v7147_v0 }
 0xd75   :  { %2864 = vrot.lane.b32.xlu0 %v5037_v16, %s5454_s30 }
 0xd79   :  { %2707 = vrot.lane.b32.xlu0 %v8194_v3, %s5460_s12 }
 0xd7d   :  { %2709 = vrot.lane.b32.xlu0 %v8197_v32, %s5460_s12 }
 0xd81   :  { %2733 = vrot.lane.b32.xlu0 %v2234_v30, %s5458_s10 }
 0xd85   :  { %2713 = vrot.lane.b32.xlu0 %v8200_v47, %s5460_s12 }
 0xd89   :  { %2737 = vrot.lane.b32.xlu0 %v2236_v54, %s5458_s10 }
 0xd8d   :  { %2717 = vrot.lane.b32.xlu0 %v8203_v26, %s5460_s12 }
 0xd93   :  { %v2503_v7 = vpop.xlane.xlu1 %2502 }
 0xd97   :  { %v2499_v2 = vpop.xlane.xlu1 %2498 }
 0xd98   :  { %5314 = vrcp.f32 %v2499_v2 }
 0xd9b   :  { %v2505_v13 = vpop.xlane.xlu1 %2504 }
 0xd9d   :  { %v2511_v31 = vpop.xlane.xlu0 %2510 }
 0xd9f   :  { %v2501_v49 = vpop.xlane.xlu1 %2500 }
 0xda0   :  { %5316 = vrcp.f32 %v2501_v49 }
 0xda1   :  { %v2507_v30 = vpop.xlane.xlu0 %2506  ;;  %5318 = vrcp.f32 %v2505_v13 }
 0xda3   :  { %v2509_v23 = vpop.xlane.xlu1 %2508 }
 0xda4   :  { %5320 = vrcp.f32 %v2509_v23 }
 0xda5   :  { %v2513_v61 = vpop.xlane.xlu0 %2512  ;;  %5322 = vrcp.f32 %v2503_v7  ;;  %v5315_v59 = vpop.eup %5314 }
 0xda6   :  { %5324 = vrcp.f32 %v2507_v30  ;;  %v2546_v38 = vmul.f32 %v5315_v59, %v7068_v33 }
 0xda7   :  { %5326 = vrcp.f32 %v2513_v61 }
 0xda9   :  { %v2519_v45 = vpop.xlane.xlu0 %2518 }
 0xdab   :  { %v2517_v54 = vpop.xlane.xlu1 %2516 }
 0xdad   :  { %v5317_v21 = vpop.eup %5316  ;;  %v2515_v1 = vpop.xlane.xlu0 %2514 }
 0xdae   :  { %v2547_v43 = vmul.f32 %v5317_v21, %v7081_v20  ;;  %5328 = vrcp.f32 %v2515_v1  ;;  %v5319_v36 = vpop.eup %5318 }
 0xdaf   :  { %v2527_v48 = vpop.xlane.xlu1 %2526  ;;  %5330 = vrcp.f32 %v2511_v31  ;;  %v2549_v16 = vmul.f32 %v5319_v36, %v7073_v63 }
 0xdb0   :  { %v2562_v17 = vpack.c.bf16 %v2547_v43, %v2546_v38  ;;  %5332 = vrcp.f32 %v2517_v54 }
 0xdb1   :  { %v2521_v19 = vpop.xlane.xlu0 %2520  ;;  %v5321_v15 = vpop.eup %5320 }
 0xdb2   :  { %4822 = vmatprep.mubr.bf16.mxu1 %v2562_v17  ;;  %v5323_v8 = vpop.eup %5322  ;;  %5334 = vrcp.f32 %v2521_v19  ;;  %v2551_v33 = vmul.f32 %v5321_v15, %v7088_v4 }
 0xdb3   :  { %v2523_v25 = vpop.xlane.xlu1 %2522  ;;  %v5325_v34 = vpop.eup %5324  ;;  %5336 = vrcp.f32 %v2519_v45  ;;  %v2548_v20 = vmul.f32 %v5323_v8, %v7064_v41 }
 0xdb4   :  { %v2550_v42 = vmul.f32 %v5325_v34, %v7085_v52  ;;  %v5327_v39 = vpop.eup %5326  ;;  %5338 = vrcp.f32 %v2523_v25 }
 0xdb5   :  { %v2563_v3 = vpack.c.bf16 %v2549_v16, %v2548_v20  ;;  %v2553_v63 = vmul.f32 %v5327_v39, %v7091_v11  ;;  %v8204_v16 = vld [vmem:[#allocation49_spill] sm:$0xff]  ;;  %v8208_v20 = vld [vmem:[#allocation48_spill] sm:$0xff] }
 0xdb6   :  { %v2564_v6 = vpack.c.bf16 %v2551_v33, %v2550_v42  ;;  %v8207_v33 = vld [vmem:[#allocation50_spill] sm:$0xff] }
 0xdb7   :  { %v2571_v58 = vpop.permute.xlu1 %2570  ;;  %v8209_v18 = vpack.c.bf16 %v8207_v33, %v8208_v20 }
 0xdb8   :  { %4820 = vmatprep.subr.bf16.mxu1 %v2571_v58 }
 0xdb9   :  { %4821 = vmatpush3.bf16.msra.mxu1 %v2571_v58  ;;  %v8205_v58 = vld [vmem:[#allocation47_spill] sm:$0xff] }
 0xdba   :  { %v8206_v55 = vpack.c.bf16 %v8204_v16, %v8205_v58  ;;  %v8226_v16 = vld [vmem:[#allocation30_spill] sm:$0xff] }
 0xdbb   :  { %v5329_v32 = vpop.eup %5328 }
 0xdbc   :  { %4823 = vmatmul.mubr.bf16.vlgmr.msra.gmra.mxu1 %v2563_v3  ;;  %v5331_v44 = vpop.eup %5330  ;;  %v2554_v47 = vmul.f32 %v5329_v32, %v7100_v60 }
 0xdbd   :  { %4826 = vmatprep.mubr.bf16.mxu1 %v2564_v6  ;;  %v5333_v28 = vpop.eup %5332  ;;  %v2552_v4 = vmul.f32 %v5331_v44, %v7078_v51  ;;  %v2863_v51 = vpop.permute.xlu1 %2862 }
 0xdbe   :  { %v2555_v35 = vmul.f32 %v5333_v28, %v7097_v57 }
 0xdbf   :  { %v2565_v41 = vpack.c.bf16 %v2553_v63, %v2552_v4  ;;  %v5335_v10 = vpop.eup %5334 }
 0xdc0   :  { %v2566_v26 = vpack.c.bf16 %v2555_v35, %v2554_v47  ;;  %v5337_v52 = vpop.eup %5336  ;;  %v2557_v7 = vmul.f32 %v5335_v10, %v7106_v9 }
 0xdc1   :  { %v2556_v2 = vmul.f32 %v5337_v52, %v7094_v22  ;;  %v5339_v31 = vpop.eup %5338  ;;  %v2861_v49 = vpop.permute.xlu1 %2860 }
 0xdc2   :  { %v2558_v9 = vmul.f32 %v5339_v31, %v7109_v29 }
 0xdc3   :  { %v2567_v13 = vpack.c.bf16 %v2557_v7, %v2556_v2  ;;  %v8213_v7 = vld [vmem:[#allocation24_spill] sm:$0xff]  ;;  %v8214_v2 = vld [vmem:[#allocation22_spill] sm:$0xff] }
 0xdc4   :  { %4827 = vmatmul.mubr.bf16.gmra.mxu1 %v2565_v41  ;;  %v8211_v41 = vld [vmem:[#allocation23_spill] sm:$0xff] }
 0xdc5   :  { %4830 = vmatprep.mubr.bf16.mxu1 %v2566_v26  ;;  %v2859_v59 = vpop.permute.xlu1 %2858 }
 0xdc9   :  { %v2732_v40 = vpop.permute.xlu1 %2731 }
 0xdcc   :  { %4831 = vmatmul.mubr.bf16.gmra.mxu1 %v2567_v13  ;;  %v8215_v13 = vpack.c.bf16 %v8213_v7, %v8214_v2 }
 0xde4   :  { %v2525_v11 = vpop.xlane.xlu0 %2524 }
 0xde5   :  { %5340 = vrcp.f32 %v2525_v11 }
 0xde6   :  { %5342 = vrcp.f32 %v2527_v48 }
 0xde8   :  { %v2529_v60 = vpop.xlane.xlu0 %2528 }
 0xde9   :  { %5344 = vrcp.f32 %v2529_v60 }
 0xdec   :  { %v2865_v57 = vpop.permute.xlu0 %2864 }
 0xded   :  { %4838 = vmatprep.subr.bf16.mxu1 %v2865_v57 }
 0xdee   :  { %4839 = vmatpush3.bf16.msra.mxu1 %v2865_v57 }
 0xdef   :  { %4840 = vmatprep.subr.bf16.mxu1 %v2863_v51 }
 0xdf0   :  { %v2708_v28 = vpop.permute.xlu0 %2707 }
 0xdf2   :  { %v5341_v30 = vpop.eup %5340  ;;  %4841 = vmatpush3.bf16.msra.mxu1 %v2863_v51 }
 0xdf3   :  { %v2559_v22 = vmul.f32 %v5341_v30, %v7144_v5  ;;  %4842 = vmatprep.subr.bf16.mxu1 %v2861_v49  ;;  %v5343_v23 = vpop.eup %5342 }
 0xdf4   :  { %v2560_v54 = vmul.f32 %v5343_v23, %v7103_v62  ;;  %v2710_v63 = vpop.permute.xlu0 %2709  ;;  %v8216_v23 = vld [vmem:[#allocation29_spill] sm:$0xff] }
 0xdf5   :  { %v2568_v61 = vpack.c.bf16 %v2559_v22, %v2558_v9  ;;  %v2776_v11 = vsel %vm914_vm9, %v8215_v13, %v2710_v63  ;;  %v8232_v63 = vld [vmem:[#allocation35_spill] sm:$0xff] }
 0xdf6   :  { %v5345_v45 = vpop.eup %5344  ;;  %4843 = vmatpush3.bf16.msra.mxu1 %v2861_v49 }
 0xdf7   :  { %4834 = vmatprep.mubr.bf16.mxu1 %v2568_v61  ;;  %v2561_v21 = vmul.f32 %v5345_v45, %v7147_v0  ;;  %4844 = vmatprep.subr.bf16.mxu1 %v2859_v59  ;;  %v8217_v61 = vld [vmem:[#allocation27_spill] sm:$0xff] }
 0xdf8   :  { %v2734_v47 = vpop.permute.xlu0 %2733  ;;  %v8218_v45 = vpack.c.bf16 %v8216_v23, %v8217_v61 }
 0xdf9   :  { %v2569_v1 = vpack.c.bf16 %v2561_v21, %v2560_v54  ;;  %v2799_v57 = vsel %vm2795_vm11, %v2776_v11, %v2734_v47  ;;  %v8219_v21 = vld [vmem:[#allocation28_spill] sm:$0xff]  ;;  %v8235_v11 = vld [vmem:[#allocation5_spill] sm:$0xff] }
 0xdfa   :  { %4845 = vmatpush3.bf16.msra.mxu1 %v2859_v59 }
 0xdfb   :  { %4835 = vmatmul.mubr.bf16.gmra.mxu1 %v2569_v1  ;;  %v8220_v1 = vld [vmem:[#allocation26_spill] sm:$0xff] }
 0xdfc   :  { %v2714_v46 = vpop.permute.xlu0 %2713 }
 0xe00   :  { %v2738_v4 = vpop.permute.xlu0 %2737 }
 0xe04   :  { %v2718_v24 = vpop.permute.xlu0 %2717 }
 0xe7c   :  { %v4824_v38 = vpop.f32.mrf.mxu1 }
 0xe7e   :  { %v2628_v43 = vpop.f32.mrf.mxu1 }
 0xe80   :  { %v4825_v29 = vpop.f32.mrf.mxu1 }
 0xe81   :  { %v2692_v48 = vpack.c.bf16 %v4825_v29, %v4824_v38  ;;  %v8221_v38 = vpack.c.bf16 %v8219_v21, %v8220_v1 }
 0xe82   :  { %v2631_v5 = vpop.f32.mrf.mxu1 }
 0xe83   :  { %v2691_v17 = vpack.c.bf16 %v2631_v5, %v2628_v43  ;;  %2757 = vrot.lane.b32.xlu0 %v2692_v48, %s5455_s8  ;;  %v2782_v43 = vsel %vm914_vm9, %v8221_v38, %v2714_v46  ;;  %v8238_v38 = vld [vmem:[#allocation8_spill] sm:$0xff] }
 0xe84   :  { %v4828_v36 = vpop.f32.mrf.mxu1  ;;  %v2803_v48 = vsel %vm2795_vm11, %v2782_v43, %v2738_v4 }
 0xe85   :  { %2755 = vrot.lane.b32.xlu1 %v2691_v17, %s5455_s8 }
 0xe86   :  { %v2644_v19 = vpop.f32.mrf.mxu1 }
 0xe87   :  { %2741 = vrot.lane.b32.xlu0 %v2238_v50, %s5458_s10 }
 0xe88   :  { %v4829_v62 = vpop.f32.mrf.mxu1 }
 0xe89   :  { %v2694_v0 = vpack.c.bf16 %v4829_v62, %v4828_v36  ;;  %2739 = vrot.lane.b32.xlu1 %v2237_v12, %s5458_s10 }
 0xe8a   :  { %v2647_v25 = vpop.f32.mrf.mxu1 }
 0xe8b   :  { %v2693_v15 = vpack.c.bf16 %v2647_v25, %v2644_v19  ;;  %2761 = vrot.lane.b32.xlu0 %v2694_v0, %s5455_s8  ;;  %v8222_v0 = vld [vmem:[#allocation33_spill] sm:$0xff]  ;;  %v8223_v25 = vld [vmem:[#allocation31_spill] sm:$0xff] }
 0xe8c   :  { %v4832_v8 = vpop.f32.mrf.mxu1 }
 0xe8d   :  { %2759 = vrot.lane.b32.xlu1 %v2693_v15, %s5455_s8  ;;  %v8224_v15 = vpack.c.bf16 %v8222_v0, %v8223_v25 }
 0xe8e   :  { %v2660_v34 = vpop.f32.mrf.mxu1 }
 0xe8f   :  { %2721 = vrot.lane.b32.xlu0 %v8206_v55, %s5460_s12 }
 0xe90   :  { %v4833_v53 = vpop.f32.mrf.mxu1 }
 0xe91   :  { %v2696_v50 = vpack.c.bf16 %v4833_v53, %v4832_v8  ;;  %2719 = vrot.lane.b32.xlu1 %v8209_v18, %s5460_s12  ;;  %v8228_v18 = vld [vmem:[#allocation36_spill] sm:$0xff] }
 0xe92   :  { %v2663_v14 = vpop.f32.mrf.mxu1 }
 0xe93   :  { %v2695_v12 = vpack.c.bf16 %v2663_v14, %v2660_v34  ;;  %2765 = vrot.lane.b32.xlu0 %v2696_v50, %s5455_s8  ;;  %v8225_v34 = vld [vmem:[#allocation32_spill] sm:$0xff]  ;;  %v8229_v14 = vld [vmem:[#allocation34_spill] sm:$0xff] }
 0xe94   :  { %v8227_v58 = vpack.c.bf16 %v8225_v34, %v8226_v16 }
 0xe95   :  { %2763 = vrot.lane.b32.xlu1 %v2695_v12, %s5455_s8  ;;  %v8230_v12 = vpack.c.bf16 %v8228_v18, %v8229_v14 }
 0xe96   :  { %v2788_v55 = vsel %vm914_vm9, %v8227_v58, %v2718_v24 }
 0xe97   :  { %2745 = vrot.lane.b32.xlu0 %v2240_v37, %s5458_s10  ;;  %v2712_v37 = vpop.permute.xlu1 %2711 }
 0xe98   :  { %v2779_v59 = vsel %vm914_vm9, %v8218_v45, %v2712_v37 }
 0xe99   :  { %2743 = vrot.lane.b32.xlu1 %v2239_v56, %s5458_s10  ;;  %v8210_v56 = vld [vmem:[#allocation25_spill] sm:$0xff] }
 0xe9a   :  { %v8212_v10 = vpack.c.bf16 %v8210_v56, %v8211_v41 }
 0xe9b   :  { %v2736_v35 = vpop.permute.xlu1 %2735 }
 0xe9c   :  { %v2773_v26 = vsel %vm914_vm9, %v8212_v10, %v2708_v28  ;;  %v2801_v54 = vsel %vm2795_vm11, %v2779_v59, %v2736_v35  ;;  %v8231_v28 = vld [vmem:[#allocation37_spill] sm:$0xff] }
 0xe9d   :  { %v2797_v51 = vsel %vm2795_vm11, %v2773_v26, %v2732_v40  ;;  %v8233_v47 = vpack.c.bf16 %v8231_v28, %v8232_v63  ;;  %v8234_v26 = vld [vmem:[#allocation3_spill] sm:$0xff] }
 0xe9f   :  { %v2716_v27 = vpop.permute.xlu1 %2715 }
 0xea0   :  { %v2785_v8 = vsel %vm914_vm9, %v8224_v15, %v2716_v27  ;;  %v7285_v27 = vld [vmem:[%s8076_s6 + $0x3] ss:$0 sm:$0xff]  ;;  %v8241_v15 = vld [vmem:[#allocation9_spill] sm:$0xff] }
 0xebb   :  { %v4836_v42 = vpop.f32.mrf.mxu1 }
 0xebd   :  { %v2676_v3 = vpop.f32.mrf.mxu1 }
 0xebf   :  { %v4837_v39 = vpop.f32.mrf.mxu1 }
 0xec0   :  { %v2698_v6 = vpack.c.bf16 %v4837_v39, %v4836_v42 }
 0xec1   :  { %v2679_v32 = vpop.f32.mrf.mxu1 }
 0xec2   :  { %v2697_v44 = vpack.c.bf16 %v2679_v32, %v2676_v3  ;;  %2769 = vrot.lane.b32.xlu0 %v2698_v6, %s5455_s8 }
 0xec4   :  { %2767 = vrot.lane.b32.xlu1 %v2697_v44, %s5455_s8 }
 0xef5   :  { %v2758_v52 = vpop.permute.xlu0 %2757 }
 0xef6   :  { %v2816_v49 = vsel %vm2812_vm2, %v2799_v57, %v2758_v52 }
 0xef7   :  { %v2756_v60 = vpop.permute.xlu1 %2755 }
 0xef8   :  { %v2814_v31 = vsel %vm2812_vm2, %v2797_v51, %v2756_v60 }
 0xef9   :  { %4846 = vmatprep.mubr.msk.bf16.mxu1 %vm312_vm8, %v2814_v31  ;;  %v2742_v30 = vpop.permute.xlu0 %2741 }
 0xefa   :  { %4847 = vmatmul.mubr.msk.bf16.vlgmr.msra.gmra.mxu1 %vm312_vm8, %v2816_v49  ;;  %v2807_v33 = vsel %vm2795_vm11, %v2788_v55, %v2742_v30  ;;  %v8236_v49 = vld [vmem:[#allocation4_spill] sm:$0xff] }
 0xefb   :  { %v2740_v9 = vpop.permute.xlu1 %2739 }
 0xefc   :  { %v2805_v53 = vsel %vm2795_vm11, %v2785_v8, %v2740_v9 }
 0xefd   :  { %v2762_v22 = vpop.permute.xlu0 %2761 }
 0xefe   :  { %v2820_v17 = vsel %vm2812_vm2, %v2803_v48, %v2762_v22  ;;  %v8237_v22 = vld [vmem:[#allocation6_spill] sm:$0xff] }
 0xeff   :  { %v2760_v29 = vpop.permute.xlu1 %2759 }
 0xf00   :  { %v2818_v5 = vsel %vm2812_vm2, %v2801_v54, %v2760_v29 }
 0xf01   :  { %4850 = vmatprep.mubr.msk.bf16.mxu1 %vm312_vm8, %v2818_v5  ;;  %v2722_v36 = vpop.permute.xlu0 %2721 }
 0xf02   :  { %4851 = vmatmul.mubr.msk.bf16.gmra.mxu1 %vm312_vm8, %v2820_v17  ;;  %v2794_v42 = vsel %vm914_vm9, %v8230_v12, %v2722_v36  ;;  %v8239_v36 = vld [vmem:[#allocation7_spill] sm:$0xff] }
 0xf03   :  { %v2720_v19 = vpop.permute.xlu1 %2719 }
 0xf04   :  { %v2791_v40 = vsel %vm914_vm9, %v8233_v47, %v2720_v19  ;;  %vm5463_vm9 = vmmov 0  }
 0xf05   :  { %v2766_v62 = vpop.permute.xlu0 %2765 }
 0xf06   :  { %v2824_v3 = vsel %vm2812_vm2, %v2807_v33, %v2766_v62  ;;  %v8240_v62 = vld [vmem:[#allocation10_spill] sm:$0xff] }
 0xf07   :  { %v2764_v50 = vpop.permute.xlu1 %2763 }
 0xf08   :  { %v2822_v20 = vsel %vm2812_vm2, %v2805_v53, %v2764_v50 }
 0xf09   :  { %4854 = vmatprep.mubr.msk.bf16.mxu1 %vm312_vm8, %v2822_v20  ;;  %v2746_v39 = vpop.permute.xlu0 %2745  ;;  %v8242_v20 = vld [vmem:[#allocation12_spill] sm:$0xff] }
 0xf0a   :  { %v2811_v6 = vsel %vm2795_vm11, %v2794_v42, %v2746_v39  ;;  %4855 = vmatmul.mubr.msk.bf16.gmra.mxu1 %vm312_vm8, %v2824_v3  ;;  %v8243_v3 = vld [vmem:[#allocation11_spill] sm:$0xff] }
 0xf0b   :  { %v2744_v32 = vpop.permute.xlu1 %2743 }
 0xf0c   :  { %v2809_v37 = vsel %vm2795_vm11, %v2791_v40, %v2744_v32 }
 0xf34   :  { %v2770_v44 = vpop.permute.xlu0 %2769 }
 0xf35   :  { %v2828_v46 = vsel %vm2812_vm2, %v2811_v6, %v2770_v44  ;;  %v8244_v6 = vld [vmem:[#allocation14_spill] sm:$0xff]  ;;  %v8245_v44 = vld [vmem:[#allocation13_spill] sm:$0xff] }
 0xf36   :  { %v2768_v4 = vpop.permute.xlu1 %2767 }
 0xf37   :  { %v2826_v35 = vsel %vm2812_vm2, %v2809_v37, %v2768_v4 }
 0xf38   :  { %4858 = vmatprep.mubr.msk.bf16.mxu1 %vm312_vm8, %v2826_v35 }
 0xf39   :  { %4859 = vmatmul.mubr.msk.bf16.gmra.mxu1 %vm312_vm8, %v2828_v46 }
 0xfba   :  { %v4848_v24 = vpop.f32.mrf.mxu1 }
 0xfbb   :  { %v2929_v13 = vadd.f32 %v4848_v24, %v7285_v27 }
 0xfbc   :  { %v2920_v56 = vpop.f32.mrf.mxu1 }
 0xfbd   :  { %v2921_v41 = vadd.f32 %v2920_v56, %v7285_v27  ;;  %v7303_v23 = vadd.f32 %v2929_v13, %v8237_v22 }
 0xfbe   :  { %v4849_v10 = vpop.f32.mrf.mxu1 }
 0xfbf   :  { %v7289_v52 = vadd.f32 %v2921_v41, %v8234_v26  ;;  %v2932_v7 = vadd.f32 %v4849_v10, %v7285_v27  ;;  %v3007_v5 = vsel %vm312_vm8, %v7303_v23, 0.0  ;;  %v8246_v41 = vld [vmem:[#allocation16_spill] sm:$0xff] }
 0xfc0   :  { %v2923_v2 = vpop.f32.mrf.mxu1 }
 0xfc1   :  { %v7294_v60 = vadd.f32 %v2932_v7, %v8235_v11  ;;  %v2924_v51 = vadd.f32 %v2923_v2, %v7285_v27  ;;  %v3001_v57 = vsel %vm312_vm8, %v7289_v52, 0.0  ;;  %v8247_v7 = vld [vmem:[#allocation18_spill] sm:$0xff] }
 0xfc2   :  { %3002 = vadd.xlane.f32.xlu1 %v3001_v57  ;;  %v4852_v31 = vpop.f32.mrf.mxu1  ;;  %v8248_v57 = vld [vmem:[#allocation15_spill] sm:$0xff] }
 0xfc3   :  { %v7300_v30 = vadd.f32 %v2924_v51, %v8236_v49  ;;  %v3010_v59 = vsel %vm312_vm8, %v7294_v60, 0.0  ;;  %v2945_v21 = vadd.f32 %v4852_v31, %v7285_v27  ;;  %v8249_v49 = vld [vmem:[#allocation17_spill] sm:$0xff] }
 0xfc4   :  { %v2936_v9 = vpop.f32.mrf.mxu1 }
 0xfc5   :  { %v2937_v61 = vadd.f32 %v2936_v9, %v7285_v27  ;;  %v3004_v45 = vsel %vm312_vm8, %v7300_v30, 0.0  ;;  %v7322_v0 = vadd.f32 %v2945_v21, %v8240_v62 }
 0xfc6   :  { %3005 = vadd.xlane.f32.xlu0 %v3004_v45  ;;  %3011 = vadd.xlane.f32.xlu1 %v3010_v59  ;;  %v4853_v54 = vpop.f32.mrf.mxu1 }
 0xfc7   :  { %v7312_v43 = vadd.f32 %v2937_v61, %v8238_v38  ;;  %v2948_v29 = vadd.f32 %v4853_v54, %v7285_v27  ;;  %v3019_v33 = vsel %vm312_vm8, %v7322_v0, 0.0 }
 0xfc8   :  { %v2939_v1 = vpop.f32.mrf.mxu1 }
 0xfc9   :  { %v2940_v48 = vadd.f32 %v2939_v1, %v7285_v27  ;;  %v7325_v8 = vadd.f32 %v2948_v29, %v8241_v15  ;;  %v3013_v58 = vsel %vm312_vm8, %v7312_v43, 0.0 }
 0xfca   :  { %3008 = vadd.xlane.f32.xlu0 %v3007_v5  ;;  %v4856_v17 = vpop.f32.mrf.mxu1 }
 0xfcb   :  { %v7319_v19 = vadd.f32 %v2940_v48, %v8239_v36  ;;  %v2961_v53 = vadd.f32 %v4856_v17, %v7285_v27  ;;  %v3022_v42 = vsel %vm312_vm8, %v7325_v8, 0.0 }
 0xfcc   :  { %v2952_v25 = vpop.f32.mrf.mxu1 }
 0xfcd   :  { %v2953_v34 = vadd.f32 %v2952_v25, %v7285_v27  ;;  %v3016_v16 = vsel %vm312_vm8, %v7319_v19, 0.0  ;;  %v7346_v32 = vadd.f32 %v2961_v53, %v8244_v6 }
 0xfce   :  { %3017 = vadd.xlane.f32.xlu1 %v3016_v16  ;;  %3014 = vadd.xlane.f32.xlu0 %v3013_v58  ;;  %v4857_v55 = vpop.f32.mrf.mxu1 }
 0xfcf   :  { %v7336_v18 = vadd.f32 %v2953_v34, %v8242_v20  ;;  %v2964_v14 = vadd.f32 %v4857_v55, %v7285_v27  ;;  %v3031_v46 = vsel %vm312_vm8, %v7346_v32, 0.0 }
 0xfd0   :  { %v2955_v50 = vpop.f32.mrf.mxu1 }
 0xfd1   :  { %v2956_v12 = vadd.f32 %v2955_v50, %v7285_v27  ;;  %v7349_v28 = vadd.f32 %v2964_v14, %v8245_v44  ;;  %v3025_v47 = vsel %vm312_vm8, %v7336_v18, 0.0 }
 0xfd2   :  { %3023 = vadd.xlane.f32.xlu1 %v3022_v42  ;;  %3020 = vadd.xlane.f32.xlu0 %v3019_v33 }
 0xfd3   :  { %v7343_v39 = vadd.f32 %v2956_v12, %v8243_v3  ;;  %v3034_v40 = vsel %vm312_vm8, %v7349_v28, 0.0 }
 0xfd5   :  { %v3028_v63 = vsel %vm312_vm8, %v7343_v39, 0.0 }
 0xfd6   :  { %3029 = vadd.xlane.f32.xlu1 %v3028_v63  ;;  %3026 = vadd.xlane.f32.xlu0 %v3025_v47 }
 0xfda   :  { %3035 = vadd.xlane.f32.xlu1 %v3034_v40  ;;  %3032 = vadd.xlane.f32.xlu0 %v3031_v46 }
 0xff9   :  { %v4860_v37 = vpop.f32.mrf.mxu1 }
 0xffa   :  { %v2977_v35 = vadd.f32 %v4860_v37, %v7285_v27 }
 0xffb   :  { %v2968_v4 = vpop.f32.mrf.mxu1 }
 0xffc   :  { %v2969_v24 = vadd.f32 %v2968_v4, %v7285_v27  ;;  %v7365_v2 = vadd.f32 %v2977_v35, %v8247_v7 }
 0xffd   :  { %v4861_v56 = vpop.f32.mrf.mxu1 }
 0xffe   :  { %v7362_v10 = vadd.f32 %v2969_v24, %v8246_v41  ;;  %v2980_v13 = vadd.f32 %v4861_v56, %v7285_v27  ;;  %v3043_v61 = vsel %vm312_vm8, %v7365_v2, 0.0 }
 0xfff   :  { %v2971_v26 = vpop.f32.mrf.mxu1 }
0x1000   :  { %v2972_v11 = vadd.f32 %v2971_v26, %v7285_v27  ;;  %v3037_v51 = vsel %vm312_vm8, %v7362_v10, 0.0  ;;  %v7375_v9 = vadd.f32 %v2980_v13, %v8249_v49 }
0x1001   :  { %3038 = vadd.xlane.f32.xlu0 %v3037_v51 }
0x1002   :  { %v7372_v31 = vadd.f32 %v2972_v11, %v8248_v57  ;;  %v3046_v27 = vsel %vm312_vm8, %v7375_v9, 0.0 }
0x1004   :  { %v3040_v22 = vsel %vm312_vm8, %v7372_v31, 0.0 }
0x1005   :  { %3041 = vadd.xlane.f32.xlu1 %v3040_v22  ;;  %3044 = vadd.xlane.f32.xlu0 %v3043_v61 }
0x1009   :  { %3047 = vadd.xlane.f32.xlu1 %v3046_v27 }
0x104b   :  { %v3003_v45 = vpop.xlane.xlu1 %3002 }
0x104c   :  { %v3049_v59 = vmul.f32 0.015625, %v3003_v45 }
0x104e   :  { %v7384_v54 = vsub.f32 %v7289_v52, %v3049_v59  ;;  %v5039_v59 = vld [vmem:[%s8075_s4 + $0x58] ss:$20 sps:$4 sm:$0xff]  }
0x104f   :  { %v3012_v21 = vpop.xlane.xlu1 %3011  ;;  %v3006_v1 = vpop.xlane.xlu0 %3005 }
0x1050   :  { %v3052_v38 = vmul.f32 0.015625, %v3012_v21  ;;  %v3050_v29 = vmul.f32 0.015625, %v3006_v1  ;;  %v3081_v48 = vmul.f32 %v7384_v54, %v7384_v54  ;;  %v5040_v21 = vld [vmem:[%s8075_s4 + $0x30] ss:$20 sps:$4 sm:$0xff]   ;;  %v5041_v1 = vld [vmem:[%s8075_s4 + $0x8] ss:$20 sps:$4 sm:$0xff]  }
0x1052   :  { %v7389_v5 = vsub.f32 %v7294_v60, %v3052_v38  ;;  %v7392_v17 = vsub.f32 %v7300_v30, %v3050_v29  ;;  %v3097_v36 = vsel %vm312_vm8, %v3081_v48, 0.0 }
0x1053   :  { %3098 = vadd.xlane.f32.xlu0 %v3097_v36  ;;  %v3009_v62 = vpop.xlane.xlu0 %3008 }
0x1054   :  { %v3051_v25 = vmul.f32 0.015625, %v3009_v62  ;;  %v3082_v52 = vmul.f32 %v7392_v17, %v7392_v17  ;;  %v3084_v60 = vmul.f32 %v7389_v5, %v7389_v5 }
0x1056   :  { %v7398_v15 = vsub.f32 %v7303_v23, %v3051_v25  ;;  %v3100_v34 = vsel %vm312_vm8, %v3082_v52, 0.0  ;;  %v3106_v23 = vsel %vm312_vm8, %v3084_v60, 0.0 }
0x1057   :  { %v3018_v16 = vpop.xlane.xlu1 %3017  ;;  %3101 = vadd.xlane.f32.xlu1 %v3100_v34  ;;  %v3015_v30 = vpop.xlane.xlu0 %3014 }
0x1058   :  { %v3054_v58 = vmul.f32 0.015625, %v3018_v16  ;;  %v3053_v55 = vmul.f32 0.015625, %v3015_v30  ;;  %v3083_v53 = vmul.f32 %v7398_v15, %v7398_v15 }
0x105a   :  { %v7406_v50 = vsub.f32 %v7319_v19, %v3054_v58  ;;  %v7409_v33 = vsub.f32 %v7312_v43, %v3053_v55  ;;  %v3103_v20 = vsel %vm312_vm8, %v3083_v53, 0.0 }
0x105b   :  { %v3024_v14 = vpop.xlane.xlu1 %3023  ;;  %3107 = vadd.xlane.f32.xlu1 %v3106_v23  ;;  %3104 = vadd.xlane.f32.xlu0 %v3103_v20  ;;  %v3021_v12 = vpop.xlane.xlu0 %3020 }
0x105c   :  { %v3056_v42 = vmul.f32 0.015625, %v3024_v14  ;;  %v3055_v3 = vmul.f32 0.015625, %v3021_v12  ;;  %v3086_v6 = vmul.f32 %v7406_v50, %v7406_v50  ;;  %v3085_v19 = vmul.f32 %v7409_v33, %v7409_v33  ;;  %v5444_v12 = vld [vmem:[%s8073_s5 + $0x30] sm:$0xff]  }
0x105e   :  { %v7418_v44 = vsub.f32 %v7325_v8, %v3056_v42  ;;  %v7421_v43 = vsub.f32 %v7322_v0, %v3055_v3  ;;  %v3112_v63 = vsel %vm312_vm8, %v3086_v6, 0.0  ;;  %v3109_v47 = vsel %vm312_vm8, %v3085_v19, 0.0  ;;  %v5446_v42 = vld [vmem:[%s8073_s5 + $0x28] sm:$0xff]   ;;  %v5447_v3 = vld [vmem:[%s8073_s5 + $0x20] sm:$0xff]   ;;  %v5448_v6 = vld [vmem:[%s8073_s5 + $0x18] sm:$0xff]  }
0x105f   :  { %v3030_v40 = vpop.xlane.xlu1 %3029  ;;  %3113 = vadd.xlane.f32.xlu1 %v3112_v63  ;;  %3110 = vadd.xlane.f32.xlu0 %v3109_v47  ;;  %v3027_v46 = vpop.xlane.xlu0 %3026  ;;  %v5449_v19 = vld [vmem:[%s8073_s5 + $0x10] sm:$0xff]   ;;  %v5450_v63 = vld [vmem:[%s8073_s5 + $0x8] sm:$0xff]   ;;  %v5451_v47 = vld [vmem:[%s8073_s5] sm:$0xff]  }
0x1060   :  { %v3058_v37 = vmul.f32 0.015625, %v3030_v40  ;;  %v3057_v4 = vmul.f32 0.015625, %v3027_v46  ;;  %v3088_v35 = vmul.f32 %v7418_v44, %v7418_v44  ;;  %v3087_v8 = vmul.f32 %v7421_v43, %v7421_v43 }
0x1062   :  { %v7430_v24 = vsub.f32 %v7343_v39, %v3058_v37  ;;  %v7433_v0 = vsub.f32 %v7336_v18, %v3057_v4  ;;  %v3118_v56 = vsel %vm312_vm8, %v3088_v35, 0.0  ;;  %v3115_v41 = vsel %vm312_vm8, %v3087_v8, 0.0 }
0x1063   :  { %v3036_v26 = vpop.xlane.xlu1 %3035  ;;  %3119 = vadd.xlane.f32.xlu1 %v3118_v56  ;;  %3116 = vadd.xlane.f32.xlu0 %v3115_v41  ;;  %v3033_v7 = vpop.xlane.xlu0 %3032 }
0x1064   :  { %v3060_v13 = vmul.f32 0.015625, %v3036_v26  ;;  %v3059_v11 = vmul.f32 0.015625, %v3033_v7  ;;  %v3090_v51 = vmul.f32 %v7430_v24, %v7430_v24  ;;  %v3089_v39 = vmul.f32 %v7433_v0, %v7433_v0 }
0x1066   :  { %v7442_v57 = vsub.f32 %v7349_v28, %v3060_v13  ;;  %v7445_v18 = vsub.f32 %v7346_v32, %v3059_v11  ;;  %v3124_v49 = vsel %vm312_vm8, %v3090_v51, 0.0  ;;  %v3121_v22 = vsel %vm312_vm8, %v3089_v39, 0.0  ;;  %v5038_v32 = vld [vmem:[%s8075_s4 + $0x80] ss:$20 sps:$4 sm:$0xff]  }
0x1067   :  { %3125 = vadd.xlane.f32.xlu1 %v3124_v49  ;;  %3122 = vadd.xlane.f32.xlu0 %v3121_v22 }
0x1068   :  { %v3092_v61 = vmul.f32 %v7442_v57, %v7442_v57  ;;  %v3091_v27 = vmul.f32 %v7445_v18, %v7445_v18  ;;  %4862 = vmatprep.subr.bf16.mxu0 %v5038_v32 }
0x1069   :  { %4863 = vmatpush3.bf16.msra.mxu0 %v5038_v32 }
0x106a   :  { %v3130_v45 = vsel %vm312_vm8, %v3092_v61, 0.0  ;;  %v3127_v28 = vsel %vm312_vm8, %v3091_v27, 0.0  ;;  %4864 = vmatprep.subr.bf16.mxu0 %v5039_v59 }
0x106b   :  { %3131 = vadd.xlane.f32.xlu1 %v3130_v45  ;;  %3128 = vadd.xlane.f32.xlu0 %v3127_v28 }
0x106d   :  { %4865 = vmatpush3.bf16.msra.mxu0 %v5039_v59 }
0x106e   :  { %4866 = vmatprep.subr.bf16.mxu0 %v5040_v21 }
0x1071   :  { %4867 = vmatpush3.bf16.msra.mxu0 %v5040_v21 }
0x1072   :  { %4868 = vmatprep.subr.bf16.mxu0 %v5041_v1 }
0x1075   :  { %4869 = vmatpush3.bf16.msra.mxu0 %v5041_v1  ;;  %v7526_v1 = vld [vmem:[%s8076_s6 + $0x4] ss:$0 sm:$0xff] }
0x108a   :  { %v3039_v38 = vpop.xlane.xlu0 %3038 }
0x108b   :  { %v3061_v29 = vmul.f32 0.015625, %v3039_v38 }
0x108d   :  { %v7468_v48 = vsub.f32 %v7362_v10, %v3061_v29 }
0x108e   :  { %v3042_v36 = vpop.xlane.xlu1 %3041  ;;  %v3045_v62 = vpop.xlane.xlu0 %3044 }
0x108f   :  { %v3062_v25 = vmul.f32 0.015625, %v3042_v36  ;;  %v3063_v52 = vmul.f32 0.015625, %v3045_v62  ;;  %v3093_v34 = vmul.f32 %v7468_v48, %v7468_v48 }
0x1091   :  { %v7473_v60 = vsub.f32 %v7372_v31, %v3062_v25  ;;  %v7476_v16 = vsub.f32 %v7365_v2, %v3063_v52  ;;  %v3133_v30 = vsel %vm312_vm8, %v3093_v34, 0.0 }
0x1092   :  { %v3048_v58 = vpop.xlane.xlu1 %3047  ;;  %3134 = vadd.xlane.f32.xlu0 %v3133_v30 }
0x1093   :  { %v3064_v55 = vmul.f32 0.015625, %v3048_v58  ;;  %v3094_v10 = vmul.f32 %v7473_v60, %v7473_v60  ;;  %v3095_v53 = vmul.f32 %v7476_v16, %v7476_v16 }
0x1095   :  { %v7484_v23 = vsub.f32 %v7375_v9, %v3064_v55  ;;  %v3136_v31 = vsel %vm312_vm8, %v3094_v10, 0.0  ;;  %v3139_v20 = vsel %vm312_vm8, %v3095_v53, 0.0  ;;  %v5445_v9 = vld [vmem:[%s8073_s5 + $0x38] sm:$0xff]   ;;  %v7533_v53 = vld [vmem:[%s8076_s6 + $0x5] ss:$0 sm:$0xff] }
0x1096   :  { %3137 = vadd.xlane.f32.xlu1 %v3136_v31  ;;  %3140 = vadd.xlane.f32.xlu0 %v3139_v20 }
0x1097   :  { %v3096_v2 = vmul.f32 %v7484_v23, %v7484_v23 }
0x1099   :  { %v3142_v14 = vsel %vm312_vm8, %v3096_v2, 0.0 }
0x109a   :  { %3143 = vadd.xlane.f32.xlu1 %v3142_v14 }
0x10ab   :  { %3568 = vrot.lane.b32.xlu1 %v5444_v12, %s5454_s30 }
0x10ac   :  { %3570 = vrot.lane.b32.xlu0 %v5445_v9, %s5454_s30 }
0x10af   :  { %3566 = vrot.lane.b32.xlu1 %v5446_v42, %s5454_s30 }
0x10b0   :  { %3564 = vrot.lane.b32.xlu0 %v5447_v3, %s5454_s30 }
0x10b3   :  { %3562 = vrot.lane.b32.xlu1 %v5448_v6, %s5454_s30 }
0x10b4   :  { %3560 = vrot.lane.b32.xlu0 %v5449_v19, %s5454_s30 }
0x10b7   :  { %3558 = vrot.lane.b32.xlu1 %v5450_v63, %s5454_s30 }
0x10b8   :  { %3556 = vrot.lane.b32.xlu0 %v5451_v47, %s5454_s30 }
0x10dc   :  { %v3099_v40 = vpop.xlane.xlu0 %3098 }
0x10dd   :  { %v3145_v46 = vmul.f32 0.015625, %v3099_v40 }
0x10df   :  { %v3161_v37 = vadd.f32 1e-12, %v3145_v46 }
0x10e0   :  { %v3102_v4 = vpop.xlane.xlu1 %3101 }
0x10e1   :  { %5346 = vrsqrt.f32 %v3161_v37  ;;  %v3146_v35 = vmul.f32 0.015625, %v3102_v4 }
0x10e3   :  { %v3162_v8 = vadd.f32 1e-12, %v3146_v35 }
0x10e4   :  { %v3108_v56 = vpop.xlane.xlu1 %3107  ;;  %v3105_v41 = vpop.xlane.xlu0 %3104 }
0x10e5   :  { %5348 = vrsqrt.f32 %v3162_v8  ;;  %v3148_v26 = vmul.f32 0.015625, %v3108_v56  ;;  %v3147_v7 = vmul.f32 0.015625, %v3105_v41 }
0x10e7   :  { %v3164_v13 = vadd.f32 1e-12, %v3148_v26  ;;  %v3163_v11 = vadd.f32 1e-12, %v3147_v7 }
0x10e8   :  { %v3114_v51 = vpop.xlane.xlu1 %3113  ;;  %v3111_v39 = vpop.xlane.xlu0 %3110 }
0x10e9   :  { %5350 = vrsqrt.f32 %v3164_v13  ;;  %v3150_v49 = vmul.f32 0.015625, %v3114_v51  ;;  %v3149_v22 = vmul.f32 0.015625, %v3111_v39 }
0x10ea   :  { %5352 = vrsqrt.f32 %v3163_v11 }
0x10eb   :  { %v3166_v61 = vadd.f32 1e-12, %v3150_v49  ;;  %v3165_v27 = vadd.f32 1e-12, %v3149_v22 }
0x10ec   :  { %v3120_v45 = vpop.xlane.xlu1 %3119  ;;  %v3117_v28 = vpop.xlane.xlu0 %3116 }
0x10ed   :  { %5354 = vrsqrt.f32 %v3166_v61  ;;  %v3152_v32 = vmul.f32 0.015625, %v3120_v45  ;;  %v3151_v59 = vmul.f32 0.015625, %v3117_v28 }
0x10ee   :  { %v5347_v21 = vpop.eup %5346  ;;  %5356 = vrsqrt.f32 %v3165_v27 }
0x10ef   :  { %v3168_v38 = vadd.f32 1e-12, %v3152_v32  ;;  %v3167_v29 = vadd.f32 1e-12, %v3151_v59  ;;  %v3193_v36 = vmul.f32 %v5347_v21, %v7384_v54 }
0x10f0   :  { %v3126_v62 = vpop.xlane.xlu1 %3125  ;;  %v3123_v25 = vpop.xlane.xlu0 %3122 }
0x10f1   :  { %5358 = vrsqrt.f32 %v3168_v38  ;;  %v3154_v52 = vmul.f32 0.015625, %v3126_v62  ;;  %v3153_v34 = vmul.f32 0.015625, %v3123_v25  ;;  %v3209_v58 = vmul.f32 %v3193_v36, %v7526_v1 }
0x10f2   :  { %v5349_v30 = vpop.eup %5348  ;;  %5360 = vrsqrt.f32 %v3167_v29 }
0x10f3   :  { %v3170_v55 = vadd.f32 1e-12, %v3154_v52  ;;  %v3169_v10 = vadd.f32 1e-12, %v3153_v34  ;;  %v3194_v31 = vmul.f32 %v5349_v30, %v7392_v17  ;;  %v7538_v42 = vadd.f32 %v3209_v58, %v7533_v53 }
0x10f4   :  { %v3132_v20 = vpop.xlane.xlu1 %3131  ;;  %v3129_v54 = vpop.xlane.xlu0 %3128 }
0x10f5   :  { %5362 = vrsqrt.f32 %v3170_v55  ;;  %v3156_v2 = vmul.f32 0.015625, %v3132_v20  ;;  %v3155_v14 = vmul.f32 0.015625, %v3129_v54  ;;  %v3210_v12 = vmul.f32 %v3194_v31, %v7526_v1 }
0x10f6   :  { %v5351_v9 = vpop.eup %5350  ;;  %5364 = vrsqrt.f32 %v3169_v10 }
0x10f7   :  { %v5353_v3 = vpop.eup %5352  ;;  %v3196_v6 = vmul.f32 %v5351_v9, %v7389_v5  ;;  %v3172_v19 = vadd.f32 1e-12, %v3156_v2  ;;  %v3171_v63 = vadd.f32 1e-12, %v3155_v14  ;;  %v7542_v47 = vadd.f32 %v3210_v12, %v7533_v53 }
0x10f8   :  { %v3195_v17 = vmul.f32 %v5353_v3, %v7398_v15 }
0x10f9   :  { %v3212_v40 = vmul.f32 %v3196_v6, %v7526_v1  ;;  %5366 = vrsqrt.f32 %v3172_v19  ;;  %v3241_v46 = vpack.c.bf16 %v7542_v47, %v7538_v42 }
0x10fa   :  { %v5355_v37 = vpop.eup %5354  ;;  %v3211_v4 = vmul.f32 %v3195_v17, %v7526_v1  ;;  %5368 = vrsqrt.f32 %v3171_v63 }
0x10fb   :  { %v5357_v35 = vpop.eup %5356  ;;  %4870 = vmatprep.mubr.msk.bf16.mxu0 %vm312_vm8, %v3241_v46  ;;  %v7551_v5 = vadd.f32 %v3212_v40, %v7533_v53  ;;  %v3198_v8 = vmul.f32 %v5355_v37, %v7406_v50 }
0x10fc   :  { %v7555_v15 = vadd.f32 %v3211_v4, %v7533_v53  ;;  %v3197_v56 = vmul.f32 %v5357_v35, %v7409_v33 }
0x10fd   :  { %v3214_v41 = vmul.f32 %v3198_v8, %v7526_v1 }
0x10fe   :  { %v5359_v26 = vpop.eup %5358  ;;  %v3242_v7 = vpack.c.bf16 %v7551_v5, %v7555_v15  ;;  %v3213_v13 = vmul.f32 %v3197_v56, %v7526_v1 }
0x10ff   :  { %v5361_v11 = vpop.eup %5360  ;;  %v7563_v51 = vadd.f32 %v3214_v41, %v7533_v53  ;;  %v3200_v39 = vmul.f32 %v5359_v26, %v7418_v44 }
0x1100   :  { %4871 = vmatmul.mubr.msk.bf16.vlgmr.msra.gmra.mxu0 %vm312_vm8, %v3242_v7  ;;  %v7568_v50 = vadd.f32 %v3213_v13, %v7533_v53  ;;  %v3199_v33 = vmul.f32 %v5361_v11, %v7421_v43 }
0x1101   :  { %v3216_v49 = vmul.f32 %v3200_v39, %v7526_v1 }
0x1102   :  { %v5363_v22 = vpop.eup %5362  ;;  %v3243_v61 = vpack.c.bf16 %v7563_v51, %v7568_v50  ;;  %v3215_v27 = vmul.f32 %v3199_v33, %v7526_v1 }
0x1103   :  { %v5365_v45 = vpop.eup %5364  ;;  %v7576_v28 = vadd.f32 %v3216_v49, %v7533_v53  ;;  %v3202_v44 = vmul.f32 %v5363_v22, %v7430_v24 }
0x1104   :  { %4874 = vmatprep.mubr.msk.bf16.mxu0 %vm312_vm8, %v3243_v61  ;;  %v7581_v32 = vadd.f32 %v3215_v27, %v7533_v53  ;;  %v3201_v43 = vmul.f32 %v5365_v45, %v7433_v0  ;;  %v7640_v45 = vld [vmem:[%s8076_s6 + $0x6] ss:$0 sm:$0xff] }
0x1105   :  { %v3218_v59 = vmul.f32 %v3202_v44, %v7526_v1 }
0x1106   :  { %v5367_v21 = vpop.eup %5366  ;;  %v3244_v38 = vpack.c.bf16 %v7576_v28, %v7581_v32  ;;  %v3217_v29 = vmul.f32 %v3201_v43, %v7526_v1 }
0x1107   :  { %v5369_v36 = vpop.eup %5368  ;;  %v7589_v62 = vadd.f32 %v3218_v59, %v7533_v53  ;;  %v3204_v24 = vmul.f32 %v5367_v21, %v7442_v57 }
0x1108   :  { %4875 = vmatmul.mubr.msk.bf16.gmra.mxu0 %vm312_vm8, %v3244_v38  ;;  %v7594_v25 = vadd.f32 %v3217_v29, %v7533_v53  ;;  %v3203_v0 = vmul.f32 %v5369_v36, %v7445_v18 }
0x1109   :  { %v3220_v52 = vmul.f32 %v3204_v24, %v7526_v1 }
0x110a   :  { %v3245_v34 = vpack.c.bf16 %v7589_v62, %v7594_v25  ;;  %v3219_v30 = vmul.f32 %v3203_v0, %v7526_v1 }
0x110b   :  { %v7602_v58 = vadd.f32 %v3220_v52, %v7533_v53 }
0x110c   :  { %4878 = vmatprep.mubr.msk.bf16.mxu0 %vm312_vm8, %v3245_v34  ;;  %v7606_v57 = vadd.f32 %v3219_v30, %v7533_v53 }
0x110e   :  { %v3246_v55 = vpack.c.bf16 %v7602_v58, %v7606_v57 }
0x1110   :  { %4879 = vmatmul.mubr.msk.bf16.gmra.mxu0 %vm312_vm8, %v3246_v55 }
0x111b   :  { %v3135_v18 = vpop.xlane.xlu0 %3134 }
0x111c   :  { %v3157_v10 = vmul.f32 0.015625, %v3135_v18 }
0x111e   :  { %v3173_v31 = vadd.f32 1e-12, %v3157_v10 }
0x111f   :  { %v3138_v20 = vpop.xlane.xlu1 %3137  ;;  %v3141_v54 = vpop.xlane.xlu0 %3140 }
0x1120   :  { %5370 = vrsqrt.f32 %v3173_v31  ;;  %v3158_v2 = vmul.f32 0.015625, %v3138_v20  ;;  %v3159_v14 = vmul.f32 0.015625, %v3141_v54 }
0x1122   :  { %v3174_v12 = vadd.f32 1e-12, %v3158_v2  ;;  %v3175_v9 = vadd.f32 1e-12, %v3159_v14 }
0x1123   :  { %v3144_v3 = vpop.xlane.xlu1 %3143 }
0x1124   :  { %5372 = vrsqrt.f32 %v3174_v12  ;;  %v3160_v6 = vmul.f32 0.015625, %v3144_v3 }
0x1125   :  { %5374 = vrsqrt.f32 %v3175_v9 }
0x1126   :  { %v3176_v19 = vadd.f32 1e-12, %v3160_v6 }
0x1127   :  { %v3569_v33 = vpop.permute.xlu1 %3568 }
0x1128   :  { %5376 = vrsqrt.f32 %v3176_v19 }
0x112d   :  { %v5371_v63 = vpop.eup %5370 }
0x112e   :  { %v3205_v17 = vmul.f32 %v5371_v63, %v7468_v48 }
0x1130   :  { %v3221_v4 = vmul.f32 %v3205_v17, %v7526_v1 }
0x1131   :  { %v5373_v40 = vpop.eup %5372 }
0x1132   :  { %v5375_v46 = vpop.eup %5374  ;;  %v3206_v37 = vmul.f32 %v5373_v40, %v7473_v60  ;;  %v7617_v41 = vadd.f32 %v3221_v4, %v7533_v53 }
0x1133   :  { %v3207_v35 = vmul.f32 %v5375_v46, %v7476_v16 }
0x1134   :  { %v3222_v8 = vmul.f32 %v3206_v37, %v7526_v1 }
0x1135   :  { %v5377_v56 = vpop.eup %5376  ;;  %v3223_v48 = vmul.f32 %v3207_v35, %v7526_v1 }
0x1136   :  { %v7620_v26 = vadd.f32 %v3222_v8, %v7533_v53  ;;  %v3208_v7 = vmul.f32 %v5377_v56, %v7484_v23  ;;  %v3571_v23 = vpop.permute.xlu0 %3570 }
0x1137   :  { %v7629_v16 = vadd.f32 %v3223_v48, %v7533_v53  ;;  %4886 = vmatprep.subr.bf16.mxu1 %v3571_v23 }
0x1138   :  { %v3247_v60 = vpack.c.bf16 %v7620_v26, %v7617_v41  ;;  %v3224_v13 = vmul.f32 %v3208_v7, %v7526_v1  ;;  %4887 = vmatpush3.bf16.msra.mxu1 %v3571_v23  ;;  %v3567_v1 = vpop.permute.xlu1 %3566 }
0x1139   :  { %4888 = vmatprep.subr.bf16.mxu1 %v3569_v33 }
0x113a   :  { %4882 = vmatprep.mubr.msk.bf16.mxu0 %vm312_vm8, %v3247_v60  ;;  %v7632_v11 = vadd.f32 %v3224_v13, %v7533_v53  ;;  %v3565_v49 = vpop.permute.xlu0 %3564 }
0x113c   :  { %v3248_v39 = vpack.c.bf16 %v7632_v11, %v7629_v16  ;;  %4889 = vmatpush3.bf16.msra.mxu1 %v3569_v33  ;;  %v3563_v22 = vpop.permute.xlu1 %3562 }
0x113d   :  { %4890 = vmatprep.subr.bf16.mxu1 %v3567_v1 }
0x113e   :  { %4883 = vmatmul.mubr.msk.bf16.gmra.mxu0 %vm312_vm8, %v3248_v39  ;;  %v3561_v53 = vpop.permute.xlu0 %3560 }
0x1140   :  { %4891 = vmatpush3.bf16.msra.mxu1 %v3567_v1  ;;  %v3559_v61 = vpop.permute.xlu1 %3558 }
0x1141   :  { %4892 = vmatprep.subr.bf16.mxu1 %v3565_v49 }
0x1142   :  { %v3557_v27 = vpop.permute.xlu0 %3556 }
0x1144   :  { %4893 = vmatpush3.bf16.msra.mxu1 %v3565_v49 }
0x1145   :  { %4894 = vmatprep.subr.bf16.mxu1 %v3563_v22 }
0x1148   :  { %4895 = vmatpush3.bf16.msra.mxu1 %v3563_v22 }
0x1149   :  { %4896 = vmatprep.subr.bf16.mxu1 %v3561_v53 }
0x114c   :  { %4897 = vmatpush3.bf16.msra.mxu1 %v3561_v53 }
0x114d   :  { %4898 = vmatprep.subr.bf16.mxu1 %v3559_v61 }
0x1150   :  { %4899 = vmatpush3.bf16.msra.mxu1 %v3559_v61 }
0x1151   :  { %4900 = vmatprep.subr.bf16.mxu1 %v3557_v27 }
0x1154   :  { %4901 = vmatpush3.bf16.msra.mxu1 %v3557_v27 }
0x11c0   :  { %v4872_v44 = vpop.f32.mrf.mxu0 }
0x11c1   :  { %v7643_v43 = vadd.f32 %v4872_v44, %v7640_v45 }
0x11c2   :  { %v3340_v59 = vpop.f32.mrf.mxu0 }
0x11c3   :  { %v3405_v21 = vmul.f32 %v7643_v43, %v7643_v43  ;;  %v7648_v38 = vadd.f32 %v3340_v59, %v7640_v45 }
0x11c4   :  { %v4873_v29 = vpop.f32.mrf.mxu0 }
0x11c5   :  { %v3421_v36 = vmul.f32 %v3405_v21, %v7643_v43  ;;  %v3403_v24 = vmul.f32 %v7648_v38, %v7648_v38  ;;  %v7654_v0 = vadd.f32 %v4873_v29, %v7640_v45 }
0x11c6   :  { %v3343_v52 = vpop.f32.mrf.mxu0 }
0x11c7   :  { %v3437_v34 = vmul.f32 0.044715, %v3421_v36  ;;  %v3419_v30 = vmul.f32 %v3403_v24, %v7648_v38  ;;  %v3406_v55 = vmul.f32 %v7654_v0, %v7654_v0  ;;  %v7660_v18 = vadd.f32 %v3343_v52, %v7640_v45 }
0x11c8   :  { %v4876_v10 = vpop.f32.mrf.mxu0 }
0x11c9   :  { %v3453_v31 = vadd.f32 %v3437_v34, %v7643_v43  ;;  %v3435_v20 = vmul.f32 0.044715, %v3419_v30  ;;  %v3422_v54 = vmul.f32 %v3406_v55, %v7654_v0  ;;  %v3404_v2 = vmul.f32 %v7660_v18, %v7660_v18 }
0x11ca   :  { %v7667_v14 = vadd.f32 %v4876_v10, %v7640_v45  ;;  %v3356_v12 = vpop.f32.mrf.mxu0 }
0x11cb   :  { %v3469_v9 = vmul.f32 0.7978846, %v3453_v31  ;;  %v3451_v3 = vadd.f32 %v3435_v20, %v7648_v38  ;;  %v3438_v6 = vmul.f32 0.044715, %v3422_v54  ;;  %v3420_v19 = vmul.f32 %v3404_v2, %v7660_v18 }
0x11cc   :  { %v3409_v63 = vmul.f32 %v7667_v14, %v7667_v14  ;;  %v7674_v17 = vadd.f32 %v3356_v12, %v7640_v45  ;;  %v4877_v40 = vpop.f32.mrf.mxu0 }
0x11cd   :  { %v3467_v46 = vmul.f32 0.7978846, %v3451_v3  ;;  %v3454_v37 = vadd.f32 %v3438_v6, %v7654_v0  ;;  %v3436_v4 = vmul.f32 0.044715, %v3420_v19  ;;  %5378 = vtanh.f32 %v3469_v9 }
0x11ce   :  { %v3425_v35 = vmul.f32 %v3409_v63, %v7667_v14  ;;  %v3407_v8 = vmul.f32 %v7674_v17, %v7674_v17  ;;  %v7681_v56 = vadd.f32 %v4877_v40, %v7640_v45  ;;  %v3359_v7 = vpop.f32.mrf.mxu0 }
0x11cf   :  { %5380 = vtanh.f32 %v3467_v46  ;;  %v3470_v48 = vmul.f32 0.7978846, %v3454_v37  ;;  %v3452_v60 = vadd.f32 %v3436_v4, %v7660_v18  ;;  %v7685_v13 = vadd.f32 %v3359_v7, %v7640_v45 }
0x11d0   :  { %v3441_v39 = vmul.f32 0.044715, %v3425_v35  ;;  %v3423_v23 = vmul.f32 %v3407_v8, %v7674_v17  ;;  %v3410_v33 = vmul.f32 %v7681_v56, %v7681_v56  ;;  %v4880_v1 = vpop.f32.mrf.mxu0 }
0x11d1   :  { %5382 = vtanh.f32 %v3470_v48  ;;  %v3468_v49 = vmul.f32 0.7978846, %v3452_v60  ;;  %v3408_v22 = vmul.f32 %v7685_v13, %v7685_v13  ;;  %v7693_v53 = vadd.f32 %v4880_v1, %v7640_v45 }
0x11d2   :  { %v3457_v61 = vadd.f32 %v3441_v39, %v7667_v14  ;;  %v3439_v27 = vmul.f32 0.044715, %v3423_v23  ;;  %v3426_v44 = vmul.f32 %v3410_v33, %v7681_v56  ;;  %v3372_v59 = vpop.f32.mrf.mxu0 }
0x11d3   :  { %5384 = vtanh.f32 %v3468_v49  ;;  %v3424_v21 = vmul.f32 %v3408_v22, %v7685_v13  ;;  %v3413_v29 = vmul.f32 %v7693_v53, %v7693_v53  ;;  %v7701_v36 = vadd.f32 %v3372_v59, %v7640_v45 }
0x11d4   :  { %v3473_v24 = vmul.f32 0.7978846, %v3457_v61  ;;  %v3455_v52 = vadd.f32 %v3439_v27, %v7674_v17  ;;  %v3442_v34 = vmul.f32 0.044715, %v3426_v44  ;;  %v4881_v30 = vpop.f32.mrf.mxu0 }
0x11d5   :  { %v3440_v55 = vmul.f32 0.044715, %v3424_v21  ;;  %v3429_v10 = vmul.f32 %v3413_v29, %v7693_v53  ;;  %v3411_v31 = vmul.f32 %v7701_v36, %v7701_v36  ;;  %v7708_v20 = vadd.f32 %v4881_v30, %v7640_v45 }
0x11d6   :  { %5386 = vtanh.f32 %v3473_v24  ;;  %v3471_v54 = vmul.f32 0.7978846, %v3455_v52  ;;  %v3458_v2 = vadd.f32 %v3442_v34, %v7681_v56  ;;  %v3375_v12 = vpop.f32.mrf.mxu0 }
0x11d7   :  { %v3456_v9 = vadd.f32 %v3440_v55, %v7685_v13  ;;  %v3445_v3 = vmul.f32 0.044715, %v3429_v10  ;;  %v3427_v6 = vmul.f32 %v3411_v31, %v7701_v36  ;;  %v3414_v19 = vmul.f32 %v7708_v20, %v7708_v20 }
0x11d8   :  { %5388 = vtanh.f32 %v3471_v54  ;;  %v3474_v63 = vmul.f32 0.7978846, %v3458_v2  ;;  %v7716_v40 = vadd.f32 %v3375_v12, %v7640_v45 }
0x11d9   :  { %v3472_v46 = vmul.f32 0.7978846, %v3456_v9  ;;  %v3461_v37 = vadd.f32 %v3445_v3, %v7693_v53  ;;  %v3443_v4 = vmul.f32 0.044715, %v3427_v6  ;;  %v3430_v35 = vmul.f32 %v3414_v19, %v7708_v20 }
0x11da   :  { %5390 = vtanh.f32 %v3474_v63  ;;  %v3412_v8 = vmul.f32 %v7716_v40, %v7716_v40  ;;  %v5379_v7 = vpop.eup %5378 }
0x11db   :  { %5392 = vtanh.f32 %v3472_v46  ;;  %v3477_v48 = vmul.f32 0.7978846, %v3461_v37  ;;  %v3459_v60 = vadd.f32 %v3443_v4, %v7701_v36  ;;  %v3446_v23 = vmul.f32 0.044715, %v3430_v35 }
0x11dc   :  { %v5381_v39 = vpop.eup %5380  ;;  %v3428_v33 = vmul.f32 %v3412_v8, %v7716_v40  ;;  %v3501_v61 = vadd.f32 1.0, %v5379_v7 }
0x11dd   :  { %v3475_v1 = vmul.f32 0.7978846, %v3459_v60  ;;  %v3499_v49 = vadd.f32 1.0, %v5381_v39  ;;  %5394 = vtanh.f32 %v3477_v48  ;;  %v3462_v27 = vadd.f32 %v3446_v23, %v7708_v20 }
0x11de   :  { %v5383_v22 = vpop.eup %5382  ;;  %v3444_v44 = vmul.f32 0.044715, %v3428_v33  ;;  %v3517_v55 = vmul.f32 0.5, %v3501_v61 }
0x11df   :  { %v3502_v59 = vadd.f32 1.0, %v5383_v22  ;;  %5396 = vtanh.f32 %v3475_v1  ;;  %v3478_v29 = vmul.f32 0.7978846, %v3462_v27  ;;  %v3515_v30 = vmul.f32 0.5, %v3499_v49 }
0x11e0   :  { %v5385_v21 = vpop.eup %5384  ;;  %v3460_v24 = vadd.f32 %v3444_v44, %v7716_v40  ;;  %v3533_v6 = vmul.f32 %v3517_v55, %v7643_v43 }
0x11e1   :  { %v3518_v52 = vmul.f32 0.5, %v3502_v59  ;;  %v3500_v34 = vadd.f32 1.0, %v5385_v21  ;;  %5398 = vtanh.f32 %v3478_v29  ;;  %v3531_v9 = vmul.f32 %v3515_v30, %v7648_v38 }
0x11e2   :  { %v3476_v10 = vmul.f32 0.7978846, %v3460_v24 }
0x11e3   :  { %v5387_v31 = vpop.eup %5386  ;;  %v3516_v54 = vmul.f32 0.5, %v3500_v34  ;;  %v3534_v2 = vmul.f32 %v3518_v52, %v7654_v0 }
0x11e4   :  { %5400 = vtanh.f32 %v3476_v10  ;;  %v3505_v19 = vadd.f32 1.0, %v5387_v31 }
0x11e5   :  { %v5389_v12 = vpop.eup %5388  ;;  %v3532_v3 = vmul.f32 %v3516_v54, %v7660_v18  ;;  %v3548_v35 = vpack.c.bf16 %v3534_v2, %v3533_v6 }
0x11e6   :  { %v3503_v63 = vadd.f32 1.0, %v5389_v12  ;;  %v3521_v60 = vmul.f32 0.5, %v3505_v19 }
0x11e7   :  { %v5391_v46 = vpop.eup %5390  ;;  %v3547_v37 = vpack.c.bf16 %v3532_v3, %v3531_v9 }
0x11e8   :  { %v5393_v4 = vpop.eup %5392  ;;  %v3506_v8 = vadd.f32 1.0, %v5391_v46  ;;  %v3519_v48 = vmul.f32 0.5, %v3503_v63  ;;  %v3537_v1 = vmul.f32 %v3521_v60, %v7667_v14 }
0x11e9   :  { %4902 = vmatprep.mubr.bf16.mxu1 %v3547_v37  ;;  %v3504_v7 = vadd.f32 1.0, %v5393_v4 }
0x11ea   :  { %v3522_v0 = vmul.f32 0.5, %v3506_v8  ;;  %4903 = vmatmul.mubr.bf16.vlgmr.msra.gmra.mxu1 %v3548_v35  ;;  %v5395_v39 = vpop.eup %5394  ;;  %v3535_v43 = vmul.f32 %v3519_v48, %v7674_v17 }
0x11eb   :  { %v3520_v23 = vmul.f32 0.5, %v3504_v7  ;;  %v3509_v61 = vadd.f32 1.0, %v5395_v39 }
0x11ec   :  { %v5397_v38 = vpop.eup %5396  ;;  %v3538_v18 = vmul.f32 %v3522_v0, %v7681_v56 }
0x11ed   :  { %v3536_v33 = vmul.f32 %v3520_v23, %v7685_v13  ;;  %v3507_v49 = vadd.f32 1.0, %v5397_v38  ;;  %v3525_v34 = vmul.f32 0.5, %v3509_v61 }
0x11ee   :  { %v5399_v22 = vpop.eup %5398  ;;  %v3550_v59 = vpack.c.bf16 %v3538_v18, %v3537_v1 }
0x11ef   :  { %v3549_v27 = vpack.c.bf16 %v3536_v33, %v3535_v43  ;;  %v3510_v44 = vadd.f32 1.0, %v5399_v22  ;;  %v3523_v52 = vmul.f32 0.5, %v3507_v49  ;;  %v3541_v30 = vmul.f32 %v3525_v34, %v7693_v53 }
0x11f1   :  { %v5401_v21 = vpop.eup %5400  ;;  %4906 = vmatprep.mubr.bf16.mxu1 %v3549_v27  ;;  %v3526_v29 = vmul.f32 0.5, %v3510_v44  ;;  %v3539_v13 = vmul.f32 %v3523_v52, %v7701_v36 }
0x11f2   :  { %4907 = vmatmul.mubr.bf16.gmra.mxu1 %v3550_v59  ;;  %v3508_v24 = vadd.f32 1.0, %v5401_v21 }
0x11f3   :  { %v3542_v17 = vmul.f32 %v3526_v29, %v7708_v20 }
0x11f4   :  { %v3524_v56 = vmul.f32 0.5, %v3508_v24 }
0x11f5   :  { %v3552_v10 = vpack.c.bf16 %v3542_v17, %v3541_v30 }
0x11f6   :  { %v3540_v14 = vmul.f32 %v3524_v56, %v7716_v40 }
0x11f8   :  { %v3551_v55 = vpack.c.bf16 %v3540_v14, %v3539_v13 }
0x11fa   :  { %4910 = vmatprep.mubr.bf16.mxu1 %v3551_v55 }
0x11fb   :  { %4911 = vmatmul.mubr.bf16.gmra.mxu1 %v3552_v10 }
0x11fe   :  { %v4884_v31 = vpop.f32.mrf.mxu0 }
0x11ff   :  { %v3397_v54 = vadd.f32 %v4884_v31, %v7640_v45 }
0x1200   :  { %v3388_v2 = vpop.f32.mrf.mxu0 }
0x1201   :  { %v3417_v12 = vmul.f32 %v3397_v54, %v3397_v54  ;;  %v3389_v9 = vadd.f32 %v3388_v2, %v7640_v45 }
0x1202   :  { %v4885_v3 = vpop.f32.mrf.mxu0 }
0x1203   :  { %v3433_v6 = vmul.f32 %v3417_v12, %v3397_v54  ;;  %v3415_v20 = vmul.f32 %v3389_v9, %v3389_v9  ;;  %v3400_v36 = vadd.f32 %v4885_v3, %v7640_v45 }
0x1204   :  { %v3391_v19 = vpop.f32.mrf.mxu0 }
0x1205   :  { %v3449_v40 = vmul.f32 0.044715, %v3433_v6  ;;  %v3431_v63 = vmul.f32 %v3415_v20, %v3389_v9  ;;  %v3418_v53 = vmul.f32 %v3400_v36, %v3400_v36  ;;  %v3392_v46 = vadd.f32 %v3391_v19, %v7640_v45 }
0x1207   :  { %v3465_v37 = vadd.f32 %v3449_v40, %v3397_v54  ;;  %v3447_v4 = vmul.f32 0.044715, %v3431_v63  ;;  %v3434_v35 = vmul.f32 %v3418_v53, %v3400_v36  ;;  %v3416_v8 = vmul.f32 %v3392_v46, %v3392_v46 }
0x1209   :  { %v3481_v7 = vmul.f32 0.7978846, %v3465_v37  ;;  %v3463_v48 = vadd.f32 %v3447_v4, %v3389_v9  ;;  %v3450_v60 = vmul.f32 0.044715, %v3434_v35  ;;  %v3432_v0 = vmul.f32 %v3416_v8, %v3392_v46 }
0x120b   :  { %v3479_v39 = vmul.f32 0.7978846, %v3463_v48  ;;  %v3466_v23 = vadd.f32 %v3450_v60, %v3400_v36  ;;  %v3448_v38 = vmul.f32 0.044715, %v3432_v0  ;;  %5402 = vtanh.f32 %v3481_v7 }
0x120d   :  { %5404 = vtanh.f32 %v3479_v39  ;;  %v3482_v18 = vmul.f32 0.7978846, %v3466_v23  ;;  %v3464_v43 = vadd.f32 %v3448_v38, %v3392_v46 }
0x120f   :  { %5406 = vtanh.f32 %v3482_v18  ;;  %v3480_v33 = vmul.f32 0.7978846, %v3464_v43 }
0x1211   :  { %5408 = vtanh.f32 %v3480_v33 }
0x1218   :  { %v5403_v1 = vpop.eup %5402 }
0x1219   :  { %v3513_v61 = vadd.f32 1.0, %v5403_v1 }
0x121a   :  { %v5405_v45 = vpop.eup %5404 }
0x121b   :  { %v3511_v49 = vadd.f32 1.0, %v5405_v45  ;;  %v3529_v24 = vmul.f32 0.5, %v3513_v61 }
0x121c   :  { %v5407_v22 = vpop.eup %5406 }
0x121d   :  { %v3514_v27 = vadd.f32 1.0, %v5407_v22  ;;  %v3527_v29 = vmul.f32 0.5, %v3511_v49  ;;  %v3545_v13 = vmul.f32 %v3529_v24, %v3397_v54  ;;  %v3555_v54 = vld [vmem:[%s8076_s6 + $0x7] ss:$0 sm:$0xff] }
0x121e   :  { %v5409_v44 = vpop.eup %5408 }
0x121f   :  { %v3530_v59 = vmul.f32 0.5, %v3514_v27  ;;  %v3512_v21 = vadd.f32 1.0, %v5409_v44  ;;  %v3543_v56 = vmul.f32 %v3527_v29, %v3389_v9 }
0x1221   :  { %v3528_v52 = vmul.f32 0.5, %v3512_v21  ;;  %v3546_v34 = vmul.f32 %v3530_v59, %v3400_v36 }
0x1223   :  { %v3544_v17 = vmul.f32 %v3528_v52, %v3392_v46  ;;  %v3554_v30 = vpack.c.bf16 %v3546_v34, %v3545_v13 }
0x1225   :  { %v3553_v14 = vpack.c.bf16 %v3544_v17, %v3543_v56 }
0x1227   :  { %4914 = vmatprep.mubr.bf16.mxu1 %v3553_v14 }
0x1228   :  { %4915 = vmatmul.mubr.bf16.gmra.mxu1 %v3554_v30 }
0x12aa   :  { %v4904_v55 = vpop.f32.mrf.mxu1 }
0x12ab   :  { %v3623_v52 = vadd.f32 %v4904_v55, %v3555_v54 }
0x12ac   :  { %v7742_v10 = vpop.f32.mrf.mxu1 }
0x12ad   :  { %v7809_v13 = vadd.f32 %v3623_v52, %v7555_v15  ;;  %v3615_v14 = vadd.f32 %v7742_v10, %v3555_v54 }
0x12ae   :  { %v4905_v31 = vpop.f32.mrf.mxu1 }
0x12af   :  { %v3626_v29 = vadd.f32 %v4905_v31, %v3555_v54  ;;  %v7820_v55 = vadd.f32 %v3615_v14, %v7538_v42  ;;  %v3701_v15 = vsel %vm312_vm8, %v7809_v13, 0.0 }
0x12b0   :  { %v3617_v2 = vpop.f32.mrf.mxu1 }
0x12b1   :  { %v7804_v56 = vadd.f32 %v3626_v29, %v7551_v5  ;;  %v3618_v17 = vadd.f32 %v3617_v2, %v3555_v54  ;;  %v3695_v31 = vsel %vm312_vm8, %v7820_v55, 0.0 }
0x12b2   :  { %v4908_v12 = vpop.f32.mrf.mxu1 }
0x12b3   :  { %v3639_v22 = vadd.f32 %v4908_v12, %v3555_v54  ;;  %v7815_v30 = vadd.f32 %v3618_v17, %v7542_v47  ;;  %v3704_v5 = vsel %vm312_vm8, %v7804_v56, 0.0 }
0x12b4   :  { %v3630_v3 = vpop.f32.mrf.mxu1 }
0x12b5   :  { %v7789_v59 = vadd.f32 %v3639_v22, %v7581_v32  ;;  %v3631_v21 = vadd.f32 %v3630_v3, %v3555_v54  ;;  %v3698_v10 = vsel %vm312_vm8, %v7815_v30, 0.0 }
0x12b6   :  { %v4909_v6 = vpop.f32.mrf.mxu1 }
0x12b7   :  { %v3642_v45 = vadd.f32 %v4909_v6, %v3555_v54  ;;  %v7799_v34 = vadd.f32 %v3631_v21, %v7568_v50  ;;  %v3713_v32 = vsel %vm312_vm8, %v7789_v59, 0.0 }
0x12b8   :  { %v3633_v20 = vpop.f32.mrf.mxu1 }
0x12b9   :  { %v7784_v27 = vadd.f32 %v3642_v45, %v7576_v28  ;;  %v3634_v44 = vadd.f32 %v3633_v20, %v3555_v54  ;;  %v3707_v50 = vsel %vm312_vm8, %v7799_v34, 0.0 }
0x12bb   :  { %v4912_v19 = vpop.f32.mrf.mxu1  ;;  %v7794_v24 = vadd.f32 %v3634_v44, %v7563_v51  ;;  %v3716_v28 = vsel %vm312_vm8, %v7784_v27, 0.0 }
0x12bc   :  { %v3655_v23 = vadd.f32 %v4912_v19, %v3555_v54 }
0x12bd   :  { %v3646_v40 = vpop.f32.mrf.mxu1  ;;  %v3710_v51 = vsel %vm312_vm8, %v7794_v24, 0.0 }
0x12be   :  { %v7769_v1 = vadd.f32 %v3655_v23, %v7606_v57 }
0x12bf   :  { %v4913_v63 = vpop.f32.mrf.mxu1 }
0x12c0   :  { %v3658_v60 = vadd.f32 %v4913_v63, %v3555_v54  ;;  %v3725_v57 = vsel %vm312_vm8, %v7769_v1, 0.0 }
0x12c1   :  { %v3649_v36 = vpop.f32.mrf.mxu1 }
0x12c2   :  { %v7764_v43 = vadd.f32 %v3658_v60, %v7602_v58  ;;  %v3650_v33 = vadd.f32 %v3649_v36, %v3555_v54 }
0x12c4   :  { %v7774_v49 = vadd.f32 %v3650_v33, %v7589_v62  ;;  %v3728_v58 = vsel %vm312_vm8, %v7764_v43, 0.0 }
0x12c6   :  { %v3722_v62 = vsel %vm312_vm8, %v7774_v49, 0.0 }
0x12e8   :  { %v4916_v9 = vpop.f32.mrf.mxu1 }
0x12e9   :  { %v3671_v53 = vadd.f32 %v4916_v9, %v3555_v54 }
0x12ea   :  { %v3662_v46 = vpop.f32.mrf.mxu1 }
0x12eb   :  { %v7748_v37 = vadd.f32 %v3671_v53, %v7629_v16  ;;  %v3663_v35 = vadd.f32 %v3662_v46, %v3555_v54 }
0x12ec   :  { %v4917_v4 = vpop.f32.mrf.mxu1 }
0x12ed   :  { %v3674_v8 = vadd.f32 %v4917_v4, %v3555_v54  ;;  %v3737_v7 = vsel %vm312_vm8, %v7748_v37, 0.0  ;;  %v7756_v38 = vadd.f32 %v3663_v35, %v7617_v41  ;;  %v3647_v41 = vadd.f32 %v3646_v40, %v3555_v54 }
0x12ee   :  { %3738 = vadd.xlane.f32.xlu1 %v3737_v7  ;;  %v3665_v48 = vpop.f32.mrf.mxu1 }
0x12ef   :  { %v7753_v0 = vadd.f32 %v3674_v8, %v7632_v11  ;;  %v3666_v39 = vadd.f32 %v3665_v48, %v3555_v54  ;;  %v7779_v61 = vadd.f32 %v3647_v41, %v7594_v25 }
0x12f1   :  { %v7759_v16 = vadd.f32 %v3666_v39, %v7620_v26  ;;  %v3740_v18 = vsel %vm312_vm8, %v7753_v0, 0.0  ;;  %v3731_v26 = vsel %vm312_vm8, %v7756_v38, 0.0  ;;  %v3719_v25 = vsel %vm312_vm8, %v7779_v61, 0.0 }
0x12f2   :  { %3741 = vadd.xlane.f32.xlu0 %v3740_v18 }
0x12f3   :  { %v3734_v11 = vsel %vm312_vm8, %v7759_v16, 0.0 }
0x12f4   :  { %3735 = vadd.xlane.f32.xlu1 %v3734_v11 }
0x12f6   :  { %3732 = vadd.xlane.f32.xlu0 %v3731_v26 }
0x12f8   :  { %3729 = vadd.xlane.f32.xlu1 %v3728_v58 }
0x12fa   :  { %3726 = vadd.xlane.f32.xlu0 %v3725_v57 }
0x12fc   :  { %3723 = vadd.xlane.f32.xlu1 %v3722_v62 }
0x12fe   :  { %3720 = vadd.xlane.f32.xlu0 %v3719_v25 }
0x1300   :  { %3717 = vadd.xlane.f32.xlu1 %v3716_v28 }
0x1302   :  { %3714 = vadd.xlane.f32.xlu0 %v3713_v32 }
0x1304   :  { %3711 = vadd.xlane.f32.xlu1 %v3710_v51 }
0x1306   :  { %3708 = vadd.xlane.f32.xlu0 %v3707_v50 }
0x1308   :  { %3705 = vadd.xlane.f32.xlu1 %v3704_v5 }
0x130a   :  { %3702 = vadd.xlane.f32.xlu0 %v3701_v15 }
0x130c   :  { %3699 = vadd.xlane.f32.xlu1 %v3698_v10 }
0x130e   :  { %3696 = vadd.xlane.f32.xlu0 %v3695_v31 }
0x1377   :  { %v3739_v47 = vpop.xlane.xlu1 %3738 }
0x1378   :  { %v3757_v2 = vmul.f32 0.015625, %v3739_v47 }
0x137a   :  { %v7829_v12 = vsub.f32 %v7748_v37, %v3757_v2 }
0x137b   :  { %v3742_v3 = vpop.xlane.xlu0 %3741 }
0x137c   :  { %v3758_v42 = vmul.f32 0.015625, %v3742_v3  ;;  %v3789_v6 = vmul.f32 %v7829_v12, %v7829_v12 }
0x137d   :  { %v3736_v20 = vpop.xlane.xlu1 %3735 }
0x137e   :  { %v7834_v19 = vsub.f32 %v7753_v0, %v3758_v42  ;;  %v3756_v40 = vmul.f32 0.015625, %v3736_v20  ;;  %v3833_v63 = vsel %vm312_vm8, %v3789_v6, 0.0 }
0x137f   :  { %v3733_v36 = vpop.xlane.xlu0 %3732  ;;  %3834 = vadd.xlane.f32.xlu0 %v3833_v63 }
0x1380   :  { %v7838_v54 = vsub.f32 %v7759_v16, %v3756_v40  ;;  %v3755_v9 = vmul.f32 0.015625, %v3733_v36  ;;  %v3790_v53 = vmul.f32 %v7834_v19, %v7834_v19 }
0x1381   :  { %v3730_v46 = vpop.xlane.xlu1 %3729 }
0x1382   :  { %v7843_v37 = vsub.f32 %v7756_v38, %v3755_v9  ;;  %v3754_v4 = vmul.f32 0.015625, %v3730_v46  ;;  %v3836_v35 = vsel %vm312_vm8, %v3790_v53, 0.0  ;;  %v3788_v8 = vmul.f32 %v7838_v54, %v7838_v54 }
0x1383   :  { %v3727_v7 = vpop.xlane.xlu0 %3726  ;;  %3837 = vadd.xlane.f32.xlu1 %v3836_v35 }
0x1384   :  { %v7849_v48 = vsub.f32 %v7764_v43, %v3754_v4  ;;  %v3753_v60 = vmul.f32 0.015625, %v3727_v7  ;;  %v3787_v0 = vmul.f32 %v7843_v37, %v7843_v37  ;;  %v3830_v23 = vsel %vm312_vm8, %v3788_v8, 0.0 }
0x1385   :  { %v3724_v39 = vpop.xlane.xlu1 %3723 }
0x1386   :  { %v7855_v38 = vsub.f32 %v7769_v1, %v3753_v60  ;;  %v3752_v16 = vmul.f32 0.015625, %v3724_v39  ;;  %v3827_v18 = vsel %vm312_vm8, %v3787_v0, 0.0  ;;  %v3786_v33 = vmul.f32 %v7849_v48, %v7849_v48  ;;  %v5042_v0 = vld [vmem:[%s8075_s4 + $0x84] ss:$20 sps:$4 sm:$0xff]   ;;  %v5043_v39 = vld [vmem:[%s8075_s4 + $0x5c] ss:$20 sps:$4 sm:$0xff]  }
0x1387   :  { %v3721_v11 = vpop.xlane.xlu0 %3720  ;;  %3831 = vadd.xlane.f32.xlu1 %v3830_v23  ;;  %3828 = vadd.xlane.f32.xlu0 %v3827_v18  ;;  %v5044_v23 = vld [vmem:[%s8075_s4 + $0x34] ss:$20 sps:$4 sm:$0xff]  }
0x1388   :  { %v7861_v43 = vsub.f32 %v7774_v49, %v3752_v16  ;;  %v3751_v41 = vmul.f32 0.015625, %v3721_v11  ;;  %v3785_v26 = vmul.f32 %v7855_v38, %v7855_v38  ;;  %v3824_v1 = vsel %vm312_vm8, %v3786_v33, 0.0 }
0x1389   :  { %v3718_v45 = vpop.xlane.xlu1 %3717 }
0x138a   :  { %v7867_v58 = vsub.f32 %v7779_v61, %v3751_v41  ;;  %v3750_v22 = vmul.f32 0.015625, %v3718_v45  ;;  %v3821_v57 = vsel %vm312_vm8, %v3785_v26, 0.0  ;;  %v3784_v44 = vmul.f32 %v7861_v43, %v7861_v43 }
0x138b   :  { %v3715_v62 = vpop.xlane.xlu0 %3714  ;;  %3825 = vadd.xlane.f32.xlu1 %v3824_v1  ;;  %3822 = vadd.xlane.f32.xlu0 %v3821_v57 }
0x138c   :  { %v7873_v49 = vsub.f32 %v7784_v27, %v3750_v22  ;;  %v3749_v21 = vmul.f32 0.015625, %v3715_v62  ;;  %v3783_v25 = vmul.f32 %v7867_v58, %v7867_v58  ;;  %v3818_v61 = vsel %vm312_vm8, %v3784_v44, 0.0 }
0x138d   :  { %v3712_v29 = vpop.xlane.xlu1 %3711 }
0x138e   :  { %v7879_v28 = vsub.f32 %v7789_v59, %v3749_v21  ;;  %v3748_v52 = vmul.f32 0.015625, %v3712_v29  ;;  %v3815_v32 = vsel %vm312_vm8, %v3783_v25, 0.0  ;;  %v3782_v17 = vmul.f32 %v7873_v49, %v7873_v49 }
0x138f   :  { %v3709_v51 = vpop.xlane.xlu0 %3708  ;;  %3819 = vadd.xlane.f32.xlu1 %v3818_v61  ;;  %3816 = vadd.xlane.f32.xlu0 %v3815_v32 }
0x1390   :  { %v7885_v27 = vsub.f32 %v7794_v24, %v3748_v52  ;;  %v3747_v14 = vmul.f32 0.015625, %v3709_v51  ;;  %v3781_v50 = vmul.f32 %v7879_v28, %v7879_v28  ;;  %v3812_v59 = vsel %vm312_vm8, %v3782_v17, 0.0 }
0x1391   :  { %v3706_v5 = vpop.xlane.xlu1 %3705 }
0x1392   :  { %v7891_v15 = vsub.f32 %v7799_v34, %v3747_v14  ;;  %v3746_v10 = vmul.f32 0.015625, %v3706_v5  ;;  %v3809_v31 = vsel %vm312_vm8, %v3781_v50, 0.0  ;;  %v3780_v47 = vmul.f32 %v7885_v27, %v7885_v27 }
0x1393   :  { %v3703_v2 = vpop.xlane.xlu0 %3702  ;;  %3813 = vadd.xlane.f32.xlu1 %v3812_v59  ;;  %3810 = vadd.xlane.f32.xlu0 %v3809_v31  ;;  %v7945_v31 = vld [vmem:[%s8076_s6 + $0x10] ss:$0 sm:$0xff] }
0x1394   :  { %v7897_v24 = vsub.f32 %v7804_v56, %v3746_v10  ;;  %v3745_v3 = vmul.f32 0.015625, %v3703_v2  ;;  %v3779_v42 = vmul.f32 %v7891_v15, %v7891_v15  ;;  %v3806_v34 = vsel %vm312_vm8, %v3780_v47, 0.0 }
0x1395   :  { %v3700_v6 = vpop.xlane.xlu1 %3699 }
0x1396   :  { %v7903_v20 = vsub.f32 %v7809_v13, %v3745_v3  ;;  %v3744_v40 = vmul.f32 0.015625, %v3700_v6  ;;  %v3803_v63 = vsel %vm312_vm8, %v3779_v42, 0.0  ;;  %v3778_v36 = vmul.f32 %v7897_v24, %v7897_v24 }
0x1397   :  { %3807 = vadd.xlane.f32.xlu1 %v3806_v34  ;;  %3804 = vadd.xlane.f32.xlu0 %v3803_v63  ;;  %v3697_v56 = vpop.xlane.xlu0 %3696 }
0x1398   :  { %v7909_v9 = vsub.f32 %v7815_v30, %v3744_v40  ;;  %v3743_v53 = vmul.f32 0.015625, %v3697_v56  ;;  %v3777_v46 = vmul.f32 %v7903_v20, %v7903_v20  ;;  %v3800_v13 = vsel %vm312_vm8, %v3778_v36, 0.0  ;;  %v7952_v56 = vld [vmem:[%s8076_s6 + $0x11] ss:$0 sm:$0xff] }
0x139a   :  { %v7914_v4 = vsub.f32 %v7820_v55, %v3743_v53  ;;  %v3797_v35 = vsel %vm312_vm8, %v3777_v46, 0.0  ;;  %v3776_v8 = vmul.f32 %v7909_v9, %v7909_v9  ;;  %v5462_v55 = vmov 0.0  }
0x139b   :  { %3801 = vadd.xlane.f32.xlu1 %v3800_v13  ;;  %3798 = vadd.xlane.f32.xlu0 %v3797_v35 }
0x139c   :  { %v3775_v30 = vmul.f32 %v7914_v4, %v7914_v4  ;;  %v3794_v7 = vsel %vm312_vm8, %v3776_v8, 0.0  ;;  %4918 = vmatprep.subr.bf16.mxu1 %v5462_v55  ;;  %4938 = vmatprep.subr.bf16.mxu0 %v5462_v55 }
0x139d   :  { %4934 = vmatprep.mubr.msk.bf16.mxu1 %vm5463_vm9, %v5462_v55  ;;  %4946 = vmatprep.mubr.msk.bf16.mxu0 %vm5463_vm9, %v5462_v55 }
0x139e   :  { %v3791_v60 = vsel %vm312_vm8, %v3775_v30, 0.0  ;;  %4939 = vmatpush3.bf16.msra.mxu0 %v5042_v0 }
0x139f   :  { %3795 = vadd.xlane.f32.xlu1 %v3794_v7  ;;  %3792 = vadd.xlane.f32.xlu0 %v3791_v60 }
0x13a0   :  { %4940 = vmatprep.subr.bf16.mxu0 %v5462_v55 }
0x13a2   :  { %4941 = vmatpush3.bf16.msra.mxu0 %v5043_v39 }
0x13a3   :  { %4942 = vmatprep.subr.bf16.mxu0 %v5462_v55 }
0x13a6   :  { %4943 = vmatpush3.bf16.msra.mxu0 %v5044_v23 }
0x13a7   :  { %4944 = vmatprep.subr.bf16.mxu0 %v5462_v55 }
0x1408   :  { %v3835_v16 = vpop.xlane.xlu0 %3834 }
0x1409   :  { %v3853_v18 = vmul.f32 0.015625, %v3835_v16 }
0x140b   :  { %v3869_v33 = vadd.f32 1e-12, %v3853_v18 }
0x140c   :  { %v3838_v11 = vpop.xlane.xlu1 %3837 }
0x140d   :  { %5410 = vrsqrt.f32 %v3869_v33  ;;  %v3854_v41 = vmul.f32 0.015625, %v3838_v11 }
0x140f   :  { %v3870_v26 = vadd.f32 1e-12, %v3854_v41 }
0x1410   :  { %v3832_v45 = vpop.xlane.xlu1 %3831  ;;  %v3829_v1 = vpop.xlane.xlu0 %3828 }
0x1411   :  { %5412 = vrsqrt.f32 %v3870_v26  ;;  %v3852_v22 = vmul.f32 0.015625, %v3832_v45  ;;  %v3851_v57 = vmul.f32 0.015625, %v3829_v1 }
0x1413   :  { %v3868_v44 = vadd.f32 1e-12, %v3852_v22  ;;  %v3867_v62 = vadd.f32 1e-12, %v3851_v57 }
0x1414   :  { %v3826_v21 = vpop.xlane.xlu1 %3825  ;;  %v3823_v25 = vpop.xlane.xlu0 %3822 }
0x1415   :  { %5414 = vrsqrt.f32 %v3868_v44  ;;  %v3850_v29 = vmul.f32 0.015625, %v3826_v21  ;;  %v3849_v61 = vmul.f32 0.015625, %v3823_v25 }
0x1416   :  { %5416 = vrsqrt.f32 %v3867_v62 }
0x1417   :  { %v3866_v52 = vadd.f32 1e-12, %v3850_v29  ;;  %v3865_v32 = vadd.f32 1e-12, %v3849_v61 }
0x1418   :  { %v3820_v17 = vpop.xlane.xlu1 %3819  ;;  %v3817_v51 = vpop.xlane.xlu0 %3816 }
0x1419   :  { %5418 = vrsqrt.f32 %v3866_v52  ;;  %v3848_v14 = vmul.f32 0.015625, %v3820_v17  ;;  %v3847_v50 = vmul.f32 0.015625, %v3817_v51 }
0x141a   :  { %v5411_v5 = vpop.eup %5410  ;;  %5420 = vrsqrt.f32 %v3865_v32 }
0x141b   :  { %v3864_v59 = vadd.f32 1e-12, %v3848_v14  ;;  %v3863_v10 = vadd.f32 1e-12, %v3847_v50  ;;  %v3901_v47 = vmul.f32 %v5411_v5, %v7829_v12 }
0x141c   :  { %v3814_v2 = vpop.xlane.xlu1 %3813  ;;  %v3811_v3 = vpop.xlane.xlu0 %3810 }
0x141d   :  { %5422 = vrsqrt.f32 %v3864_v59  ;;  %v3846_v42 = vmul.f32 0.015625, %v3814_v2  ;;  %v3845_v6 = vmul.f32 0.015625, %v3811_v3  ;;  %v3917_v40 = vmul.f32 %v3901_v47, %v7945_v31 }
0x141e   :  { %v5413_v34 = vpop.eup %5412  ;;  %5424 = vrsqrt.f32 %v3863_v10 }
0x141f   :  { %v3862_v63 = vadd.f32 1e-12, %v3846_v42  ;;  %v3861_v36 = vadd.f32 1e-12, %v3845_v6  ;;  %v3902_v53 = vmul.f32 %v5413_v34, %v7834_v19  ;;  %v3933_v7 = vadd.f32 %v3917_v40, %v7952_v56 }
0x1420   :  { %v3808_v46 = vpop.xlane.xlu1 %3807  ;;  %v3805_v12 = vpop.xlane.xlu0 %3804 }
0x1421   :  { %5426 = vrsqrt.f32 %v3862_v63  ;;  %v3844_v13 = vmul.f32 0.015625, %v3808_v46  ;;  %v3843_v35 = vmul.f32 0.015625, %v3805_v12  ;;  %v3918_v8 = vmul.f32 %v3902_v53, %v7945_v31 }
0x1422   :  { %v5415_v30 = vpop.eup %5414  ;;  %5428 = vrsqrt.f32 %v3861_v36 }
0x1423   :  { %v5417_v60 = vpop.eup %5416  ;;  %v3860_v0 = vadd.f32 1e-12, %v3844_v13  ;;  %v3859_v39 = vadd.f32 1e-12, %v3843_v35  ;;  %v3934_v23 = vadd.f32 %v3918_v8, %v7952_v56  ;;  %v3900_v16 = vmul.f32 %v5415_v30, %v7838_v54 }
0x1424   :  { %v3802_v18 = vpop.xlane.xlu1 %3801  ;;  %v3799_v19 = vpop.xlane.xlu0 %3798  ;;  %v3899_v33 = vmul.f32 %v5417_v60, %v7843_v37 }
0x1425   :  { %5430 = vrsqrt.f32 %v3860_v0  ;;  %v3842_v11 = vmul.f32 0.015625, %v3802_v18  ;;  %v3841_v41 = vmul.f32 0.015625, %v3799_v19  ;;  %v3946_v26 = vpack.c.bf16 %v3934_v23, %v3933_v7 }
0x1426   :  { %v5419_v45 = vpop.eup %5418  ;;  %5432 = vrsqrt.f32 %v3859_v39  ;;  %v3915_v1 = vmul.f32 %v3899_v33, %v7945_v31  ;;  %v3916_v22 = vmul.f32 %v3900_v16, %v7945_v31 }
0x1427   :  { %v5421_v57 = vpop.eup %5420  ;;  %v3858_v44 = vadd.f32 1e-12, %v3842_v11  ;;  %v3857_v62 = vadd.f32 1e-12, %v3841_v41  ;;  %4919 = vmatpush3.bf16.msra.mxu1 %v3946_v26  ;;  %v3898_v54 = vmul.f32 %v5419_v45, %v7849_v48 }
0x1428   :  { %v3796_v21 = vpop.xlane.xlu1 %3795  ;;  %v3793_v25 = vpop.xlane.xlu0 %3792  ;;  %4920 = vmatprep.subr.bf16.mxu1 %v5462_v55  ;;  %v3931_v37 = vadd.f32 %v3915_v1, %v7952_v56  ;;  %v3932_v29 = vadd.f32 %v3916_v22, %v7952_v56  ;;  %v3897_v61 = vmul.f32 %v5421_v57, %v7855_v38  ;;  %v8250_v57 = vld [vmem:[#allocation19_spill] sm:$0xff] }
0x1429   :  { %5434 = vrsqrt.f32 %v3858_v44  ;;  %v3840_v52 = vmul.f32 0.015625, %v3796_v21  ;;  %v3839_v32 = vmul.f32 0.015625, %v3793_v25  ;;  %v3914_v17 = vmul.f32 %v3898_v54, %v7945_v31 }
0x142a   :  { %v5423_v51 = vpop.eup %5422  ;;  %5436 = vrsqrt.f32 %v3857_v62  ;;  %v3945_v14 = vpack.c.bf16 %v3932_v29, %v3931_v37  ;;  %v3913_v48 = vmul.f32 %v3897_v61, %v7945_v31  ;;  %v3935_v44 = vmul.u32 16, %v8250_v57 }
0x142b   :  { %v5425_v50 = vpop.eup %5424  ;;  %v3856_v5 = vadd.f32 1e-12, %v3840_v52  ;;  %v3855_v59 = vadd.f32 1e-12, %v3839_v32  ;;  %v3930_v10 = vadd.f32 %v3914_v17, %v7952_v56  ;;  %v3896_v47 = vmul.f32 %v5423_v51, %v7861_v43  ;;  %v5046_v17 = vld [vmem:[%s8075_s4 + $0x88] ss:$20 sps:$4 sm:$0xff]  }
0x142c   :  { %4921 = vmatpush3.bf16.msra.mxu1 %v3945_v14  ;;  %v3929_v38 = vadd.f32 %v3913_v48, %v7952_v56  ;;  %v3895_v2 = vmul.f32 %v5425_v50, %v7867_v58  ;;  %v5048_v51 = vld [vmem:[%s8075_s4 + $0x84] ss:$20 sps:$4 sm:$0xff]   ;;  %4172 = vrot.lane.b32.xlu1 %v5046_v17, %s5454_s30  ;;  %v5049_v14 = vld [vmem:[%s8075_s4 + $0x5c] ss:$20 sps:$4 sm:$0xff]   ;;  %v5051_v48 = vld [vmem:[%s8075_s4 + $0x60] ss:$20 sps:$4 sm:$0xff]  }
0x142d   :  { %5438 = vrsqrt.f32 %v3856_v5  ;;  %4922 = vmatprep.subr.bf16.mxu1 %v5462_v55  ;;  %v3912_v3 = vmul.f32 %v3896_v47, %v7945_v31  ;;  %4170 = vrot.lane.b32.xlu0 %v5048_v51, %s5454_s30  ;;  %v5052_v50 = vld [vmem:[%s8075_s4 + $0x34] ss:$20 sps:$4 sm:$0xff]   ;;  %v5054_v5 = vld [vmem:[%s8075_s4 + $0x38] ss:$20 sps:$4 sm:$0xff]   ;;  %v3996_v47 = vld [vmem:[%s8076_s6 + $0x12] ss:$0 sm:$0xff] }
0x142e   :  { %v5427_v42 = vpop.eup %5426  ;;  %5440 = vrsqrt.f32 %v3855_v59  ;;  %v3944_v6 = vpack.c.bf16 %v3930_v10, %v3929_v38  ;;  %v3911_v34 = vmul.f32 %v3895_v2, %v7945_v31  ;;  %v5055_v59 = vld [vmem:[%s8075_s4 + $0xc] ss:$20 sps:$4 sm:$0xff]   ;;  %v5057_v10 = vld [vmem:[%s8075_s4 + $0x10] ss:$20 sps:$4 sm:$0xff]  }
0x142f   :  { %v5429_v40 = vpop.eup %5428  ;;  %v3928_v63 = vadd.f32 %v3912_v3, %v7952_v56  ;;  %v3894_v43 = vmul.f32 %v5427_v42, %v7873_v49 }
0x1430   :  { %4923 = vmatpush3.bf16.msra.mxu1 %v3944_v6  ;;  %v3927_v36 = vadd.f32 %v3911_v34, %v7952_v56  ;;  %v3893_v58 = vmul.f32 %v5429_v40, %v7879_v28  ;;  %4166 = vrot.lane.b32.xlu1 %v5049_v14, %s5454_s30 }
0x1431   :  { %4924 = vmatprep.subr.bf16.mxu1 %v5462_v55  ;;  %v3910_v53 = vmul.f32 %v3894_v43, %v7945_v31  ;;  %4168 = vrot.lane.b32.xlu0 %v5051_v48, %s5454_s30 }
0x1432   :  { %v5431_v46 = vpop.eup %5430  ;;  %v3943_v12 = vpack.c.bf16 %v3928_v63, %v3927_v36  ;;  %v3909_v13 = vmul.f32 %v3893_v58, %v7945_v31 }
0x1433   :  { %v5433_v35 = vpop.eup %5432  ;;  %v3926_v8 = vadd.f32 %v3910_v53, %v7952_v56  ;;  %v3892_v30 = vmul.f32 %v5431_v46, %v7885_v27 }
0x1434   :  { %4925 = vmatpush3.bf16.msra.mxu1 %v3943_v12  ;;  %v3925_v49 = vadd.f32 %v3909_v13, %v7952_v56  ;;  %v3891_v7 = vmul.f32 %v5433_v35, %v7891_v15  ;;  %4162 = vrot.lane.b32.xlu1 %v5052_v50, %s5454_s30 }
0x1435   :  { %4926 = vmatprep.subr.bf16.mxu1 %v5462_v55  ;;  %v3908_v28 = vmul.f32 %v3892_v30, %v7945_v31  ;;  %4164 = vrot.lane.b32.xlu0 %v5054_v5, %s5454_s30 }
0x1436   :  { %v5435_v60 = vpop.eup %5434  ;;  %v3942_v0 = vpack.c.bf16 %v3926_v8, %v3925_v49  ;;  %v3907_v39 = vmul.f32 %v3891_v7, %v7945_v31  ;;  %v4065_v8 = vld [vmem:[%s8078_s2] sm:$0xf] }
0x1437   :  { %v5437_v23 = vpop.eup %5436  ;;  %v3924_v16 = vadd.f32 %v3908_v28, %v7952_v56  ;;  %v3890_v18 = vmul.f32 %v5435_v60, %v7897_v24 }
0x1438   :  { %4927 = vmatpush3.bf16.msra.mxu1 %v3942_v0  ;;  %v3923_v27 = vadd.f32 %v3907_v39, %v7952_v56  ;;  %v3889_v19 = vmul.f32 %v5437_v23, %v7903_v20  ;;  %4158 = vrot.lane.b32.xlu1 %v5055_v59, %s5454_s30 }
0x1439   :  { %4928 = vmatprep.subr.bf16.mxu1 %v5462_v55  ;;  %v3906_v15 = vmul.f32 %v3890_v18, %v7945_v31  ;;  %4160 = vrot.lane.b32.xlu0 %v5057_v10, %s5454_s30 }
0x143a   :  { %v5439_v33 = vpop.eup %5438  ;;  %v3941_v11 = vpack.c.bf16 %v3924_v16, %v3923_v27  ;;  %v3905_v41 = vmul.f32 %v3889_v19, %v7945_v31  ;;  %v4125_v27 = vld [vmem:[%s8076_s6 + $0x13] ss:$0 sm:$0xff] }
0x143b   :  { %v5441_v26 = vpop.eup %5440  ;;  %v3922_v45 = vadd.f32 %v3906_v15, %v7952_v56  ;;  %v3888_v1 = vmul.f32 %v5439_v33, %v7909_v9  ;;  %v8251_v9 = vld [vmem:[#allocation2_spill] sm:$0xff] }
0x143c   :  { %4929 = vmatpush3.bf16.msra.mxu1 %v3941_v11  ;;  %v3921_v24 = vadd.f32 %v3905_v41, %v7952_v56  ;;  %v3887_v22 = vmul.f32 %v5441_v26, %v7914_v4  ;;  %vm3936_vm3 = vcmp.eq.s32.totalorder %v8251_v9, %v3935_v44  ;;  %v8252_v4 = vmov 1.0|1.0  }
0x143d   :  { %4930 = vmatprep.subr.bf16.mxu1 %v5462_v55  ;;  %v3904_v20 = vmul.f32 %v3888_v1, %v7945_v31  ;;  %vm4328_vm4 = vmpackc.low %vm3936_vm3, %vm3936_vm3 }
0x143e   :  { %v3940_v62 = vpack.c.bf16 %v3922_v45, %v3921_v24  ;;  %v3903_v54 = vmul.f32 %v3887_v22, %v7945_v31  ;;  %v5045_v31 = vld [vmem:[%s8075_s4 + $0xc] ss:$20 sps:$4 sm:$0xff]  }
0x143f   :  { %v3920_v21 = vadd.f32 %v3904_v20, %v7952_v56  ;;  %4945 = vmatpush3.bf16.msra.mxu0 %v5045_v31 }
0x1440   :  { %4931 = vmatpush3.bf16.msra.mxu1 %v3940_v62  ;;  %v3919_v25 = vadd.f32 %v3903_v54, %v7952_v56  ;;  %4956 = vmatprep.subr.bf16.mxu0 %v5462_v55 }
0x1441   :  { %4932 = vmatprep.subr.bf16.mxu1 %v5462_v55 }
0x1442   :  { %v3939_v37 = vpack.c.bf16 %v3920_v21, %v3919_v25 }
0x1444   :  { %4933 = vmatpush3.bf16.msra.mxu1 %v3939_v37 }
0x1445   :  { %4950 = vmatprep.subr.bf16.mxu1 %v5462_v55 }
0x1447   :  { %4935 = vmatmul.mubr.msk.bf16.vlgmr.msra.gmra.mxu1 %vm4328_vm4, %v8252_v4 }
0x1448   :  { %4952 = vmatprep.mubr.msk.bf16.mxu1 %vm5463_vm9, %v5462_v55 }
0x149e   :  { %v4173_v34 = vpop.permute.xlu1 %4172 }
0x149f   :  { %v4171_v40 = vpop.permute.xlu0 %4170 }
0x14a0   :  { %v4178_v63 = vsel %vm312_vm8, %v4171_v40, %v4173_v34 }
0x14a2   :  { %v4167_v43 = vpop.permute.xlu1 %4166 }
0x14a3   :  { %v4169_v36 = vpop.permute.xlu0 %4168 }
0x14a4   :  { %v4177_v53 = vsel %vm312_vm8, %v4167_v43, %v4169_v36 }
0x14a6   :  { %v4163_v13 = vpop.permute.xlu1 %4162 }
0x14a7   :  { %v4165_v35 = vpop.permute.xlu0 %4164 }
0x14a8   :  { %v4176_v30 = vsel %vm312_vm8, %v4163_v13, %v4165_v35 }
0x14aa   :  { %v4159_v49 = vpop.permute.xlu1 %4158 }
0x14ab   :  { %v4161_v7 = vpop.permute.xlu0 %4160 }
0x14ac   :  { %v4175_v28 = vsel %vm312_vm8, %v4159_v49, %v4161_v7 }
0x1507   :  { %v3981_v56 = vpop.f32.mrf.mxu1 }
0x1508   :  { %v3987_v29 = vpack.c.bf16 %v3981_v56, %v3981_v56 }
0x1509   :  { %v4936_v61 = vpop.f32.mrf.mxu1 }
0x150a   :  { %4947 = vmatmul.mubr.msk.bf16.vlgmr.msra.gmra.mxu0 %vm312_vm8, %v3987_v29 }
0x150b   :  { %v3984_v52 = vpop.f32.mrf.mxu1  ;;  %4964 = vmatprep.mubr.msk.bf16.mxu0 %vm5463_vm9, %v5462_v55  ;;  %4957 = vmatpush3.bf16.msra.mxu0 %v4178_v63 }
0x150c   :  { %4958 = vmatprep.subr.bf16.mxu0 %v5462_v55 }
0x150d   :  { %v4937_v32 = vpop.f32.mrf.mxu1 }
0x150f   :  { %4959 = vmatpush3.bf16.msra.mxu0 %v4177_v53 }
0x1510   :  { %4960 = vmatprep.subr.bf16.mxu0 %v5462_v55 }
0x1513   :  { %4961 = vmatpush3.bf16.msra.mxu0 %v4176_v30 }
0x1514   :  { %4962 = vmatprep.subr.bf16.mxu0 %v5462_v55 }
0x1517   :  { %4963 = vmatpush3.bf16.msra.mxu0 %v4175_v28 }
0x15ca   :  { %v4058_v38 = vpop.f32.mrf.mxu0 }
0x15cb   :  { %v4059_v2 = vadd.f32 %v4058_v38, %v3996_v47 }
0x15cc   :  { %v4948_v3 = vpop.f32.mrf.mxu0 }
0x15cd   :  { %5442 = vtanh.f32 %v4059_v2 }
0x15ce   :  { %v4061_v42 = vpop.f32.mrf.mxu0 }
0x15d0   :  { %v4949_v6 = vpop.f32.mrf.mxu0 }
0x15da   :  { %v5443_v58 = vpop.eup %5442 }
0x15db   :  { %v4066_v46 = vpack.c.bf16 %v5443_v58, %v5443_v58 }
0x15dd   :  { %v4073_v12 = vsel %vm4071_vm5, %v4066_v46, 0 }
0x15de   :  { %4951 = vmatpush3.bf16.msra.mxu1 %v4073_v12 }
0x15e1   :  { %4953 = vmatmul.mubr.msk.bf16.vlgmr.msra.gmra.mxu1 %vm4067_vm6, %v4065_v8 }
0x16a1   :  { %v4109_v60 = vpop.f32.mrf.mxu1 }
0x16a2   :  { %v4115_v0 = vadd.f32 %v5443_v58, %v4109_v60 }
0x16a3   :  { %v4954_v39 = vpop.f32.mrf.mxu1 }
0x16a4   :  { %v4116_v23 = vpack.c.bf16 %v4115_v0, %v4115_v0 }
0x16a5   :  { %v4112_v16 = vpop.f32.mrf.mxu1 }
0x16a6   :  { %4965 = vmatmul.mubr.msk.bf16.vlgmr.msra.gmra.mxu0 %vm312_vm8, %v4116_v23 }
0x16a7   :  { %v4955_v18 = vpop.f32.mrf.mxu1 }
0x1766   :  { %v4220_v19 = vpop.f32.mrf.mxu0 }
0x1767   :  { %v4221_v55 = vadd.f32 %v4220_v19, %v4125_v27 }
0x1768   :  { %v4966_v15 = vpop.f32.mrf.mxu0 }
0x1769   :  { %4226 = vst [vmem:[%s8079_s7] sm:$0xff] %v4221_v55 }
0x176a   :  { %v4223_v33 = vpop.f32.mrf.mxu0 }
0x176c   :  { %v4967_v11 = vpop.f32.mrf.mxu0 }

</bundles_post_ra>
